<compile_context>
chip_gen: v7x
topology: tpu7x:2x2x1
jax: 0.10.0
libtpu: 0.0.40
codegen_flags: <defaults>
</compile_context>

<pallas_src>
import jax
import jax.numpy as jnp
from jax.experimental import pallas as pl
from jax.experimental.pallas import tpu as pltpu


def _basic_block_kernel(x_ref, w1_ref, s1_ref, b1_ref, w2_ref, s2_ref, b2_ref,
                        out_ref, xpad_scr, ypad_scr):
    # x_ref    : [H, W, Cin]    f32  (one batch element; leading N squeezed)
    # w1_ref   : [9*Cin, Cout]  bf16 (tap-major im2col weights, conv1)
    # s1/b1    : [1, Cout]      f32  folded BN1 scale / bias
    # w2_ref   : [9*Cout, Cout] bf16 (conv2)
    # s2/b2    : [1, Cout]      f32  folded BN2 scale / bias
    # out_ref  : [H, W, Cout]   f32
    # xpad_scr : [H+2, W+2, Cin]  bf16 VMEM (zero-padded conv1 input)
    # ypad_scr : [H+2, W+2, Cout] bf16 VMEM (zero-padded conv2 input)
    H, W, Cin = x_ref.shape
    Cout = out_ref.shape[2]
    Hp, Wp = H + 2, W + 2

    def zero_border(ref):
        # Zero only the 1-pixel ring (not the whole scratch).
        c = ref.shape[-1]
        ref[0:1, :, :] = jnp.zeros((1, Wp, c), jnp.bfloat16)
        ref[Hp - 1:Hp, :, :] = jnp.zeros((1, Wp, c), jnp.bfloat16)
        ref[:, 0:1, :] = jnp.zeros((Hp, 1, c), jnp.bfloat16)
        ref[:, Wp - 1:Wp, :] = jnp.zeros((Hp, 1, c), jnp.bfloat16)

    def im2col(xp, c):
        # xp: [H+2, W+2, c] -> [H*W, 9*c]; column order = (dy, dx, channel)
        cols = []
        for dy in range(3):
            for dx in range(3):
                cols.append(xp[dy:dy + H, dx:dx + W, :].reshape(H * W, c))
        return jnp.concatenate(cols, axis=-1)

    x = x_ref[...]                                        # f32, identity branch

    # ---- conv1 -> bn1 -> relu  (bf16 matmul operands, f32 accumulate/epilogue)
    zero_border(xpad_scr)
    xpad_scr[1:H + 1, 1:W + 1, :] = x.astype(jnp.bfloat16)
    p1 = im2col(xpad_scr[...], Cin)                       # [H*W, 9*Cin] bf16
    y = jnp.dot(p1, w1_ref[...], preferred_element_type=jnp.float32)
    y = jnp.maximum(y * s1_ref[...] + b1_ref[...], 0.0)   # [H*W, Cout] f32

    # ---- conv2 -> bn2
    zero_border(ypad_scr)
    ypad_scr[1:H + 1, 1:W + 1, :] = y.reshape(H, W, Cout).astype(jnp.bfloat16)
    p2 = im2col(ypad_scr[...], Cout)                      # [H*W, 9*Cout] bf16
    z = jnp.dot(p2, w2_ref[...], preferred_element_type=jnp.float32)
    z = z * s2_ref[...] + b2_ref[...]

    # ---- + identity (f32) -> relu
    z = z + x.reshape(H * W, Cin)
    out_ref[...] = jnp.maximum(z, 0.0).reshape(H, W, Cout).astype(out_ref.dtype)


@jax.jit
def basic_block_forward(x_nchw, w1, g1, be1, rm1, rv1, w2, g2, be2, rm2, rv2,
                        eps=1e-5):
    """Fused BasicBlock forward. x_nchw: [N, C, H, W] -> [N, C, H, W]."""
    N, Cin, H, W = x_nchw.shape
    Cout = w1.shape[0]
    assert Cin == Cout, "BasicBlock residual requires in_planes == out_planes"

    # NCHW -> NHWC once at the boundary.
    x = jnp.transpose(x_nchw, (0, 2, 3, 1)).astype(jnp.float32)

    # PyTorch conv weight [Cout, Cin, 3, 3] -> im2col layout [9*Cin, Cout]
    # (row index = (ky*3 + kx)*Cin + ci), bf16 for the MXU.
    w1t = jnp.transpose(w1, (2, 3, 1, 0)).reshape(9 * Cin, Cout).astype(jnp.bfloat16)
    w2t = jnp.transpose(w2, (2, 3, 1, 0)).reshape(9 * Cout, Cout).astype(jnp.bfloat16)

    # Fold BN (inference) into per-channel scale / bias, kept in f32.
    inv1 = g1 / jnp.sqrt(rv1 + eps)
    inv2 = g2 / jnp.sqrt(rv2 + eps)
    s1 = inv1.reshape(1, Cout).astype(jnp.float32)
    b1 = (be1 - rm1 * inv1).reshape(1, Cout).astype(jnp.float32)
    s2 = inv2.reshape(1, Cout).astype(jnp.float32)
    b2 = (be2 - rm2 * inv2).reshape(1, Cout).astype(jnp.float32)

    flops = 2 * (2 * 9 * N * H * W * Cin * Cout)          # two 3x3 convs
    bytes_accessed = (N * H * W * Cin * 4 + N * H * W * Cout * 4
                      + 9 * Cin * Cout * 2 + 9 * Cout * Cout * 2
                      + 4 * 2 * Cout * 4)

    out_nhwc = pl.pallas_call(
        _basic_block_kernel,
        out_shape=jax.ShapeDtypeStruct((N, H, W, Cout), jnp.float32),
        grid=(N,),
        in_specs=[
            pl.BlockSpec((None, H, W, Cin), lambda n: (n, 0, 0, 0)),
            pl.BlockSpec((9 * Cin, Cout), lambda n: (0, 0)),
            pl.BlockSpec((1, Cout), lambda n: (0, 0)),
            pl.BlockSpec((1, Cout), lambda n: (0, 0)),
            pl.BlockSpec((9 * Cout, Cout), lambda n: (0, 0)),
            pl.BlockSpec((1, Cout), lambda n: (0, 0)),
            pl.BlockSpec((1, Cout), lambda n: (0, 0)),
        ],
        out_specs=pl.BlockSpec((None, H, W, Cout), lambda n: (n, 0, 0, 0)),
        scratch_shapes=[
            pltpu.VMEM((H + 2, W + 2, Cin), jnp.bfloat16),
            pltpu.VMEM((H + 2, W + 2, Cout), jnp.bfloat16),
        ],
        compiler_params=pltpu.CompilerParams(
            dimension_semantics=("parallel",)),
        cost_estimate=pl.CostEstimate(flops=flops, transcendentals=0,
                                      bytes_accessed=bytes_accessed),
    )(x, w1t, s1, b1, w2t, s2, b2)

    # NHWC -> NCHW
    return jnp.transpose(out_nhwc, (0, 3, 1, 2))


if __name__ == "__main__":
    key = jax.random.PRNGKey(0)
    N, C, H, W = 2, 4, 16, 16

    k_x, k_w1, k_w2 = jax.random.split(key, 3)
    x = jax.random.normal(k_x, (N, C, H, W), dtype=jnp.float32)

    # Deterministic parameter init (conv: kaiming-ish scale; BN: default init)
    fan_in = C * 3 * 3
    w1 = jax.random.normal(k_w1, (C, C, 3, 3), dtype=jnp.float32) / jnp.sqrt(fan_in)
    w2 = jax.random.normal(k_w2, (C, C, 3, 3), dtype=jnp.float32) / jnp.sqrt(fan_in)
    gamma1 = jnp.ones((C,), jnp.float32)
    beta1 = jnp.zeros((C,), jnp.float32)
    rmean1 = jnp.zeros((C,), jnp.float32)
    rvar1 = jnp.ones((C,), jnp.float32)
    gamma2 = jnp.ones((C,), jnp.float32)
    beta2 = jnp.zeros((C,), jnp.float32)
    rmean2 = jnp.zeros((C,), jnp.float32)
    rvar2 = jnp.ones((C,), jnp.float32)

    out = basic_block_forward(x, w1, gamma1, beta1, rmean1, rvar1,
                              w2, gamma2, beta2, rmean2, rvar2)
    jax.block_until_ready(out)
    assert out.shape == (N, C, H, W)

    # Reference check (same bf16 quantization of matmul operands as the kernel).
    eps = 1e-5
    q = lambda a: a.astype(jnp.bfloat16).astype(jnp.float32)
    xn = jnp.transpose(x, (0, 2, 3, 1))
    w1h = jnp.transpose(w1, (2, 3, 1, 0))
    w2h = jnp.transpose(w2, (2, 3, 1, 0))
    s1 = gamma1 / jnp.sqrt(rvar1 + eps); b1 = beta1 - rmean1 * s1
    s2 = gamma2 / jnp.sqrt(rvar2 + eps); b2 = beta2 - rmean2 * s2
    dn = ("NHWC", "HWIO", "NHWC")
    y = jax.lax.conv_general_dilated(q(xn), q(w1h), (1, 1), "SAME",
                                     dimension_numbers=dn,
                                     precision=jax.lax.Precision.HIGHEST)
    y = jnp.maximum(y * s1 + b1, 0.0)
    zr = jax.lax.conv_general_dilated(q(y), q(w2h), (1, 1), "SAME",
                                      dimension_numbers=dn,
                                      precision=jax.lax.Precision.HIGHEST)
    ref = jnp.maximum(zr * s2 + b2 + xn, 0.0)
    ref = jnp.transpose(ref, (0, 3, 1, 2))

    err = float(jnp.max(jnp.abs(out - ref)))
    assert err < 2e-2, f"max abs error vs reference too large: {err}"
    print("KERNEL_OK")
</pallas_src>

<mosaic_0001>
module attributes {stable_mosaic.version = 11 : i64} {
  func.func @_basic_block_kernel(%arg0: i32, %arg1: memref<1x16x16x4xf32, #tpu.memory_space<vmem>>, %arg2: memref<36x4xbf16, #tpu.memory_space<vmem>>, %arg3: memref<1x4xf32, #tpu.memory_space<vmem>>, %arg4: memref<1x4xf32, #tpu.memory_space<vmem>>, %arg5: memref<36x4xbf16, #tpu.memory_space<vmem>>, %arg6: memref<1x4xf32, #tpu.memory_space<vmem>>, %arg7: memref<1x4xf32, #tpu.memory_space<vmem>>, %arg8: memref<1x16x16x4xf32, #tpu.memory_space<vmem>>, %arg9: memref<18x18x4xbf16, #tpu.memory_space<vmem>>, %arg10: memref<18x18x4xbf16, #tpu.memory_space<vmem>>) attributes {dimension_semantics = [#tpu.dimension_semantics<parallel>], iteration_bounds = array<i64: 2>, scalar_prefetch = 0 : i64, scratch_operands = 2 : i64, tpu.core_type = #tpu.core_type<tc>, window_params = [{transform_indices = @transform_0, window_bounds = array<i64: 1, 16, 16, 4>}, {pipeline_mode = #tpu.pipeline_mode<synchronous>, transform_indices = @transform_1, window_bounds = array<i64: 36, 4>}, {pipeline_mode = #tpu.pipeline_mode<synchronous>, transform_indices = @transform_2, window_bounds = array<i64: 1, 4>}, {pipeline_mode = #tpu.pipeline_mode<synchronous>, transform_indices = @transform_3, window_bounds = array<i64: 1, 4>}, {pipeline_mode = #tpu.pipeline_mode<synchronous>, transform_indices = @transform_4, window_bounds = array<i64: 36, 4>}, {pipeline_mode = #tpu.pipeline_mode<synchronous>, transform_indices = @transform_5, window_bounds = array<i64: 1, 4>}, {pipeline_mode = #tpu.pipeline_mode<synchronous>, transform_indices = @transform_6, window_bounds = array<i64: 1, 4>}, {transform_indices = @transform_7, window_bounds = array<i64: 1, 16, 16, 4>}]} {
    %c0 = arith.constant 0 : index
    %c0_0 = arith.constant 0 : index
    %c0_1 = arith.constant 0 : index
    %c0_2 = arith.constant 0 : index
    %0 = vector.load %arg1[%c0, %c0_0, %c0_1, %c0_2] : memref<1x16x16x4xf32, #tpu.memory_space<vmem>>, vector<1x16x16x4xf32>
    %1 = vector.shape_cast %0 : vector<1x16x16x4xf32> to vector<16x16x4xf32>
    %cst = arith.constant 0.000000e+00 : bf16
    %2 = vector.broadcast %cst : bf16 to vector<1x18x4xbf16>
    %c0_3 = arith.constant 0 : index
    %c0_4 = arith.constant 0 : index
    %c0_5 = arith.constant 0 : index
    %3 = vector.load %arg9[%c0_3, %c0_4, %c0_5] : memref<18x18x4xbf16, #tpu.memory_space<vmem>>, vector<1x18x4xbf16>
    tpu.vector_store %arg9[%c0_3, %c0_4, %c0_5], %2 {strides = array<i32>} : memref<18x18x4xbf16, #tpu.memory_space<vmem>>, vector<1x18x4xbf16>,
    %cst_6 = arith.constant 0.000000e+00 : bf16
    %4 = vector.broadcast %cst_6 : bf16 to vector<1x18x4xbf16>
    %c17 = arith.constant 17 : index
    %c0_7 = arith.constant 0 : index
    %c0_8 = arith.constant 0 : index
    %5 = vector.load %arg9[%c17, %c0_7, %c0_8] : memref<18x18x4xbf16, #tpu.memory_space<vmem>>, vector<1x18x4xbf16>
    tpu.vector_store %arg9[%c17, %c0_7, %c0_8], %4 {strides = array<i32>} : memref<18x18x4xbf16, #tpu.memory_space<vmem>>, vector<1x18x4xbf16>,
    %cst_9 = arith.constant 0.000000e+00 : bf16
    %6 = vector.broadcast %cst_9 : bf16 to vector<18x1x4xbf16>
    %c0_10 = arith.constant 0 : index
    %c0_11 = arith.constant 0 : index
    %c0_12 = arith.constant 0 : index
    %7 = vector.load %arg9[%c0_10, %c0_11, %c0_12] : memref<18x18x4xbf16, #tpu.memory_space<vmem>>, vector<18x1x4xbf16>
    tpu.vector_store %arg9[%c0_10, %c0_11, %c0_12], %6 {strides = array<i32>} : memref<18x18x4xbf16, #tpu.memory_space<vmem>>, vector<18x1x4xbf16>,
    %cst_13 = arith.constant 0.000000e+00 : bf16
    %8 = vector.broadcast %cst_13 : bf16 to vector<18x1x4xbf16>
    %c0_14 = arith.constant 0 : index
    %c17_15 = arith.constant 17 : index
    %c0_16 = arith.constant 0 : index
    %9 = vector.load %arg9[%c0_14, %c17_15, %c0_16] : memref<18x18x4xbf16, #tpu.memory_space<vmem>>, vector<18x1x4xbf16>
    tpu.vector_store %arg9[%c0_14, %c17_15, %c0_16], %8 {strides = array<i32>} : memref<18x18x4xbf16, #tpu.memory_space<vmem>>, vector<18x1x4xbf16>,
    %10 = arith.truncf %1 : vector<16x16x4xf32> to vector<16x16x4xbf16>
    %c1 = arith.constant 1 : index
    %c1_17 = arith.constant 1 : index
    %c0_18 = arith.constant 0 : index
    %11 = vector.load %arg9[%c1, %c1_17, %c0_18] : memref<18x18x4xbf16, #tpu.memory_space<vmem>>, vector<16x16x4xbf16>
    tpu.vector_store %arg9[%c1, %c1_17, %c0_18], %10 {strides = array<i32>} : memref<18x18x4xbf16, #tpu.memory_space<vmem>>, vector<16x16x4xbf16>,
    %c0_19 = arith.constant 0 : index
    %c0_20 = arith.constant 0 : index
    %c0_21 = arith.constant 0 : index
    %12 = vector.load %arg9[%c0_19, %c0_20, %c0_21] : memref<18x18x4xbf16, #tpu.memory_space<vmem>>, vector<18x18x4xbf16>
    %13 = vector.extract_strided_slice %12 {offsets = [0, 0, 0], sizes = [16, 16, 4], strides = [1, 1, 1]} : vector<18x18x4xbf16> to vector<16x16x4xbf16>
    %14 = vector.shape_cast %13 : vector<16x16x4xbf16> to vector<256x4xbf16>
    %15 = vector.extract_strided_slice %12 {offsets = [0, 1, 0], sizes = [16, 16, 4], strides = [1, 1, 1]} : vector<18x18x4xbf16> to vector<16x16x4xbf16>
    %16 = vector.shape_cast %15 : vector<16x16x4xbf16> to vector<256x4xbf16>
    %17 = vector.extract_strided_slice %12 {offsets = [0, 2, 0], sizes = [16, 16, 4], strides = [1, 1, 1]} : vector<18x18x4xbf16> to vector<16x16x4xbf16>
    %18 = vector.shape_cast %17 : vector<16x16x4xbf16> to vector<256x4xbf16>
    %19 = vector.extract_strided_slice %12 {offsets = [1, 0, 0], sizes = [16, 16, 4], strides = [1, 1, 1]} : vector<18x18x4xbf16> to vector<16x16x4xbf16>
    %20 = vector.shape_cast %19 : vector<16x16x4xbf16> to vector<256x4xbf16>
    %21 = vector.extract_strided_slice %12 {offsets = [1, 1, 0], sizes = [16, 16, 4], strides = [1, 1, 1]} : vector<18x18x4xbf16> to vector<16x16x4xbf16>
    %22 = vector.shape_cast %21 : vector<16x16x4xbf16> to vector<256x4xbf16>
    %23 = vector.extract_strided_slice %12 {offsets = [1, 2, 0], sizes = [16, 16, 4], strides = [1, 1, 1]} : vector<18x18x4xbf16> to vector<16x16x4xbf16>
    %24 = vector.shape_cast %23 : vector<16x16x4xbf16> to vector<256x4xbf16>
    %25 = vector.extract_strided_slice %12 {offsets = [2, 0, 0], sizes = [16, 16, 4], strides = [1, 1, 1]} : vector<18x18x4xbf16> to vector<16x16x4xbf16>
    %26 = vector.shape_cast %25 : vector<16x16x4xbf16> to vector<256x4xbf16>
    %27 = vector.extract_strided_slice %12 {offsets = [2, 1, 0], sizes = [16, 16, 4], strides = [1, 1, 1]} : vector<18x18x4xbf16> to vector<16x16x4xbf16>
    %28 = vector.shape_cast %27 : vector<16x16x4xbf16> to vector<256x4xbf16>
    %29 = vector.extract_strided_slice %12 {offsets = [2, 2, 0], sizes = [16, 16, 4], strides = [1, 1, 1]} : vector<18x18x4xbf16> to vector<16x16x4xbf16>
    %30 = vector.shape_cast %29 : vector<16x16x4xbf16> to vector<256x4xbf16>
    %31 = tpu.concatenate %14, %16, %18, %20, %22, %24, %26, %28, %30 in 1 : vector<256x4xbf16>, vector<256x4xbf16>, vector<256x4xbf16>, vector<256x4xbf16>, vector<256x4xbf16>, vector<256x4xbf16>, vector<256x4xbf16>, vector<256x4xbf16>, vector<256x4xbf16> -> vector<256x36xbf16>
    %c0_22 = arith.constant 0 : index
    %c0_23 = arith.constant 0 : index
    %32 = vector.load %arg2[%c0_22, %c0_23] : memref<36x4xbf16, #tpu.memory_space<vmem>>, vector<36x4xbf16>
    %cst_24 = arith.constant dense<0.000000e+00> : vector<256x4xf32>
    %33 = tpu.matmul %31, %32, %cst_24 {dimension_numbers = #tpu.dot_dimension_numbers<[1], [0], [0], [1], [0, 0, 1, 1], [], []>} : vector<256x36xbf16>, vector<36x4xbf16>, vector<256x4xf32> -> vector<256x4xf32>
    %c0_25 = arith.constant 0 : index
    %c0_26 = arith.constant 0 : index
    %34 = vector.load %arg3[%c0_25, %c0_26] : memref<1x4xf32, #tpu.memory_space<vmem>>, vector<1x4xf32>
    %35 = vector.broadcast %34 : vector<1x4xf32> to vector<256x4xf32>
    %36 = arith.mulf %33, %35 : vector<256x4xf32>
    %c0_27 = arith.constant 0 : index
    %c0_28 = arith.constant 0 : index
    %37 = vector.load %arg4[%c0_27, %c0_28] : memref<1x4xf32, #tpu.memory_space<vmem>>, vector<1x4xf32>
    %38 = vector.broadcast %37 : vector<1x4xf32> to vector<256x4xf32>
    %39 = arith.addf %36, %38 : vector<256x4xf32>
    %cst_29 = arith.constant 0.000000e+00 : f32
    %40 = vector.broadcast %cst_29 : f32 to vector<256x4xf32>
    %41 = arith.maximumf %39, %40 : vector<256x4xf32>
    %cst_30 = arith.constant 0.000000e+00 : bf16
    %42 = vector.broadcast %cst_30 : bf16 to vector<1x18x4xbf16>
    %c0_31 = arith.constant 0 : index
    %c0_32 = arith.constant 0 : index
    %c0_33 = arith.constant 0 : index
    %43 = vector.load %arg10[%c0_31, %c0_32, %c0_33] : memref<18x18x4xbf16, #tpu.memory_space<vmem>>, vector<1x18x4xbf16>
    tpu.vector_store %arg10[%c0_31, %c0_32, %c0_33], %42 {strides = array<i32>} : memref<18x18x4xbf16, #tpu.memory_space<vmem>>, vector<1x18x4xbf16>,
    %cst_34 = arith.constant 0.000000e+00 : bf16
    %44 = vector.broadcast %cst_34 : bf16 to vector<1x18x4xbf16>
    %c17_35 = arith.constant 17 : index
    %c0_36 = arith.constant 0 : index
    %c0_37 = arith.constant 0 : index
    %45 = vector.load %arg10[%c17_35, %c0_36, %c0_37] : memref<18x18x4xbf16, #tpu.memory_space<vmem>>, vector<1x18x4xbf16>
    tpu.vector_store %arg10[%c17_35, %c0_36, %c0_37], %44 {strides = array<i32>} : memref<18x18x4xbf16, #tpu.memory_space<vmem>>, vector<1x18x4xbf16>,
    %cst_38 = arith.constant 0.000000e+00 : bf16
    %46 = vector.broadcast %cst_38 : bf16 to vector<18x1x4xbf16>
    %c0_39 = arith.constant 0 : index
    %c0_40 = arith.constant 0 : index
    %c0_41 = arith.constant 0 : index
    %47 = vector.load %arg10[%c0_39, %c0_40, %c0_41] : memref<18x18x4xbf16, #tpu.memory_space<vmem>>, vector<18x1x4xbf16>
    tpu.vector_store %arg10[%c0_39, %c0_40, %c0_41], %46 {strides = array<i32>} : memref<18x18x4xbf16, #tpu.memory_space<vmem>>, vector<18x1x4xbf16>,
    %cst_42 = arith.constant 0.000000e+00 : bf16
    %48 = vector.broadcast %cst_42 : bf16 to vector<18x1x4xbf16>
    %c0_43 = arith.constant 0 : index
    %c17_44 = arith.constant 17 : index
    %c0_45 = arith.constant 0 : index
    %49 = vector.load %arg10[%c0_43, %c17_44, %c0_45] : memref<18x18x4xbf16, #tpu.memory_space<vmem>>, vector<18x1x4xbf16>
    tpu.vector_store %arg10[%c0_43, %c17_44, %c0_45], %48 {strides = array<i32>} : memref<18x18x4xbf16, #tpu.memory_space<vmem>>, vector<18x1x4xbf16>,
    %50 = vector.shape_cast %41 : vector<256x4xf32> to vector<16x16x4xf32>
    %51 = arith.truncf %50 : vector<16x16x4xf32> to vector<16x16x4xbf16>
    %c1_46 = arith.constant 1 : index
    %c1_47 = arith.constant 1 : index
    %c0_48 = arith.constant 0 : index
    %52 = vector.load %arg10[%c1_46, %c1_47, %c0_48] : memref<18x18x4xbf16, #tpu.memory_space<vmem>>, vector<16x16x4xbf16>
    tpu.vector_store %arg10[%c1_46, %c1_47, %c0_48], %51 {strides = array<i32>} : memref<18x18x4xbf16, #tpu.memory_space<vmem>>, vector<16x16x4xbf16>,
    %c0_49 = arith.constant 0 : index
    %c0_50 = arith.constant 0 : index
    %c0_51 = arith.constant 0 : index
    %53 = vector.load %arg10[%c0_49, %c0_50, %c0_51] : memref<18x18x4xbf16, #tpu.memory_space<vmem>>, vector<18x18x4xbf16>
    %54 = vector.extract_strided_slice %53 {offsets = [0, 0, 0], sizes = [16, 16, 4], strides = [1, 1, 1]} : vector<18x18x4xbf16> to vector<16x16x4xbf16>
    %55 = vector.shape_cast %54 : vector<16x16x4xbf16> to vector<256x4xbf16>
    %56 = vector.extract_strided_slice %53 {offsets = [0, 1, 0], sizes = [16, 16, 4], strides = [1, 1, 1]} : vector<18x18x4xbf16> to vector<16x16x4xbf16>
    %57 = vector.shape_cast %56 : vector<16x16x4xbf16> to vector<256x4xbf16>
    %58 = vector.extract_strided_slice %53 {offsets = [0, 2, 0], sizes = [16, 16, 4], strides = [1, 1, 1]} : vector<18x18x4xbf16> to vector<16x16x4xbf16>
    %59 = vector.shape_cast %58 : vector<16x16x4xbf16> to vector<256x4xbf16>
    %60 = vector.extract_strided_slice %53 {offsets = [1, 0, 0], sizes = [16, 16, 4], strides = [1, 1, 1]} : vector<18x18x4xbf16> to vector<16x16x4xbf16>
    %61 = vector.shape_cast %60 : vector<16x16x4xbf16> to vector<256x4xbf16>
    %62 = vector.extract_strided_slice %53 {offsets = [1, 1, 0], sizes = [16, 16, 4], strides = [1, 1, 1]} : vector<18x18x4xbf16> to vector<16x16x4xbf16>
    %63 = vector.shape_cast %62 : vector<16x16x4xbf16> to vector<256x4xbf16>
    %64 = vector.extract_strided_slice %53 {offsets = [1, 2, 0], sizes = [16, 16, 4], strides = [1, 1, 1]} : vector<18x18x4xbf16> to vector<16x16x4xbf16>
    %65 = vector.shape_cast %64 : vector<16x16x4xbf16> to vector<256x4xbf16>
    %66 = vector.extract_strided_slice %53 {offsets = [2, 0, 0], sizes = [16, 16, 4], strides = [1, 1, 1]} : vector<18x18x4xbf16> to vector<16x16x4xbf16>
    %67 = vector.shape_cast %66 : vector<16x16x4xbf16> to vector<256x4xbf16>
    %68 = vector.extract_strided_slice %53 {offsets = [2, 1, 0], sizes = [16, 16, 4], strides = [1, 1, 1]} : vector<18x18x4xbf16> to vector<16x16x4xbf16>
    %69 = vector.shape_cast %68 : vector<16x16x4xbf16> to vector<256x4xbf16>
    %70 = vector.extract_strided_slice %53 {offsets = [2, 2, 0], sizes = [16, 16, 4], strides = [1, 1, 1]} : vector<18x18x4xbf16> to vector<16x16x4xbf16>
    %71 = vector.shape_cast %70 : vector<16x16x4xbf16> to vector<256x4xbf16>
    %72 = tpu.concatenate %55, %57, %59, %61, %63, %65, %67, %69, %71 in 1 : vector<256x4xbf16>, vector<256x4xbf16>, vector<256x4xbf16>, vector<256x4xbf16>, vector<256x4xbf16>, vector<256x4xbf16>, vector<256x4xbf16>, vector<256x4xbf16>, vector<256x4xbf16> -> vector<256x36xbf16>
    %c0_52 = arith.constant 0 : index
    %c0_53 = arith.constant 0 : index
    %73 = vector.load %arg5[%c0_52, %c0_53] : memref<36x4xbf16, #tpu.memory_space<vmem>>, vector<36x4xbf16>
    %cst_54 = arith.constant dense<0.000000e+00> : vector<256x4xf32>
    %74 = tpu.matmul %72, %73, %cst_54 {dimension_numbers = #tpu.dot_dimension_numbers<[1], [0], [0], [1], [0, 0, 1, 1], [], []>} : vector<256x36xbf16>, vector<36x4xbf16>, vector<256x4xf32> -> vector<256x4xf32>
    %c0_55 = arith.constant 0 : index
    %c0_56 = arith.constant 0 : index
    %75 = vector.load %arg6[%c0_55, %c0_56] : memref<1x4xf32, #tpu.memory_space<vmem>>, vector<1x4xf32>
    %76 = vector.broadcast %75 : vector<1x4xf32> to vector<256x4xf32>
    %77 = arith.mulf %74, %76 : vector<256x4xf32>
    %c0_57 = arith.constant 0 : index
    %c0_58 = arith.constant 0 : index
    %78 = vector.load %arg7[%c0_57, %c0_58] : memref<1x4xf32, #tpu.memory_space<vmem>>, vector<1x4xf32>
    %79 = vector.broadcast %78 : vector<1x4xf32> to vector<256x4xf32>
    %80 = arith.addf %77, %79 : vector<256x4xf32>
    %81 = vector.shape_cast %1 : vector<16x16x4xf32> to vector<256x4xf32>
    %82 = arith.addf %80, %81 : vector<256x4xf32>
    %cst_59 = arith.constant 0.000000e+00 : f32
    %83 = vector.broadcast %cst_59 : f32 to vector<256x4xf32>
    %84 = arith.maximumf %82, %83 : vector<256x4xf32>
    %85 = vector.shape_cast %84 : vector<256x4xf32> to vector<16x16x4xf32>
    %c0_60 = arith.constant 0 : index
    %c0_61 = arith.constant 0 : index
    %c0_62 = arith.constant 0 : index
    %c0_63 = arith.constant 0 : index
    %86 = vector.load %arg8[%c0_60, %c0_61, %c0_62, %c0_63] : memref<1x16x16x4xf32, #tpu.memory_space<vmem>>, vector<1x16x16x4xf32>
    %87 = vector.shape_cast %86 : vector<1x16x16x4xf32> to vector<16x16x4xf32>
    %88 = vector.shape_cast %85 : vector<16x16x4xf32> to vector<1x16x16x4xf32>
    tpu.vector_store %arg8[%c0_60, %c0_61, %c0_62, %c0_63], %88 {strides = array<i32>} : memref<1x16x16x4xf32, #tpu.memory_space<vmem>>, vector<1x16x16x4xf32>,
    return
  }
  func.func @transform_0(%arg0: i32) -> (i32, i32, i32, i32) {
    %c0_i32 = arith.constant 0 : i32
    %c0_i32_0 = arith.constant 0 : i32
    %c0_i32_1 = arith.constant 0 : i32
    %c0_i32_2 = arith.constant 0 : i32
    return %arg0, %c0_i32, %c0_i32_0, %c0_i32_1 : i32, i32, i32, i32
  }
  func.func @transform_1(%arg0: i32) -> (i32, i32) {
    %c0_i32 = arith.constant 0 : i32
    %c0_i32_0 = arith.constant 0 : i32
    %c0_i32_1 = arith.constant 0 : i32
    return %c0_i32, %c0_i32_0 : i32, i32
  }
  func.func @transform_2(%arg0: i32) -> (i32, i32) {
    %c0_i32 = arith.constant 0 : i32
    %c0_i32_0 = arith.constant 0 : i32
    %c0_i32_1 = arith.constant 0 : i32
    return %c0_i32, %c0_i32_0 : i32, i32
  }
  func.func @transform_3(%arg0: i32) -> (i32, i32) {
    %c0_i32 = arith.constant 0 : i32
    %c0_i32_0 = arith.constant 0 : i32
    %c0_i32_1 = arith.constant 0 : i32
    return %c0_i32, %c0_i32_0 : i32, i32
  }
  func.func @transform_4(%arg0: i32) -> (i32, i32) {
    %c0_i32 = arith.constant 0 : i32
    %c0_i32_0 = arith.constant 0 : i32
    %c0_i32_1 = arith.constant 0 : i32
    return %c0_i32, %c0_i32_0 : i32, i32
  }
  func.func @transform_5(%arg0: i32) -> (i32, i32) {
    %c0_i32 = arith.constant 0 : i32
    %c0_i32_0 = arith.constant 0 : i32
    %c0_i32_1 = arith.constant 0 : i32
    return %c0_i32, %c0_i32_0 : i32, i32
  }
  func.func @transform_6(%arg0: i32) -> (i32, i32) {
    %c0_i32 = arith.constant 0 : i32
    %c0_i32_0 = arith.constant 0 : i32
    %c0_i32_1 = arith.constant 0 : i32
    return %c0_i32, %c0_i32_0 : i32, i32
  }
  func.func @transform_7(%arg0: i32) -> (i32, i32, i32, i32) {
    %c0_i32 = arith.constant 0 : i32
    %c0_i32_0 = arith.constant 0 : i32
    %c0_i32_1 = arith.constant 0 : i32
    %c0_i32_2 = arith.constant 0 : i32
    return %arg0, %c0_i32, %c0_i32_0, %c0_i32_1 : i32, i32, i32, i32
  }
}

</mosaic_0001>

<bundles_post_ra>
// kernel: basic_block_forward.1
= control target key start
LH: loop header
LB: loop body
LE: loop exit
PB: predicated region body
PF: predicated region fallthrough
CT: control target
= control target key end

     0   :  { %s5705_s24 = smov 0   ;;  %s8536_s0 = inlined_call_operand.vmem [shape: f32[2,16,16,4], index: 0, kind: input, shape index: {}]   ;;  %s8537_s1 = inlined_call_operand.vmem [shape: bf16[36,4], index: 1, kind: input, shape index: {}]   ;;  %s8538_s2 = inlined_call_operand.vmem [shape: f32[1,4], index: 2, kind: input, shape index: {}]   ;;  %s8539_s3 = inlined_call_operand.vmem [shape: f32[1,4], index: 3, kind: input, shape index: {}]   ;;  %s8540_s4 = inlined_call_operand.vmem [shape: bf16[36,4], index: 4, kind: input, shape index: {}]   ;;  %s8541_s5 = inlined_call_operand.vmem [shape: f32[1,4], index: 5, kind: input, shape index: {}]   ;;  %s8542_s6 = inlined_call_operand.vmem [shape: f32[1,4], index: 6, kind: input, shape index: {}]   ;;  %s8543_s7 = inlined_call_operand.vmem [shape: f32[2,16,16,4], index: 7, kind: output, shape index: {}]  }
   0x1 LB: > { %s5110_s25 = sadd.s32 4294967295, %s5654_s24   ;;  %p5114_p0 = scmp.ge.s32.totalorder %s5654_s24, 1  ;;  %s5654_s24 = sphi %s5705_s24, %s17_s24  }
   0x2   : > { %p237_p1 = scmp.lt.s32.totalorder %s5654_s24, 3 }
   0x4   : > { %p238_p2 = pnand %p5114_p0, %p237_p1 }
   0x6   : > { %241 = sbr.rel (%p238_p2) target bundleno = 1048 (0x418), region = 48 }
   0xd   : > { %vm312_vm0 = vcmask 27648   ;;  %vm315_vm1 = vcmask 24576   ;;  %vm322_vm2 = vsmask.f32 256  ;;  %v5656_v0 = vmov 0   ;;  %p269_p3 = scmp.lt.s32.totalorder %s5110_s25, 1 }
   0xe   : > { %313 = vst.msk [vmem:[#allocation2] sm:$0xf] %vm312_vm0, %v5656_v0  ;;  %314 = vst.msk [vmem:[#allocation2 + $0x4] sm:$0xf] %vm312_vm0, %v5656_v0  ;;  %vm378_vm4 = vsmask.f32 7938 }
   0xf   : > { %316 = vst.msk [vmem:[#allocation2 + $0x8] sm:$0x1] %vm315_vm1, %v5656_v0  ;;  %vm5718_vm3 = vmand %vm315_vm1, %vm322_vm2  ;;  %v327_v2 = vld [vmem:[#allocation2 + $0xc] sm:$0x1]  ;;  %v330_v3 = vld [vmem:[#allocation2 + $0x18] sm:$0x1] }
  0x10   : > { %318 = vst.msk [vmem:[#allocation2 + $0xcc] sm:$0xf] %vm312_vm0, %v5656_v0  ;;  %319 = vst.msk [vmem:[#allocation2 + $0xd0] sm:$0xf] %vm312_vm0, %v5656_v0  ;;  %s8617_s25 = smov (!%p269_p3, %s5110_s25), 1  ;;  %v328_v4 = vsel %vm5718_vm3, 0, %v327_v2 }
  0x11   : > { %320 = vst.msk [vmem:[#allocation2 + $0xd4] sm:$0x1] %vm315_vm1, %v5656_v0  ;;  %2667 = vst.msk [vmem:[#allocation3 + $0x8] sm:$0x1] %vm315_vm1, %v5656_v0  ;;  %v331_v5 = vsel %vm5718_vm3, 0, %v330_v3  ;;  %s5371_s26 = sshll.u32 %s8617_s25, 8 }
  0x12   : > { %2665 = vst.msk [vmem:[#allocation3] sm:$0xf] %vm312_vm0, %v5656_v0  ;;  %2666 = vst.msk [vmem:[#allocation3 + $0x4] sm:$0xf] %vm312_vm0, %v5656_v0  ;;  %v333_v6 = vld [vmem:[#allocation2 + $0x24] sm:$0x1]  ;;  %s5751_s29 = scalar_lea.vmem %s8536_s0, %s5371_s26 }
  0x13   : > { %2669 = vst.msk [vmem:[#allocation3 + $0xcc] sm:$0xf] %vm312_vm0, %v5656_v0  ;;  %2670 = vst.msk [vmem:[#allocation3 + $0xd0] sm:$0xf] %vm312_vm0, %v5656_v0  ;;  %v334_v7 = vsel %vm5718_vm3, 0, %v333_v6  ;;  %vm1456_vm6 = vcmask 1042432  }
  0x14   : > { %2671 = vst.msk [vmem:[#allocation3 + $0xd4] sm:$0x1] %vm315_vm1, %v5656_v0  ;;  %329 = vst [vmem:[#allocation2 + $0xc] sm:$0x1] %v328_v4  ;;  %v383_v9 = vld [vmem:[#allocation2 + $0x14] sm:$0x1] }
  0x15   : > { %332 = vst [vmem:[#allocation2 + $0x18] sm:$0x1] %v331_v5  ;;  %vm5741_vm5 = vmand %vm315_vm1, %vm378_vm4  ;;  %v386_v10 = vld [vmem:[#allocation2 + $0x20] sm:$0x1]  ;;  %vm1457_vm7 = vcmask 1046532   ;;  %v281_v15 = vld [vmem:[%s5751_s29 + $0x8] sm:$0xff] }
  0x16   : > { %335 = vst [vmem:[#allocation2 + $0x24] sm:$0x1] %v334_v7  ;;  %v384_v11 = vsel %vm5741_vm5, 0, %v383_v9  ;;  %v387_v12 = vsel %vm5741_vm5, 0, %v386_v10  ;;  %v389_v13 = vld [vmem:[#allocation2 + $0x2c] sm:$0x1]  ;;  %v5374_v22 = vpack.c.bf16 %v281_v15, %v281_v15  ;;  %vm5782_vm10 = vmand %vm312_vm0, %vm378_vm4 }
  0x17   : > { %v280_v14 = vld [vmem:[%s5751_s29] sm:$0xff]  ;;  %vm530_vm8 = vsmask.f32 4368  ;;  %v282_v16 = vld [vmem:[%s5751_s29 + $0x10] sm:$0xff]  ;;  %385 = vst [vmem:[#allocation2 + $0x14] sm:$0x1] %v384_v11  ;;  %vm5795_vm13 = vmor %vm1456_vm6, %vm1457_vm7 }
  0x18   : > { %388 = vst [vmem:[#allocation2 + $0x20] sm:$0x1] %v387_v12  ;;  %v390_v17 = vsel %vm5741_vm5, 0, %v389_v13  ;;  %v324_v18 = vld [vmem:[#allocation2] sm:$0x1]  ;;  %v5373_v21 = vpack.c.bf16 %v280_v14, %v280_v14  ;;  %v5375_v23 = vpack.c.bf16 %v282_v16, %v282_v16  ;;  %v283_v27 = vld [vmem:[%s5751_s29 + $0x18] sm:$0xff]  ;;  %vm5774_vm9 = vmor %vm322_vm2, %vm530_vm8 }
  0x19   : > { %v380_v19 = vld [vmem:[#allocation2 + $0x8] sm:$0x1]  ;;  %v5762_v20 = vld [vmem:[#allocation2 + $0x4] sm:$0xf]  ;;  %391 = vst [vmem:[#allocation2 + $0x2c] sm:$0x1] %v390_v17  ;;  %v5376_v35 = vpack.c.bf16 %v283_v27, %v283_v27 }
  0x1a   : > { %v325_v24 = vsel %vm5718_vm3, 0, %v324_v18  ;;  %v381_v25 = vsel %vm5741_vm5, 0, %v380_v19  ;;  %v1461_v26 = vrot.slane %v5762_v20, 5  ;;  %v284_v28 = vld [vmem:[%s5751_s29 + $0x20] sm:$0xff]  ;;  %v285_v29 = vld [vmem:[%s5751_s29 + $0x28] sm:$0xff]  ;;  %v533_v30 = vshrl.u32 %v5373_v21, 16 }
  0x1b   : > { %326 = vst [vmem:[#allocation2] sm:$0x1] %v325_v24  ;;  %382 = vst [vmem:[#allocation2 + $0x8] sm:$0x1] %v381_v25  ;;  %v536_v31 = vshll.u32 %v5373_v21, 16  ;;  %v541_v32 = vshrl.u32 %v5374_v22, 16  ;;  %v5377_v41 = vpack.c.bf16 %v284_v28, %v284_v28  ;;  %v5378_v42 = vpack.c.bf16 %v285_v29, %v285_v29 }
  0x1c   : > { %v544_v33 = vshll.u32 %v5374_v22, 16  ;;  %v1463_v34 = vrot.slane %v1461_v26, 4  ;;  %v550_v36 = vshrl.u32 %v5375_v23, 16  ;;  %v553_v37 = vshll.u32 %v5375_v23, 16  ;;  %v855_v44 = vld [vmem:[#allocation2 + $0xc] sm:$0xf] }
  0x1d   : > { %v535_v39 = vrot.slane %v533_v30, 7  ;;  %v5778_v40 = vrot.slane %v541_v32, 7  ;;  %v558_v46 = vshrl.u32 %v5376_v35, 16  ;;  %v561_v47 = vshll.u32 %v5376_v35, 16  ;;  %v862_v53 = vld [vmem:[#allocation2 + $0x18] sm:$0xf] }
  0x1e   : > { %v552_v45 = vrot.slane %v550_v36, 7  ;;  %v1034_v48 = vshll.u32 %v5762_v20, 16  ;;  %v567_v57 = vshrl.u32 %v5377_v41, 16  ;;  %v570_v60 = vshll.u32 %v5377_v41, 16  ;;  %v869_v11 = vld [vmem:[#allocation2 + $0x24] sm:$0xf] }
  0x1f   : > { %v538_v49 = vor.u32 %v536_v31, %v535_v39  ;;  %v539_v50 = vrot.slane %v535_v39, 4  ;;  %v546_v51 = vor.u32 %v544_v33, %v5778_v40  ;;  %v548_v52 = vrot.slane %v5778_v40, 4  ;;  %v859_v21 = vld [vmem:[#allocation2 + $0x14] sm:$0x1]  ;;  %v866_v22 = vld [vmem:[#allocation2 + $0x20] sm:$0x1] }
  0x20   : > { %v555_v54 = vor.u32 %v553_v37, %v552_v45  ;;  %v556_v55 = vrot.slane %v552_v45, 4  ;;  %v560_v56 = vrot.slane %v558_v46, 7  ;;  %v575_v61 = vshrl.u32 %v5378_v42, 16  ;;  %v873_v28 = vld [vmem:[#allocation2 + $0x2c] sm:$0x1]  ;;  %v286_v29 = vld [vmem:[%s5751_s29 + $0x30] sm:$0xff] }
  0x21   : > { %v547_v58 = vsel %vm5774_vm9, %v539_v50, %v546_v51  ;;  %v856_v59 = vsel %vm5782_vm10, %v538_v49, %v855_v44  ;;  %vm1021_vm11 = vsmask.f32 3328  ;;  %vm1022_vm12 = vsmask.f32 7440  ;;  %v336_v30 = vld [vmem:[#allocation2 + $0x30] sm:$0x1] }
  0x22   : > { %v967_v62 = vld [vmem:[#allocation2] sm:$0xf]  ;;  %v969_v63 = vld [vmem:[#allocation2 + $0x8] sm:$0x1]  ;;  %857 = vst [vmem:[#allocation2 + $0xc] sm:$0xf] %v856_v59  ;;  %v563_v2 = vor.u32 %v561_v47, %v560_v56  ;;  %v863_v4 = vsel %vm5782_vm10, %v555_v54, %v862_v53  ;;  %v860_v36 = vsel %vm5718_vm3, %v548_v52, %v859_v21  ;;  %v5827_v44 = vpack.c.bf16 %v286_v29, %v286_v29  ;;  %vm5842_vm14 = vmor %vm1021_vm11, %vm1022_vm12 }
  0x23   : > { %858 = vst.msk [vmem:[#allocation2 + $0x10] sm:$0xf] %vm312_vm0, %v547_v58  ;;  %v565_v3 = vrot.slane %v560_v56, 4  ;;  %v569_v5 = vrot.slane %v567_v57, 7  ;;  %v1044_v6 = vshll.u32 %v969_v63, 16  ;;  %v5151_v7 = vrot.slane %v967_v62, 9 }
  0x24   : > { %v1464_v9 = vrot.slane %v969_v63, 5  ;;  %864 = vst [vmem:[#allocation2 + $0x18] sm:$0xf] %v863_v4  ;;  %v577_v10 = vrot.slane %v575_v61, 7  ;;  %v564_v12 = vsel %vm5774_vm9, %v556_v55, %v563_v2  ;;  %v578_v15 = vshll.u32 %v5378_v42, 16  ;;  %s5657_s30 = smov 8  }
  0x25   : > { %v572_v13 = vor.u32 %v570_v60, %v569_v5  ;;  %v573_v14 = vrot.slane %v569_v5, 4  ;;  %v1462_v16 = vsel %vm5795_vm13, %v5151_v7, %v1461_v26  ;;  %865 = vst.msk [vmem:[#allocation2 + $0x1c] sm:$0xf] %vm312_vm0, %v564_v12  ;;  %v1025_v19 = vshrl.u32 %v967_v62, 16  ;;  %861 = vst [vmem:[#allocation2 + $0x14] sm:$0x1] %v860_v36 }
  0x26   : > { %v1465_v17 = vsel %vm5795_vm13, %v1463_v34, %v1464_v9  ;;  %v582_v18 = vrot.slane %v577_v10, 4  ;;  %v580_v24 = vor.u32 %v578_v15, %v577_v10  ;;  %v1028_v27 = vshll.u32 %v967_v62, 16  ;;  %s5658_s8 = smov 12   ;;  %s5659_s9 = smov 24  }
  0x27   : > { %v5201_v23 = vcombine.low %v1462_v16, %v1465_v17  ;;  %v870_v25 = vsel %vm5782_vm10, %v572_v13, %v869_v11  ;;  %v1027_v26 = vrot.slane %v1025_v19, 4  ;;  %v1036_v31 = vrot.slane %v1034_v48, 5  ;;  %s5660_s10 = smov 4   ;;  %s5661_s11 = smov 20  }
  0x28   : > { %871 = vst [vmem:[#allocation2 + $0x24] sm:$0xf] %v870_v25  ;;  %v1038_v32 = vshrl.u32 %v5762_v20, 16  ;;  %v1046_v33 = vrot.slane %v1044_v6, 5  ;;  %v581_v34 = vsel %vm5774_vm9, %v573_v14, %v580_v24  ;;  %v1030_v35 = vrot.slane %v1028_v27, 5  ;;  %s5662_s14 = smov 32  }
  0x29   : > { %1815 = vrot.lane.b32.xlu1 %v5201_v23, %s5657_s30  ;;  %v867_v37 = vsel %vm5718_vm3, %v565_v3, %v866_v22  ;;  %v970_v39 = vld [vmem:[#allocation2 + $0xc] sm:$0xf]  ;;  %872 = vst.msk [vmem:[#allocation2 + $0x28] sm:$0xf] %vm312_vm0, %v581_v34  ;;  %v874_v41 = vsel %vm5718_vm3, %v582_v18, %v873_v28  ;;  %v337_v42 = vsel %vm5718_vm3, 0, %v336_v30  ;;  %s5663_s17 = smov 16  }
  0x2a   : > { %v5820_v40 = vld [vmem:[#allocation2 + $0x10] sm:$0xf]  ;;  %v1040_v20 = vrot.slane %v1038_v32, 4  ;;  %868 = vst [vmem:[#allocation2 + $0x20] sm:$0x1] %v867_v37  ;;  %v1049_v48 = vshrl.u32 %v970_v39, 16  ;;  %v1031_v53 = vor.u32 %v1030_v35, %v1027_v26 }
  0x2b   : > { %v1058_v45 = vshll.u32 %v5820_v40, 16  ;;  %v1062_v46 = vshrl.u32 %v5820_v40, 16  ;;  %v5832_v47 = vcombine.low %v970_v39, %v5820_v40  ;;  %v973_v49 = vld [vmem:[#allocation2 + $0x18] sm:$0xf]  ;;  %875 = vst [vmem:[#allocation2 + $0x2c] sm:$0x1] %v874_v41 }
  0x2c   : > { %338 = vst [vmem:[#allocation2 + $0x30] sm:$0x1] %v337_v42  ;;  %v1052_v50 = vshll.u32 %v970_v39, 16  ;;  %v1073_v51 = vshrl.u32 %v973_v49, 16  ;;  %v1076_v52 = vshll.u32 %v973_v49, 16  ;;  %v5838_v55 = vrot.slane %v1049_v48, 4 }
  0x2d   : > { %v5834_v54 = vrot.slane %v1062_v46, 4  ;;  %1850 = vrot.lane.b32.xlu0 %v5832_v47, %s5658_s8  ;;  %v974_v56 = vld [vmem:[#allocation2 + $0x1c] sm:$0xf]  ;;  %v1041_v58 = vor.u32 %v1040_v20, %v1036_v31  ;;  %v5152_v59 = vrot.slane %v970_v39, 9  ;;  %v1032_v63 = vrot.slane %v1031_v53, 4  ;;  %s5664_s18 = smov 28  }
  0x2e   : > { %v5846_v60 = vrot.slane %v1052_v50, 5  ;;  %v1086_v61 = vshrl.u32 %v974_v56, 16  ;;  %v5848_v62 = vcombine.low %v973_v49, %v974_v56  ;;  %v1468_v4 = vrot.slane %v5820_v40, 5  ;;  %v5859_v14 = vld [vmem:[#allocation2 + $0x14] sm:$0x1] }
  0x2f   : > { %v976_v2 = vld [vmem:[#allocation2 + $0x24] sm:$0xf]  ;;  %v1042_v3 = vrot.slane %v1041_v58, 4  ;;  %v5153_v5 = vrot.slane %v973_v49, 9  ;;  %v1475_v6 = vrot.slane %v974_v56, 5  ;;  %v1037_v10 = vsel %vm5842_vm14, %v1032_v63, %v1036_v31 }
  0x30   : > { %1852 = vrot.lane.b32.xlu1 %v5848_v62, %s5658_s8  ;;  %v1097_v7 = vshrl.u32 %v976_v2, 16  ;;  %v1100_v9 = vshll.u32 %v976_v2, 16  ;;  %v1075_v11 = vrot.slane %v1073_v51, 4  ;;  %v977_v12 = vld [vmem:[#allocation2 + $0x28] sm:$0xf]  ;;  %v1469_v15 = vsel %vm5795_vm13, %v5152_v59, %v1468_v4  ;;  %v5580_v63 = vld [vmem:[%s8537_s1] sm:$0xff]  }
  0x31   : > { %1955 = vrot.lane.b32.xlu0 %v5848_v62, %s5659_s9  ;;  %v1047_v13 = vsel %vm5842_vm14, %v1042_v3, %v1046_v33  ;;  %v1470_v16 = vrot.slane %v1468_v4, 4  ;;  %v1476_v17 = vsel %vm5795_vm13, %v5153_v5, %v1475_v6  ;;  %v1110_v18 = vshrl.u32 %v977_v12, 16  ;;  %v975_v23 = vld [vmem:[#allocation2 + $0x20] sm:$0x1]  ;;  %5475 = vmatprep.subr.bf16.mxu0 %v5580_v63 }
  0x32   : > { %v5865_v19 = vcombine.low %v976_v2, %v977_v12  ;;  %v5185_v21 = vcombine.low %v1037_v10, %v1047_v13  ;;  %v1471_v22 = vrot.slane %v5859_v14, 5  ;;  %v1477_v24 = vrot.slane %v1475_v6, 4  ;;  %v978_v29 = vld [vmem:[#allocation2 + $0x2c] sm:$0x1]  ;;  %v287_v6 = vld [vmem:[%s5751_s29 + $0x38] sm:$0xff]  ;;  %5476 = vmatpush3.bf16.msra.mxu0 %v5580_v63 }
  0x33   : > { %v1478_v25 = vrot.slane %v975_v23, 5  ;;  %v1078_v27 = vrot.slane %v1076_v52, 5  ;;  %v1082_v28 = vshll.u32 %v974_v56, 16  ;;  %v1088_v26 = vrot.slane %v1086_v61, 4 }
  0x34   : > { %1957 = vrot.lane.b32.xlu1 %v5865_v19, %s5659_s9  ;;  %v1472_v30 = vsel %vm5795_vm13, %v1470_v16, %v1471_v22  ;;  %v1092_v31 = vshll.u32 %v975_v23, 16  ;;  %v5154_v32 = vrot.slane %v976_v2, 9  ;;  %v1482_v20 = vrot.slane %v977_v12, 5 }
  0x35   : > { %1735 = vrot.lane.b32.xlu0 %v5185_v21, %s5660_s10  ;;  %v5202_v33 = vcombine.low %v1469_v15, %v1472_v30  ;;  %v1479_v34 = vsel %vm5795_vm13, %v1477_v24, %v1478_v25  ;;  %v1079_v35 = vor.u32 %v1078_v27, %v1075_v11  ;;  %v1084_v36 = vrot.slane %v1082_v28, 5  ;;  %v339_v21 = vld [vmem:[#allocation2 + $0x3c] sm:$0x1]  ;;  %v289_v27 = vld [vmem:[%s5751_s29 + $0x48] sm:$0xff] }
  0x36   : > { %v5875_v37 = vcombine.low %v1476_v17, %v1479_v34  ;;  %v1094_v39 = vrot.slane %v1092_v31, 5  ;;  %v1485_v41 = vrot.slane %v978_v29, 5  ;;  %v1099_v48 = vrot.slane %v1097_v7, 4 }
  0x37   : > { %v1080_v42 = vrot.slane %v1079_v35, 4  ;;  %v1089_v46 = vor.u32 %v1088_v26, %v1084_v36  ;;  %v1102_v49 = vrot.slane %v1100_v9, 5  ;;  %v1483_v50 = vsel %vm5795_vm13, %v5154_v32, %v1482_v20  ;;  %v395_v26 = vld [vmem:[#allocation2 + $0x44] sm:$0x1]  ;;  %v876_v32 = vld [vmem:[#allocation2 + $0x30] sm:$0xf] }
  0x38   : > { %1817 = vrot.lane.b32.xlu1 %v5202_v33, %s5657_s30  ;;  %v1484_v51 = vrot.slane %v1482_v20, 4  ;;  %v1106_v52 = vshll.u32 %v977_v12, 16  ;;  %v1112_v53 = vrot.slane %v1110_v18, 4  ;;  %v1116_v61 = vshll.u32 %v978_v29, 16  ;;  %v288_v18 = vld [vmem:[%s5751_s29 + $0x40] sm:$0xff] }
  0x39   : > { %1920 = vrot.lane.b32.xlu0 %v5202_v33, %s5661_s11  ;;  %v1085_v56 = vsel %vm5842_vm14, %v1080_v42, %v1084_v36  ;;  %v1090_v58 = vrot.slane %v1089_v46, 4  ;;  %v1103_v59 = vor.u32 %v1102_v49, %v1099_v48  ;;  %v1055_v4 = vor.u32 %v5846_v60, %v5838_v55  ;;  %v342_v35 = vld [vmem:[#allocation2 + $0x48] sm:$0x1] }
  0x3a   : > { %v1486_v2 = vsel %vm5795_vm13, %v1484_v51, %v1485_v41  ;;  %v1108_v3 = vrot.slane %v1106_v52, 5  ;;  %v1060_v5 = vrot.slane %v1058_v45, 5  ;;  %v1118_v11 = vrot.slane %v1116_v61, 5  ;;  %v392_v45 = vld [vmem:[#allocation2 + $0x38] sm:$0x1] }
  0x3b   : > { %v1095_v7 = vsel %vm5842_vm14, %v1090_v58, %v1094_v39  ;;  %v5895_v9 = vcombine.low %v1483_v50, %v1486_v2  ;;  %v1104_v10 = vrot.slane %v1103_v59, 4  ;;  %v1056_v55 = vrot.slane %v1055_v4, 4  ;;  %v290_v50 = vld [vmem:[%s5751_s29 + $0x50] sm:$0xff]  ;;  %v291_v51 = vld [vmem:[%s5751_s29 + $0x58] sm:$0xff] }
  0x3c   : > { %1922 = vrot.lane.b32.xlu1 %v5875_v37, %s5661_s11  ;;  %v5899_v12 = vcombine.low %v1085_v56, %v1095_v7  ;;  %v1113_v13 = vor.u32 %v1112_v53, %v1108_v3  ;;  %v1065_v40 = vor.u32 %v5834_v54, %v1060_v5  ;;  %v1068_v15 = vshll.u32 %v5859_v14, 16  ;;  %v5581_v54 = vld [vmem:[%s8537_s1 + $0x8] sm:$0xff]   ;;  %v398_v52 = vld [vmem:[#allocation2 + $0x50] sm:$0x1] }
  0x3d   : > { %2025 = vrot.lane.b32.xlu0 %v5875_v37, %s5662_s14  ;;  %v1109_v60 = vsel %vm5842_vm14, %v1104_v10, %v1108_v3  ;;  %v5380_v16 = vpack.c.bf16 %v287_v6, %v287_v6  ;;  %v584_v17 = vshrl.u32 %v5827_v44, 16  ;;  %v1061_v23 = vsel %vm5842_vm14, %v1056_v55, %v1060_v5  ;;  %5477 = vmatprep.subr.bf16.mxu0 %v5581_v54  ;;  %v345_v10 = vld [vmem:[#allocation2 + $0x54] sm:$0x1] }
  0x3e   : > { %v1114_v22 = vrot.slane %v1113_v13, 4  ;;  %v1066_v24 = vrot.slane %v1065_v40, 4  ;;  %v587_v25 = vshll.u32 %v5827_v44, 16  ;;  %v1070_v28 = vrot.slane %v1068_v15, 5  ;;  %5478 = vmatpush3.bf16.msra.mxu0 %v5581_v54 }
  0x3f   : > { %v586_v29 = vrot.slane %v584_v17, 7  ;;  %v592_v14 = vshrl.u32 %v5380_v16, 16  ;;  %v595_v30 = vshll.u32 %v5380_v16, 16  ;;  %v393_v33 = vsel %vm5741_vm5, 0, %v392_v45 }
  0x40   : > { %1887 = vrot.lane.b32.xlu1 %v5899_v12, %s5663_s17  ;;  %v1119_v31 = vsel %vm5842_vm14, %v1114_v22, %v1118_v11  ;;  %v340_v44 = vsel %vm5718_vm3, 0, %v339_v21  ;;  %v5381_v34 = vpack.c.bf16 %v288_v18, %v288_v18  ;;  %v1071_v39 = vsel %vm5842_vm14, %v1066_v24, %v1070_v28  ;;  %394 = vst [vmem:[#allocation2 + $0x38] sm:$0x1] %v393_v33  ;;  %v292_v28 = vld [vmem:[%s5751_s29 + $0x60] sm:$0xff] }
  0x41   : > { %2027 = vrot.lane.b32.xlu0 %v5895_v9, %s5662_s14  ;;  %v5926_v36 = vcombine.low %v1109_v60, %v1119_v31  ;;  %v589_v20 = vor.u32 %v587_v25, %v586_v29  ;;  %v590_v41 = vrot.slane %v586_v29, 4  ;;  %341 = vst [vmem:[#allocation2 + $0x3c] sm:$0x1] %v340_v44  ;;  %v5186_v42 = vcombine.low %v1061_v23, %v1071_v39 }
  0x42   : > { %v594_v46 = vrot.slane %v592_v14, 7  ;;  %v5382_v48 = vpack.c.bf16 %v289_v27, %v289_v27  ;;  %v601_v49 = vshrl.u32 %v5381_v34, 16  ;;  %v604_v56 = vshll.u32 %v5381_v34, 16  ;;  %v293_v14 = vld [vmem:[%s5751_s29 + $0x68] sm:$0xff] }
  0x43   : > { %v877_v53 = vsel %vm5782_vm10, %v589_v20, %v876_v32  ;;  %v396_v58 = vsel %vm5741_vm5, 0, %v395_v26  ;;  %v343_v59 = vsel %vm5718_vm3, 0, %v342_v35  ;;  %v5383_v5 = vpack.c.bf16 %v290_v50, %v290_v50 }
  0x44   : > { %1992 = vrot.lane.b32.xlu1 %v5926_v36, %s5664_s18  ;;  %v597_v61 = vor.u32 %v595_v30, %v594_v46  ;;  %v599_v63 = vrot.slane %v594_v46, 4  ;;  %878 = vst [vmem:[#allocation2 + $0x30] sm:$0xf] %v877_v53  ;;  %v603_v2 = vrot.slane %v601_v49, 7  ;;  %v609_v3 = vshrl.u32 %v5382_v48, 16 }
  0x45   : > { %397 = vst [vmem:[#allocation2 + $0x44] sm:$0x1] %v396_v58  ;;  %344 = vst [vmem:[#allocation2 + $0x48] sm:$0x1] %v343_v59  ;;  %1737 = vrot.lane.b32.xlu0 %v5186_v42, %s5660_s10  ;;  %v612_v4 = vshll.u32 %v5382_v48, 16  ;;  %v5384_v6 = vpack.c.bf16 %v291_v51, %v291_v51  ;;  %v399_v7 = vsel %vm5741_vm5, 0, %v398_v52  ;;  %v5386_v53 = vpack.c.bf16 %v293_v14, %v293_v14 }
  0x46   : > { %v598_v11 = vsel %vm5774_vm9, %v590_v41, %v597_v61  ;;  %v606_v13 = vor.u32 %v604_v56, %v603_v2  ;;  %v607_v55 = vrot.slane %v603_v2, 4  ;;  %v611_v40 = vrot.slane %v609_v3, 7  ;;  %400 = vst [vmem:[#allocation2 + $0x50] sm:$0x1] %v399_v7 }
  0x47   : > { %879 = vst.msk [vmem:[#allocation2 + $0x34] sm:$0xf] %vm312_vm0, %v598_v11  ;;  %v618_v45 = vshrl.u32 %v5383_v5, 16  ;;  %v621_v60 = vshll.u32 %v5383_v5, 16  ;;  %v626_v15 = vshrl.u32 %v5384_v6, 16  ;;  %v629_v16 = vshll.u32 %v5384_v6, 16 }
  0x48   : > { %1739 = vrot.lane.b32.xlu1 %v5899_v12, %s5660_s10  ;;  %v880_v17 = vld [vmem:[#allocation2 + $0x38] sm:$0x1]  ;;  %v614_v18 = vor.u32 %v612_v4, %v611_v40  ;;  %v616_v21 = vrot.slane %v611_v40, 4  ;;  %v883_v54 = vld [vmem:[#allocation2 + $0x3c] sm:$0xf]  ;;  %v346_v22 = vsel %vm5718_vm3, 0, %v345_v10  ;;  %v5968_v41 = vpack.c.bf16 %v292_v28, %v292_v28 }
  0x49   : > { %1885 = vrot.lane.b32.xlu0 %v5186_v42, %s5663_s17  ;;  %v881_v23 = vsel %vm5718_vm3, %v599_v63, %v880_v17  ;;  %v884_v24 = vsel %vm5782_vm10, %v606_v13, %v883_v54  ;;  %v620_v25 = vrot.slane %v618_v45, 7  ;;  %v628_v27 = vrot.slane %v626_v15, 7  ;;  %347 = vst [vmem:[#allocation2 + $0x54] sm:$0x1] %v346_v22 }
  0x4a   : > { %882 = vst [vmem:[#allocation2 + $0x38] sm:$0x1] %v881_v23  ;;  %v615_v29 = vsel %vm5774_vm9, %v607_v55, %v614_v18  ;;  %885 = vst [vmem:[#allocation2 + $0x3c] sm:$0xf] %v884_v24  ;;  %v635_v63 = vshrl.u32 %v5968_v41, 16  ;;  %v643_v13 = vshrl.u32 %v5386_v53, 16 }
  0x4b   : > { %v5959_v30 = vld [vmem:[#allocation2 + $0x30] sm:$0xf]  ;;  %886 = vst.msk [vmem:[#allocation2 + $0x40] sm:$0xf] %vm312_vm0, %v615_v29  ;;  %v623_v31 = vor.u32 %v621_v60, %v620_v25  ;;  %v624_v32 = vrot.slane %v620_v25, 4  ;;  %v631_v33 = vor.u32 %v629_v16, %v628_v27  ;;  %v633_v44 = vrot.slane %v628_v27, 4 }
  0x4c   : > { %v887_v26 = vld [vmem:[#allocation2 + $0x44] sm:$0x1]  ;;  %1741 = vrot.lane.b32.xlu1 %v5926_v36, %s5660_s10  ;;  %v1121_v34 = vshrl.u32 %v5959_v30, 16  ;;  %v1124_v35 = vshll.u32 %v5959_v30, 16  ;;  %v890_v20 = vld [vmem:[#allocation2 + $0x48] sm:$0xf] }
  0x4d   : > { %v888_v39 = vsel %vm5718_vm3, %v616_v21, %v887_v26  ;;  %1990 = vrot.lane.b32.xlu0 %v5899_v12, %s5664_s18  ;;  %v632_v42 = vsel %vm5774_vm9, %v624_v32, %v631_v33  ;;  %v891_v46 = vsel %vm5782_vm10, %v623_v31, %v890_v20  ;;  %v894_v48 = vld [vmem:[#allocation2 + $0x50] sm:$0x1]  ;;  %v5155_v5 = vrot.slane %v5959_v30, 9 }
  0x4e   : > { %889 = vst [vmem:[#allocation2 + $0x44] sm:$0x1] %v888_v39  ;;  %v980_v49 = vld [vmem:[#allocation2 + $0x34] sm:$0xf]  ;;  %v1123_v50 = vrot.slane %v1121_v34, 4  ;;  %v1126_v51 = vrot.slane %v1124_v35, 5  ;;  %v895_v52 = vsel %vm5718_vm3, %v633_v44, %v894_v48 }
  0x4f   : > { %892 = vst [vmem:[#allocation2 + $0x48] sm:$0xf] %v891_v46  ;;  %893 = vst.msk [vmem:[#allocation2 + $0x4c] sm:$0xf] %vm312_vm0, %v632_v42  ;;  %v1134_v56 = vshrl.u32 %v980_v49, 16  ;;  %v1130_v12 = vshll.u32 %v980_v49, 16  ;;  %v5982_v59 = vcombine.low %v5959_v30, %v980_v49 }
  0x50   : > { %v1489_v58 = vrot.slane %v980_v49, 5  ;;  %896 = vst [vmem:[#allocation2 + $0x50] sm:$0x1] %v895_v52  ;;  %1821 = vrot.lane.b32.xlu1 %v5895_v9, %s5657_s30  ;;  %v1127_v61 = vor.u32 %v1126_v51, %v1123_v50  ;;  %v637_v18 = vrot.slane %v635_v63, 7  ;;  %v646_v23 = vshll.u32 %v5386_v53, 16  ;;  %v294_v63 = vld [vmem:[%s5751_s29 + $0x70] sm:$0xff] }
  0x51   : > { %1819 = vrot.lane.b32.xlu0 %v5875_v37, %s5657_s30  ;;  %v981_v2 = vld [vmem:[#allocation2 + $0x38] sm:$0x1]  ;;  %v1132_v3 = vrot.slane %v1130_v12, 5  ;;  %v1136_v4 = vrot.slane %v1134_v56, 4  ;;  %v5988_v11 = vld [vmem:[#allocation2 + $0x3c] sm:$0xf] }
  0x52   : > { %v1128_v6 = vrot.slane %v1127_v61, 4  ;;  %v1140_v7 = vshll.u32 %v981_v2, 16  ;;  %v1491_v10 = vrot.slane %v1489_v58, 4  ;;  %v1492_v40 = vrot.slane %v981_v2, 5  ;;  %v5990_v45 = vld [vmem:[#allocation2 + $0x40] sm:$0xf] }
  0x53   : > { %v1137_v55 = vor.u32 %v1136_v4, %v1132_v3  ;;  %v1145_v60 = vshrl.u32 %v5988_v11, 16  ;;  %v1148_v15 = vshll.u32 %v5988_v11, 16  ;;  %v1158_v16 = vshrl.u32 %v5990_v45, 16  ;;  %v897_v53 = vld [vmem:[#allocation2 + $0x54] sm:$0xf] }
  0x54   : > { %1856 = vrot.lane.b32.xlu1 %v5982_v59, %s5658_s8  ;;  %v1142_v37 = vrot.slane %v1140_v7, 5  ;;  %v1133_v21 = vsel %vm5842_vm14, %v1128_v6, %v1132_v3  ;;  %v1154_v25 = vshll.u32 %v5990_v45, 16  ;;  %v6004_v28 = vrot.slane %v643_v13, 7  ;;  %v401_v56 = vld [vmem:[#allocation2 + $0x5c] sm:$0x1] }
  0x55   : > { %v5997_v17 = vld [vmem:[#allocation2 + $0x44] sm:$0x1]  ;;  %1854 = vrot.lane.b32.xlu0 %v5865_v19, %s5658_s8  ;;  %v1138_v54 = vrot.slane %v1137_v55, 4  ;;  %v1147_v22 = vrot.slane %v1145_v60, 4  ;;  %v1150_v24 = vrot.slane %v1148_v15, 5  ;;  %v1160_v27 = vrot.slane %v1158_v16, 4 }
  0x56   : > { %v1490_v14 = vsel %vm5795_vm13, %v5155_v5, %v1489_v58  ;;  %v1493_v30 = vsel %vm5795_vm13, %v1491_v10, %v1492_v40  ;;  %v1164_v26 = vshll.u32 %v5997_v17, 16  ;;  %v1156_v33 = vrot.slane %v1154_v25, 5  ;;  %v6022_v39 = vld [vmem:[#allocation2 + $0x48] sm:$0xf]  ;;  %v6026_v50 = vld [vmem:[#allocation2 + $0x4c] sm:$0xf] }
  0x57   : > { %v1143_v29 = vsel %vm5842_vm14, %v1138_v54, %v1142_v37  ;;  %v1151_v32 = vor.u32 %v1150_v24, %v1147_v22  ;;  %v638_v44 = vshll.u32 %v5968_v41, 16  ;;  %v6020_v34 = vcombine.low %v1490_v14, %v1493_v30  ;;  %v348_v2 = vld [vmem:[#allocation2 + $0x60] sm:$0x1]  ;;  %v404_v7 = vld [vmem:[#allocation2 + $0x68] sm:$0x1] }
  0x58   : > { %v6013_v31 = vcombine.low %v1133_v21, %v1143_v29  ;;  %v1161_v35 = vor.u32 %v1160_v27, %v1156_v33  ;;  %v641_v20 = vrot.slane %v637_v18, 4  ;;  %v648_v42 = vor.u32 %v646_v23, %v6004_v28  ;;  %v351_v10 = vld [vmem:[#allocation2 + $0x6c] sm:$0x1]  ;;  %v296_v16 = vld [vmem:[%s5751_s29 + $0x80] sm:$0xff]  ;;  %v407_v22 = vld [vmem:[#allocation2 + $0x74] sm:$0x1] }
  0x59   : > { %1889 = vrot.lane.b32.xlu0 %v5926_v36, %s5663_s17  ;;  %v1152_v46 = vrot.slane %v1151_v32, 4  ;;  %v1166_v48 = vrot.slane %v1164_v26, 5  ;;  %v1496_v41 = vrot.slane %v5990_v45, 5  ;;  %v640_v36 = vor.u32 %v638_v44, %v637_v18  ;;  %v6072_v29 = vld [vmem:[#allocation2 + $0x50] sm:$0x1] }
  0x5a   : > { %1891 = vrot.lane.b32.xlu1 %v6013_v31, %s5663_s17  ;;  %v1162_v49 = vrot.slane %v1161_v35, 4  ;;  %v1169_v51 = vshrl.u32 %v6022_v39, 16  ;;  %v1172_v52 = vshll.u32 %v6022_v39, 16  ;;  %v6036_v12 = vcombine.low %v5988_v11, %v5990_v45 }
  0x5b   : > { %v5156_v58 = vrot.slane %v5988_v11, 9  ;;  %v649_v61 = vsel %vm5774_vm9, %v641_v20, %v648_v42  ;;  %v1157_v3 = vsel %vm5842_vm14, %v1152_v46, %v1156_v33  ;;  %v1182_v5 = vshrl.u32 %v6026_v50, 16  ;;  %v297_v46 = vld [vmem:[%s5751_s29 + $0x88] sm:$0xff] }
  0x5c   : > { %v1167_v4 = vsel %vm5842_vm14, %v1162_v49, %v1166_v48  ;;  %v1178_v6 = vshll.u32 %v6026_v50, 16  ;;  %900 = vst.msk [vmem:[#allocation2 + $0x58] sm:$0xf] %vm312_vm0, %v649_v61  ;;  %v1498_v11 = vrot.slane %v1496_v41, 4  ;;  %v1499_v13 = vrot.slane %v5997_v17, 5 }
  0x5d   : > { %1924 = vrot.lane.b32.xlu0 %v5895_v9, %s5661_s11  ;;  %v295_v9 = vld [vmem:[%s5751_s29 + $0x78] sm:$0xff]  ;;  %v898_v55 = vsel %vm5782_vm10, %v640_v36, %v897_v53  ;;  %v402_v40 = vsel %vm5741_vm5, 0, %v401_v56  ;;  %v6057_v45 = vrot.slane %v1169_v51, 4  ;;  %v1174_v60 = vrot.slane %v1172_v52, 5 }
  0x5e   : > { %1926 = vrot.lane.b32.xlu1 %v6020_v34, %s5661_s11  ;;  %899 = vst [vmem:[#allocation2 + $0x54] sm:$0xf] %v898_v55  ;;  %403 = vst [vmem:[#allocation2 + $0x5c] sm:$0x1] %v402_v40  ;;  %v349_v15 = vsel %vm5718_vm3, 0, %v348_v2  ;;  %v5387_v37 = vpack.c.bf16 %v294_v63, %v294_v63  ;;  %v6064_v17 = vcombine.low %v1157_v3, %v1167_v4  ;;  %v405_v21 = vsel %vm5741_vm5, 0, %v404_v7 }
  0x5f   : > { %350 = vst [vmem:[#allocation2 + $0x60] sm:$0x1] %v349_v15  ;;  %v5388_v18 = vpack.c.bf16 %v295_v9, %v295_v9  ;;  %v352_v54 = vsel %vm5718_vm3, 0, %v351_v10  ;;  %v6070_v23 = vrot.slane %v1178_v6, 5  ;;  %v1184_v24 = vrot.slane %v1182_v5, 4  ;;  %v298_v63 = vld [vmem:[%s5751_s29 + $0x90] sm:$0xff] }
  0x60   : > { %v652_v25 = vshrl.u32 %v5387_v37, 16  ;;  %v655_v27 = vshll.u32 %v5387_v37, 16  ;;  %406 = vst [vmem:[#allocation2 + $0x68] sm:$0x1] %v405_v21  ;;  %353 = vst [vmem:[#allocation2 + $0x6c] sm:$0x1] %v352_v54  ;;  %v5389_v26 = vpack.c.bf16 %v296_v16, %v296_v16  ;;  %v1497_v35 = vsel %vm5795_vm13, %v5156_v58, %v1496_v41 }
  0x61   : > { %1959 = vrot.lane.b32.xlu0 %v5982_v59, %s5659_s9  ;;  %v660_v14 = vshrl.u32 %v5388_v18, 16  ;;  %v663_v30 = vshll.u32 %v5388_v18, 16  ;;  %v650_v32 = vrot.slane %v6004_v28, 4  ;;  %v408_v44 = vsel %vm5741_vm5, 0, %v407_v22  ;;  %v354_v40 = vld [vmem:[#allocation2 + $0x78] sm:$0x1] }
  0x62   : > { %1961 = vrot.lane.b32.xlu1 %v6036_v12, %s5659_s9  ;;  %v654_v33 = vrot.slane %v652_v25, 7  ;;  %v1500_v20 = vsel %vm5795_vm13, %v1498_v11, %v1499_v13  ;;  %409 = vst [vmem:[#allocation2 + $0x74] sm:$0x1] %v408_v44  ;;  %v1175_v48 = vor.u32 %v1174_v60, %v6057_v45  ;;  %v1185_v28 = vor.u32 %v1184_v24, %v6070_v23  ;;  %v410_v18 = vld [vmem:[#allocation2 + $0x80] sm:$0x1] }
  0x63   : > { %v662_v42 = vrot.slane %v660_v14, 7  ;;  %v1188_v49 = vshll.u32 %v6072_v29, 16  ;;  %v669_v61 = vshrl.u32 %v5389_v26, 16  ;;  %v6092_v41 = vcombine.low %v1497_v35, %v1500_v20  ;;  %v6104_v6 = vld [vmem:[#allocation2 + $0x58] sm:$0xf] }
  0x64   : > { %v657_v36 = vor.u32 %v655_v27, %v654_v33  ;;  %v658_v52 = vrot.slane %v654_v33, 4  ;;  %v5157_v58 = vrot.slane %v6022_v39, 9  ;;  %v5390_v3 = vpack.c.bf16 %v297_v46, %v297_v46  ;;  %v299_v35 = vld [vmem:[%s5751_s29 + $0x98] sm:$0xff] }
  0x65   : > { %1994 = vrot.lane.b32.xlu0 %v6013_v31, %s5664_s18  ;;  %v901_v51 = vld [vmem:[#allocation2 + $0x5c] sm:$0x1]  ;;  %v665_v53 = vor.u32 %v663_v30, %v662_v42  ;;  %v667_v56 = vrot.slane %v662_v42, 4  ;;  %v6101_v4 = vcombine.low %v6022_v39, %v6026_v50  ;;  %v1503_v5 = vrot.slane %v6026_v50, 5  ;;  %v6106_v13 = vld [vmem:[#allocation2 + $0x54] sm:$0xf] }
  0x66   : > { %1996 = vrot.lane.b32.xlu1 %v6064_v17, %s5664_s18  ;;  %v902_v9 = vsel %vm5718_vm3, %v650_v32, %v901_v51  ;;  %v904_v2 = vld [vmem:[#allocation2 + $0x60] sm:$0xf]  ;;  %v672_v10 = vshll.u32 %v5389_v26, 16  ;;  %v1190_v11 = vrot.slane %v1188_v49, 5  ;;  %v5391_v45 = vpack.c.bf16 %v298_v63, %v298_v63 }
  0x67   : > { %903 = vst [vmem:[#allocation2 + $0x5c] sm:$0x1] %v902_v9  ;;  %v908_v7 = vld [vmem:[#allocation2 + $0x68] sm:$0x1]  ;;  %v666_v55 = vsel %vm5774_vm9, %v658_v52, %v665_v53  ;;  %v1176_v60 = vrot.slane %v1175_v48, 4  ;;  %v1186_v15 = vrot.slane %v1185_v28, 4 }
  0x68   : > { %907 = vst.msk [vmem:[#allocation2 + $0x64] sm:$0xf] %vm312_vm0, %v666_v55  ;;  %v909_v37 = vsel %vm5718_vm3, %v667_v56, %v908_v7  ;;  %v671_v16 = vrot.slane %v669_v61, 7  ;;  %v1206_v21 = vshrl.u32 %v6104_v6, 16  ;;  %v1202_v54 = vshll.u32 %v6104_v6, 16 }
  0x69   : > { %2029 = vrot.lane.b32.xlu0 %v6020_v34, %s5662_s14  ;;  %910 = vst [vmem:[#allocation2 + $0x68] sm:$0x1] %v909_v37  ;;  %v677_v22 = vshrl.u32 %v5390_v3, 16  ;;  %v680_v24 = vshll.u32 %v5390_v3, 16  ;;  %v911_v25 = vld [vmem:[#allocation2 + $0x6c] sm:$0xf]  ;;  %v1181_v42 = vsel %vm5842_vm14, %v1176_v60, %v6070_v23  ;;  %v5392_v61 = vpack.c.bf16 %v299_v35, %v299_v35 }
  0x6a   : > { %1743 = vrot.lane.b32.xlu1 %v6013_v31, %s5660_s10  ;;  %v905_v31 = vsel %vm5782_vm10, %v657_v36, %v904_v2  ;;  %v1193_v27 = vshrl.u32 %v6106_v13, 16  ;;  %v1196_v14 = vshll.u32 %v6106_v13, 16  ;;  %v674_v30 = vor.u32 %v672_v10, %v671_v16  ;;  %v915_v28 = vld [vmem:[#allocation2 + $0x74] sm:$0x1]  ;;  %v357_v35 = vld [vmem:[#allocation2 + $0x84] sm:$0x1] }
  0x6b   : > { %906 = vst [vmem:[#allocation2 + $0x60] sm:$0xf] %v905_v31  ;;  %v355_v26 = vsel %vm5718_vm3, 0, %v354_v40  ;;  %v1506_v32 = vrot.slane %v6072_v29, 5  ;;  %v675_v33 = vrot.slane %v671_v16, 4  ;;  %v679_v44 = vrot.slane %v677_v22, 7 }
  0x6c   : > { %356 = vst [vmem:[#allocation2 + $0x78] sm:$0x1] %v355_v26  ;;  %v686_v20 = vshrl.u32 %v5391_v45, 16  ;;  %v1505_v46 = vrot.slane %v1503_v5, 4  ;;  %v912_v48 = vsel %vm5782_vm10, %v674_v30, %v911_v25  ;;  %v411_v49 = vsel %vm5741_vm5, 0, %v410_v18 }
  0x6d   : > { %2031 = vrot.lane.b32.xlu0 %v6092_v41, %s5662_s14  ;;  %v1191_v29 = vsel %vm5842_vm14, %v1186_v15, %v1190_v11  ;;  %v6140_v36 = vrot.slane %v1202_v54, 5  ;;  %v682_v51 = vor.u32 %v680_v24, %v679_v44  ;;  %v684_v23 = vrot.slane %v679_v44, 4  ;;  %913 = vst [vmem:[#allocation2 + $0x6c] sm:$0xf] %v912_v48  ;;  %412 = vst [vmem:[#allocation2 + $0x80] sm:$0x1] %v411_v49 }
  0x6e   : > { %1745 = vrot.lane.b32.xlu1 %v6064_v17, %s5660_s10  ;;  %v1195_v52 = vrot.slane %v1193_v27, 4  ;;  %v1198_v53 = vrot.slane %v1196_v14, 5  ;;  %v1208_v56 = vrot.slane %v1206_v21, 4  ;;  %v688_v9 = vrot.slane %v686_v20, 7  ;;  %v990_v3 = vld [vmem:[#allocation2 + $0x5c] sm:$0x1] }
  0x6f   : > { %v683_v63 = vsel %vm5774_vm9, %v675_v33, %v682_v51  ;;  %v689_v2 = vshll.u32 %v5391_v45, 16  ;;  %v6153_v7 = vcombine.low %v1181_v42, %v1191_v29  ;;  %v1504_v10 = vsel %vm5795_vm13, %v5157_v58, %v1503_v5  ;;  %v300_v24 = vld [vmem:[%s5751_s29 + $0xa0] sm:$0xff] }
  0x70   : > { %914 = vst.msk [vmem:[#allocation2 + $0x70] sm:$0xf] %vm312_vm0, %v683_v63  ;;  %v1199_v11 = vor.u32 %v1198_v53, %v1195_v52  ;;  %v1209_v55 = vor.u32 %v1208_v56, %v6140_v36  ;;  %v1507_v31 = vsel %vm5795_vm13, %v1505_v46, %v1506_v32  ;;  %v1212_v40 = vshll.u32 %v990_v3, 16  ;;  %v301_v46 = vld [vmem:[%s5751_s29 + $0xa8] sm:$0xff] }
  0x71   : > { %1823 = vrot.lane.b32.xlu0 %v6020_v34, %s5657_s30  ;;  %v916_v34 = vsel %vm5718_vm3, %v684_v23, %v915_v28  ;;  %v691_v45 = vor.u32 %v689_v2, %v688_v9  ;;  %v694_v60 = vshrl.u32 %v5392_v61, 16  ;;  %v6168_v39 = vcombine.low %v1504_v10, %v1507_v31  ;;  %v5583_v53 = vld [vmem:[%s8537_s1 + $0x10] ss:$0 sps:$4 sm:$0x33]   ;;  %v6217_v56 = vld [vmem:[#allocation2 + $0x68] sm:$0x1] }
  0x72   : > { %1825 = vrot.lane.b32.xlu1 %v6092_v41, %s5657_s30  ;;  %917 = vst [vmem:[#allocation2 + $0x74] sm:$0x1] %v916_v34  ;;  %v1200_v50 = vrot.slane %v1199_v11, 4  ;;  %v1210_v58 = vrot.slane %v1209_v55, 4  ;;  %v1510_v5 = vrot.slane %v6104_v6, 5  ;;  %v1214_v37 = vrot.slane %v1212_v40, 5 }
  0x73   : > { %v918_v15 = vld [vmem:[#allocation2 + $0x78] sm:$0xf]  ;;  %v696_v16 = vrot.slane %v694_v60, 7  ;;  %v697_v18 = vshll.u32 %v5392_v61, 16  ;;  %v6173_v54 = vld [vmem:[#allocation2 + $0x60] sm:$0xf]  ;;  %v6184_v25 = vcombine.low %v6106_v13, %v6104_v6  ;;  %v5393_v48 = vpack.c.bf16 %v300_v24, %v300_v24 }
  0x74   : > { %v919_v21 = vsel %vm5782_vm10, %v691_v45, %v918_v15  ;;  %v692_v22 = vrot.slane %v688_v9, 4  ;;  %v1205_v27 = vsel %vm5842_vm14, %v1200_v50, %v6140_v36  ;;  %v5158_v14 = vrot.slane %v6106_v13, 9  ;;  %v922_v44 = vld [vmem:[#allocation2 + $0x80] sm:$0x1]  ;;  %v413_v31 = vld [vmem:[#allocation2 + $0x8c] sm:$0x1] }
  0x75   : > { %1858 = vrot.lane.b32.xlu0 %v6036_v12, %s5658_s8  ;;  %920 = vst [vmem:[#allocation2 + $0x78] sm:$0xf] %v919_v21  ;;  %v1512_v30 = vrot.slane %v1510_v5, 4  ;;  %v1513_v26 = vrot.slane %v990_v3, 5  ;;  %v1217_v32 = vshrl.u32 %v6173_v54, 16  ;;  %v699_v33 = vor.u32 %v697_v18, %v696_v16  ;;  %v302_v24 = vld [vmem:[%s5751_s29 + $0xb0] sm:$0xff] }
  0x76   : > { %1860 = vrot.lane.b32.xlu1 %v6101_v4, %s5658_s8  ;;  %v1220_v20 = vshll.u32 %v6173_v54, 16  ;;  %v701_v42 = vrot.slane %v696_v16, 4  ;;  %v358_v36 = vsel %vm5718_vm3, 0, %v357_v35  ;;  %v1511_v51 = vsel %vm5795_vm13, %v5158_v14, %v1510_v5  ;;  %v6235_v16 = vld [vmem:[#allocation2 + $0x6c] sm:$0xf] }
  0x77   : > { %v700_v28 = vsel %vm5774_vm9, %v692_v22, %v699_v33  ;;  %v1514_v23 = vsel %vm5795_vm13, %v1512_v30, %v1513_v26  ;;  %359 = vst [vmem:[#allocation2 + $0x84] sm:$0x1] %v358_v36  ;;  %v5394_v52 = vpack.c.bf16 %v301_v46, %v301_v46  ;;  %v1219_v61 = vrot.slane %v1217_v32, 4  ;;  %v360_v22 = vld [vmem:[#allocation2 + $0x90] sm:$0x1] }
  0x78   : > { %921 = vst.msk [vmem:[#allocation2 + $0x7c] sm:$0xf] %vm312_vm0, %v700_v28  ;;  %v923_v29 = vsel %vm5718_vm3, %v701_v42, %v922_v44  ;;  %v1222_v63 = vrot.slane %v1220_v20, 5  ;;  %v703_v9 = vshrl.u32 %v5393_v48, 16  ;;  %v706_v3 = vshll.u32 %v5393_v48, 16  ;;  %v304_v42 = vld [vmem:[%s5751_s29 + $0xc0] sm:$0xff] }
  0x79   : > { %1893 = vrot.lane.b32.xlu0 %v6064_v17, %s5663_s17  ;;  %v6177_v17 = vld [vmem:[#allocation2 + $0x64] sm:$0xf]  ;;  %924 = vst [vmem:[#allocation2 + $0x80] sm:$0x1] %v923_v29  ;;  %v711_v10 = vshrl.u32 %v5394_v52, 16  ;;  %v714_v11 = vshll.u32 %v5394_v52, 16  ;;  %v6228_v60 = vcombine.low %v1511_v51, %v1514_v23  ;;  %v5395_v36 = vpack.c.bf16 %v302_v24, %v302_v24 }
  0x7a   : > { %1895 = vrot.lane.b32.xlu1 %v6153_v7, %s5663_s17  ;;  %v1226_v6 = vshll.u32 %v6177_v17, 16  ;;  %v1230_v13 = vshrl.u32 %v6177_v17, 16  ;;  %v705_v55 = vrot.slane %v703_v9, 7  ;;  %v1236_v40 = vshll.u32 %v6217_v56, 16  ;;  %v416_v14 = vld [vmem:[#allocation2 + $0x98] sm:$0x1] }
  0x7b   : > { %v6226_v45 = vrot.slane %v711_v10, 7  ;;  %vm8544_vm15 = vcmask 1041408   ;;  %v1223_v5 = vor.u32 %v1222_v63, %v1219_v61  ;;  %v414_v21 = vsel %vm5741_vm5, 0, %v413_v31  ;;  %v6249_v32 = vld [vmem:[#allocation2 + $0x70] sm:$0xf]  ;;  %v305_v23 = vld [vmem:[%s5751_s29 + $0xc8] sm:$0xff] }
  0x7c   : > { %v6219_v34 = vrot.slane %v1226_v6, 5  ;;  %v1232_v2 = vrot.slane %v1230_v13, 4  ;;  %v708_v15 = vor.u32 %v706_v3, %v705_v55  ;;  %v709_v50 = vrot.slane %v705_v55, 4  ;;  %5551 = vmatprep.subr.msk.bf16.mxu0 %vm8544_vm15, %v5583_v53  ;;  %415 = vst [vmem:[#allocation2 + $0x8c] sm:$0x1] %v414_v21 }
  0x7d   : > { %1928 = vrot.lane.b32.xlu0 %v6092_v41, %s5661_s11  ;;  %v1215_v41 = vsel %vm5842_vm14, %v1210_v58, %v1214_v37  ;;  %v2392_v58 = vsel %vm8544_vm15, %v5583_v53, 0  ;;  %v716_v18 = vor.u32 %v714_v11, %v6226_v45  ;;  %v6246_v30 = vcombine.low %v6173_v54, %v6177_v17 }
  0x7e   : > { %1930 = vrot.lane.b32.xlu1 %v6168_v39, %s5661_s11  ;;  %v6203_v49 = vcombine.low %v1205_v27, %v1215_v41  ;;  %v1233_v37 = vor.u32 %v1232_v2, %v6219_v34  ;;  %5480 = vmatpush3.bf16.msra.mxu0 %v2392_v58  ;;  %v303_v27 = vld [vmem:[%s5751_s29 + $0xb8] sm:$0xff]  ;;  %v1238_v41 = vrot.slane %v1236_v40, 5  ;;  %v5159_v26 = vrot.slane %v6173_v54, 9  ;;  %v925_v44 = vld [vmem:[#allocation2 + $0x84] sm:$0xf] }
  0x7f   : > { %v717_v33 = vsel %vm5774_vm9, %v709_v50, %v716_v18  ;;  %v1520_v35 = vrot.slane %v6217_v56, 5  ;;  %v1241_v20 = vshrl.u32 %v6235_v16, 16  ;;  %v926_v6 = vsel %vm5782_vm10, %v708_v15, %v925_v44  ;;  %v363_v54 = vld [vmem:[#allocation2 + $0x9c] sm:$0x1]  ;;  %v6288_v18 = vld [vmem:[#allocation2 + $0x74] sm:$0x1] }
  0x80   : > { %928 = vst.msk [vmem:[#allocation2 + $0x88] sm:$0xf] %vm312_vm0, %v717_v33  ;;  %v1224_v46 = vrot.slane %v1223_v5, 4  ;;  %v1234_v48 = vrot.slane %v1233_v37, 4  ;;  %v1244_v13 = vshll.u32 %v6235_v16, 16  ;;  %v1254_v28 = vshrl.u32 %v6249_v32, 16 }
  0x81   : > { %1963 = vrot.lane.b32.xlu0 %v6101_v4, %s5659_s9  ;;  %927 = vst [vmem:[#allocation2 + $0x84] sm:$0xf] %v926_v6  ;;  %v718_v29 = vrot.slane %v6226_v45, 4  ;;  %v5396_v51 = vpack.c.bf16 %v303_v27, %v303_v27  ;;  %v1250_v52 = vshll.u32 %v6249_v32, 16  ;;  %v417_v53 = vsel %vm5741_vm5, 0, %v416_v14 }
  0x82   : > { %1965 = vrot.lane.b32.xlu1 %v6184_v25, %s5659_s9  ;;  %v364_v56 = vsel %vm5718_vm3, 0, %v363_v54  ;;  %v5397_v61 = vpack.c.bf16 %v304_v42, %v304_v42  ;;  %v1243_v9 = vrot.slane %v1241_v20, 4  ;;  %v720_v2 = vshrl.u32 %v5395_v36, 16  ;;  %418 = vst [vmem:[#allocation2 + $0x98] sm:$0x1] %v417_v53 }
  0x83   : > { %v723_v3 = vshll.u32 %v5395_v36, 16  ;;  %365 = vst [vmem:[#allocation2 + $0x9c] sm:$0x1] %v364_v56  ;;  %v1229_v10 = vsel %vm5842_vm14, %v1224_v46, %v6219_v34  ;;  %v929_v11 = vld [vmem:[#allocation2 + $0x8c] sm:$0x1]  ;;  %v728_v55 = vshrl.u32 %v5396_v51, 16  ;;  %v5398_v31 = vpack.c.bf16 %v305_v23, %v305_v23 }
  0x84   : > { %v737_v40 = vshrl.u32 %v5397_v61, 16  ;;  %v1239_v45 = vsel %vm5842_vm14, %v1234_v48, %v1238_v41  ;;  %v1246_v15 = vrot.slane %v1244_v13, 5  ;;  %v930_v50 = vsel %vm5718_vm3, %v718_v29, %v929_v11  ;;  %v419_v36 = vld [vmem:[#allocation2 + $0xa4] sm:$0x1] }
  0x85   : > { %1998 = vrot.lane.b32.xlu0 %v6153_v7, %s5664_s18  ;;  %v722_v58 = vrot.slane %v720_v2, 7  ;;  %v1256_v5 = vrot.slane %v1254_v28, 4  ;;  %931 = vst [vmem:[#allocation2 + $0x8c] sm:$0x1] %v930_v50  ;;  %v730_v34 = vrot.slane %v728_v55, 7  ;;  %v731_v37 = vshll.u32 %v5396_v51, 16 }
  0x86   : > { %2000 = vrot.lane.b32.xlu1 %v6203_v49, %s5664_s18  ;;  %v740_v24 = vshll.u32 %v5397_v61, 16  ;;  %v745_v14 = vshrl.u32 %v5398_v31, 16  ;;  %v6294_v41 = vcombine.low %v1229_v10, %v1239_v45  ;;  %v1247_v6 = vor.u32 %v1246_v15, %v1243_v9  ;;  %v366_v51 = vld [vmem:[#allocation2 + $0xa8] sm:$0x1]  ;;  %v306_v10 = vld [vmem:[%s5751_s29 + $0xd0] sm:$0xff] }
  0x87   : > { %v725_v21 = vor.u32 %v723_v3, %v722_v58  ;;  %v726_v20 = vrot.slane %v722_v58, 4  ;;  %v1260_v54 = vshll.u32 %v6288_v18, 16  ;;  %v733_v46 = vor.u32 %v731_v37, %v730_v34  ;;  %v422_v55 = vld [vmem:[#allocation2 + $0xb0] sm:$0x1]  ;;  %v369_v45 = vld [vmem:[#allocation2 + $0xb4] sm:$0x1] }
  0x88   : > { %v1248_v56 = vrot.slane %v1247_v6, 4  ;;  %v420_v3 = vsel %vm5741_vm5, 0, %v419_v36  ;;  %v367_v11 = vsel %vm5718_vm3, 0, %v366_v51  ;;  %v6336_v15 = vcombine.low %v6235_v16, %v6249_v32 }
  0x89   : > { %2033 = vrot.lane.b32.xlu0 %v6168_v39, %s5662_s14  ;;  %v936_v48 = vld [vmem:[#allocation2 + $0x98] sm:$0x1]  ;;  %421 = vst [vmem:[#allocation2 + $0xa4] sm:$0x1] %v420_v3  ;;  %368 = vst [vmem:[#allocation2 + $0xa8] sm:$0x1] %v367_v11  ;;  %v5399_v37 = vpack.c.bf16 %v306_v10, %v306_v10 }
  0x8a   : > { %1747 = vrot.lane.b32.xlu1 %v6153_v7, %s5660_s10  ;;  %v1517_v7 = vrot.slane %v6177_v17, 5  ;;  %v361_v17 = vsel %vm5718_vm3, 0, %v360_v22  ;;  %v739_v22 = vrot.slane %v737_v40, 7  ;;  %v939_v13 = vld [vmem:[#allocation2 + $0x9c] sm:$0xf]  ;;  %v1524_v50 = vrot.slane %v6249_v32, 5 }
  0x8b   : > { %362 = vst [vmem:[#allocation2 + $0x90] sm:$0x1] %v361_v17  ;;  %v735_v17 = vrot.slane %v730_v34, 4  ;;  %v307_v40 = vld [vmem:[%s5751_s29 + $0xd8] sm:$0xff]  ;;  %v1527_v6 = vrot.slane %v6288_v18, 5  ;;  %vm2057_vm1 = vcmask 31744  }
  0x8c   : > { %v1519_v63 = vrot.slane %v1517_v7, 4  ;;  %v1518_v33 = vsel %vm5795_vm13, %v5159_v26, %v1517_v7  ;;  %v742_v29 = vor.u32 %v740_v24, %v739_v22  ;;  %v734_v7 = vsel %vm5774_vm9, %v726_v20, %v733_v46  ;;  %v6395_v11 = vld [vmem:[#allocation2 + $0x88] sm:$0xf] }
  0x8d   : > { %2035 = vrot.lane.b32.xlu0 %v6228_v60, %s5662_s14  ;;  %935 = vst.msk [vmem:[#allocation2 + $0x94] sm:$0xf] %vm312_vm0, %v734_v7  ;;  %v937_v23 = vsel %vm5718_vm3, %v735_v17, %v936_v48  ;;  %v1526_v20 = vrot.slane %v1524_v50, 4  ;;  %vm2106_vm2 = vcmask 64512   ;;  %vm2139_vm4 = vcmask 97280  }
  0x8e   : > { %1749 = vrot.lane.b32.xlu1 %v6203_v49, %s5660_s10  ;;  %v1521_v44 = vsel %vm5795_vm13, %v1519_v63, %v1520_v35  ;;  %v6310_v35 = vrot.slane %v745_v14, 7  ;;  %v940_v53 = vsel %vm5782_vm10, %v742_v29, %v939_v13  ;;  %v1262_v63 = vrot.slane %v1260_v54, 5  ;;  %938 = vst [vmem:[#allocation2 + $0x98] sm:$0x1] %v937_v23 }
  0x8f   : > { %v6306_v26 = vcombine.low %v1518_v33, %v1521_v44  ;;  %941 = vst [vmem:[#allocation2 + $0x9c] sm:$0xf] %v940_v53  ;;  %v5160_v14 = vrot.slane %v6235_v16, 9  ;;  %v754_v16 = vshrl.u32 %v5399_v37, 16  ;;  %v757_v53 = vshll.u32 %v5399_v37, 16 }
  0x90   : > { %v946_v37 = vld [vmem:[#allocation2 + $0xa8] sm:$0xf]  ;;  %vm2172_vm6 = vcmask 130048   ;;  %vm2205_vm7 = vcmask 162816   ;;  %vm2238_vm8 = vcmask 195584   ;;  %vm2271_vm11 = vcmask 228352  }
  0x91   : > { %1827 = vrot.lane.b32.xlu0 %v6168_v39, %s5657_s30  ;;  %v6286_v39 = vrot.slane %v1250_v52, 5  ;;  %v748_v52 = vshll.u32 %v5398_v31, 16  ;;  %v6329_v31 = vld [vmem:[#allocation2 + $0x78] sm:$0xf]  ;;  %v1525_v7 = vsel %vm5795_vm13, %v5160_v14, %v1524_v50  ;;  %vm8546_vm12 = vcmask 261120  }
  0x92   : > { %1829 = vrot.lane.b32.xlu1 %v6228_v60, %s5657_s30  ;;  %v932_v27 = vld [vmem:[#allocation2 + $0x90] sm:$0xf]  ;;  %v1265_v32 = vshrl.u32 %v6329_v31, 16  ;;  %v1268_v24 = vshll.u32 %v6329_v31, 16  ;;  %vm8545_vm15 = vcmask 293888  }
  0x93   : > { %v1257_v42 = vor.u32 %v1256_v5, %v6286_v39  ;;  %v933_v28 = vsel %vm5782_vm10, %v725_v21, %v932_v27  ;;  %v750_v2 = vor.u32 %v748_v52, %v6310_v35  ;;  %v423_v21 = vsel %vm5741_vm5, 0, %v422_v55  ;;  %v6399_v55 = vld [vmem:[#allocation2 + $0x4] sm:$0xf] }
  0x94   : > { %934 = vst [vmem:[#allocation2 + $0x90] sm:$0xf] %v933_v28  ;;  %v5400_v27 = vpack.c.bf16 %v307_v40, %v307_v40  ;;  %424 = vst [vmem:[#allocation2 + $0xb0] sm:$0x1] %v423_v21  ;;  %v1267_v13 = vrot.slane %v1265_v32, 4  ;;  %v1270_v17 = vrot.slane %v1268_v24, 5 }
  0x95   : > { %1862 = vrot.lane.b32.xlu0 %v6184_v25, %s5658_s8  ;;  %v1258_v61 = vrot.slane %v1257_v42, 4  ;;  %v752_v42 = vrot.slane %v6310_v35, 4  ;;  %v943_v28 = vld [vmem:[#allocation2 + $0xa4] sm:$0x1]  ;;  %v1528_v35 = vsel %vm5795_vm13, %v1526_v20, %v1527_v6  ;;  %v756_v52 = vrot.slane %v754_v16, 7 }
  0x96   : > { %1864 = vrot.lane.b32.xlu1 %v6246_v30, %s5658_s8  ;;  %v762_v29 = vshrl.u32 %v5400_v27, 16  ;;  %v765_v3 = vshll.u32 %v5400_v27, 16  ;;  %v6393_v10 = vcombine.low %v1525_v7, %v1528_v35  ;;  %v6401_v40 = vld [vmem:[#allocation2] sm:$0xf]  ;;  %v1302_v6 = vshrl.u32 %v6395_v11, 16 }
  0x97   : > { %v1263_v34 = vsel %vm5842_vm14, %v1258_v61, %v1262_v63  ;;  %v944_v36 = vsel %vm5718_vm3, %v752_v42, %v943_v28  ;;  %v6389_v61 = vld [vmem:[#allocation2 + $0x80] sm:$0x1]  ;;  %v1271_v63 = vor.u32 %v1270_v17, %v1267_v13  ;;  %v760_v14 = vrot.slane %v756_v52, 4 }
  0x98   : > { %945 = vst [vmem:[#allocation2 + $0xa4] sm:$0x1] %v944_v36  ;;  %v1284_v27 = vshll.u32 %v6389_v61, 16  ;;  %v1298_v42 = vshll.u32 %v6395_v11, 16 }
  0x99   : > { %1897 = vrot.lane.b32.xlu0 %v6203_v49, %s5663_s17  ;;  %v743_v49 = vrot.slane %v739_v22, 4  ;;  %v6351_v22 = vld [vmem:[#allocation2 + $0x7c] sm:$0xf]  ;;  %v6419_v20 = vrot.slane %v1271_v63, 4 }
  0x9a   : > { %1899 = vrot.lane.b32.xlu1 %v6294_v41, %s5663_s17  ;;  %v1278_v46 = vshrl.u32 %v6351_v22, 16  ;;  %v1274_v48 = vshll.u32 %v6351_v22, 16 }
  0x9b   : > { %v6319_v9 = vpop.permute.xlu1 %1815  ;;  %v751_v58 = vsel %vm5774_vm9, %v743_v49, %v750_v2  ;;  %v764_v2 = vrot.slane %v762_v29, 7  ;;  %v425_v29 = vld [vmem:[#allocation2 + $0xbc] sm:$0x1] }
  0x9c   : > { %942 = vst.msk [vmem:[#allocation2 + $0xa0] sm:$0xf] %vm312_vm0, %v751_v58  ;;  %v6386_v23 = vrot.slane %v1274_v48, 5  ;;  %v1280_v49 = vrot.slane %v1278_v46, 4  ;;  %v6409_v58 = vcombine.low %v6329_v31, %v6351_v22  ;;  %v950_v48 = vld [vmem:[#allocation2 + $0xb0] sm:$0x1] }
  0x9d   : > { %1932 = vrot.lane.b32.xlu0 %v6228_v60, %s5661_s11  ;;  %v1253_v60 = vsel %vm5842_vm14, %v1248_v56, %v6286_v39  ;;  %v370_v39 = vsel %vm5718_vm3, 0, %v369_v45  ;;  %v308_v56 = vld [vmem:[%s5751_s29 + $0xe0] sm:$0xff]  ;;  %v5169_v45 = vcombine.low %v6401_v40, %v6399_v55  ;;  %v767_v46 = vor.u32 %v765_v3, %v764_v2 }
  0x9e   : > { %1934 = vrot.lane.b32.xlu1 %v6306_v26, %s5661_s11  ;;  %371 = vst [vmem:[#allocation2 + $0xb4] sm:$0x1] %v370_v39  ;;  %v6364_v44 = vcombine.low %v1253_v60, %v1263_v34  ;;  %v6412_v34 = vld [vmem:[#allocation2 + $0x84] sm:$0xf]  ;;  %v5401_v21 = vpack.c.bf16 %v308_v56, %v308_v56  ;;  %v1281_v24 = vor.u32 %v1280_v49, %v6386_v23  ;;  %v769_v13 = vrot.slane %v764_v2, 4 }
  0x9f   : > { %v6341_v5 = vpop.permute.xlu0 %1850  ;;  %v759_v39 = vor.u32 %v757_v53, %v756_v52  ;;  %v1289_v16 = vshrl.u32 %v6412_v34, 16  ;;  %v1292_v35 = vshll.u32 %v6412_v34, 16  ;;  %v768_v36 = vsel %vm5774_vm9, %v760_v14, %v767_v46  ;;  %v372_v53 = vld [vmem:[#allocation2 + $0xc0] sm:$0x1] }
  0xa0   : > { %v771_v49 = vshrl.u32 %v5401_v21, 16  ;;  %v774_v52 = vshll.u32 %v5401_v21, 16  ;;  %v1282_v63 = vrot.slane %v1281_v24, 4  ;;  %v1286_v2 = vrot.slane %v1284_v27, 5  ;;  %949 = vst.msk [vmem:[#allocation2 + $0xac] sm:$0xf] %vm312_vm0, %v768_v36 }
  0xa1   : > { %1967 = vrot.lane.b32.xlu0 %v6246_v30, %s5659_s9  ;;  %v947_v17 = vsel %vm5782_vm10, %v759_v39, %v946_v37  ;;  %v1531_v3 = vrot.slane %v6351_v22, 5  ;;  %v951_v37 = vsel %vm5718_vm3, %v769_v13, %v950_v48  ;;  %v426_v14 = vsel %vm5741_vm5, 0, %v425_v29 }
  0xa2   : > { %1969 = vrot.lane.b32.xlu1 %v6336_v15, %s5659_s9  ;;  %v6362_v33 = vpop.permute.xlu1 %1852  ;;  %948 = vst [vmem:[#allocation2 + $0xa8] sm:$0xf] %v947_v17  ;;  %952 = vst [vmem:[#allocation2 + $0xb0] sm:$0x1] %v951_v37  ;;  %v1291_v21 = vrot.slane %v1289_v16, 4  ;;  %v6445_v24 = vrot.slane %v1298_v42, 5  ;;  %v1287_v42 = vsel %vm5842_vm14, %v1282_v63, %v1286_v2 }
  0xa3   : > { %v6368_v54 = vpop.permute.xlu0 %1955  ;;  %v1304_v27 = vrot.slane %v1302_v6, 4  ;;  %427 = vst [vmem:[#allocation2 + $0xbc] sm:$0x1] %v426_v14  ;;  %v373_v46 = vsel %vm5718_vm3, 0, %v372_v53  ;;  %v1294_v13 = vrot.slane %v1292_v35, 5  ;;  %v1277_v6 = vsel %vm5842_vm14, %v6419_v20, %v6386_v23  ;;  %v310_v37 = vld [vmem:[%s5751_s29 + $0xf0] sm:$0xff] }
  0xa4   : > { %374 = vst [vmem:[#allocation2 + $0xc0] sm:$0x1] %v373_v46  ;;  %v1533_v36 = vrot.slane %v1531_v3, 4  ;;  %v6460_v35 = vld [vmem:[#allocation2 + $0x8c] sm:$0x1]  ;;  %v6476_v20 = vcombine.low %v1277_v6, %v1287_v42  ;;  %v6489_v14 = vpack.c.bf16 %v310_v37, %v310_v37  ;;  %v6532_v37 = vcombine.low %v6412_v34, %v6395_v11 }
  0xa5   : > { %2002 = vrot.lane.b32.xlu0 %v6294_v41, %s5664_s18  ;;  %v953_v22 = vld [vmem:[#allocation2 + $0xb4] sm:$0xf]  ;;  %v1295_v63 = vor.u32 %v1294_v13, %v1291_v21  ;;  %v1305_v55 = vor.u32 %v1304_v27, %v6445_v24 }
  0xa6   : > { %2004 = vrot.lane.b32.xlu1 %v6364_v44, %s5664_s18  ;;  %v6376_v18 = vpop.permute.xlu1 %1957  ;;  %v788_v6 = vshrl.u32 %v6489_v14, 16 }
  0xa7   : > { %v6384_v51 = vpop.permute.xlu0 %1735  ;;  %v1296_v13 = vrot.slane %v1295_v63, 4 }
  0xa8   : > { %v2060_v23 = vsel %vm2057_vm1, %v5169_v45, %v6384_v51  ;;  %v8566_v45 = vrot.slane %v6329_v31, 9 }
  0xa9   : > { %2037 = vrot.lane.b32.xlu0 %v6306_v26, %s5662_s14  ;;  %v2108_v21 = vsel %vm2106_vm2, %v2060_v23, %v6319_v9  ;;  %v6540_v23 = vld [vmem:[#allocation2 + $0x94] sm:$0xf] }
  0xaa   : > { %1751 = vrot.lane.b32.xlu1 %v6294_v41, %s5660_s10  ;;  %v6405_v50 = vpop.permute.xlu1 %1817  ;;  %v309_v41 = vld [vmem:[%s5751_s29 + $0xe8] sm:$0xff]  ;;  %v1532_v2 = vsel %vm5795_vm13, %v8566_v45, %v1531_v3  ;;  %v1541_v45 = vrot.slane %v6460_v35, 5 }
  0xab   : > { %v6415_v32 = vpop.permute.xlu0 %1920  ;;  %v5402_v28 = vpack.c.bf16 %v309_v41, %v309_v41  ;;  %v773_v41 = vrot.slane %v771_v49, 7  ;;  %v1534_v49 = vrot.slane %v6389_v61, 5 }
  0xad   : > { %2039 = vrot.lane.b32.xlu0 %v6393_v10, %s5662_s14  ;;  %v779_v39 = vshrl.u32 %v5402_v28, 16  ;;  %v782_v60 = vshll.u32 %v5402_v28, 16  ;;  %v776_v17 = vor.u32 %v774_v52, %v773_v41  ;;  %v777_v28 = vrot.slane %v773_v41, 4 }
  0xae   : > { %1753 = vrot.lane.b32.xlu1 %v6364_v44, %s5660_s10  ;;  %v6430_v7 = vpop.permute.xlu1 %1922  ;;  %v1535_v41 = vsel %vm5795_vm13, %v1533_v36, %v1534_v49  ;;  %v1538_v36 = vrot.slane %v6395_v11, 5  ;;  %v791_v11 = vshll.u32 %v6489_v14, 16 }
  0xaf   : > { %v6435_v56 = vpop.permute.xlu0 %2025  ;;  %v781_v29 = vrot.slane %v779_v39, 7  ;;  %v954_v53 = vsel %vm5782_vm10, %v776_v17, %v953_v22  ;;  %v1308_v39 = vshll.u32 %v6460_v35, 16  ;;  %v957_v22 = vld [vmem:[#allocation2 + $0xbc] sm:$0x1]  ;;  %v1306_v17 = vrot.slane %v1305_v55, 4 }
  0xb0   : > { %955 = vst [vmem:[#allocation2 + $0xb4] sm:$0xf] %v954_v53 }
  0xb1   : > { %1831 = vrot.lane.b32.xlu0 %v6306_v26, %s5657_s30  ;;  %v428_v26 = vld [vmem:[#allocation2 + $0xc8] sm:$0x1]  ;;  %v784_v52 = vor.u32 %v782_v60, %v781_v29  ;;  %v786_v31 = vrot.slane %v781_v29, 4 }
  0xb2   : > { %1833 = vrot.lane.b32.xlu1 %v6393_v10, %s5657_s30  ;;  %v1888_v48 = vpop.permute.xlu1 %1887  ;;  %v429_v61 = vsel %vm5741_vm5, 0, %v428_v26  ;;  %v1310_v26 = vrot.slane %v1308_v39, 5 }
  0xb3   : > { %v6451_v16 = vpop.permute.xlu0 %2027  ;;  %v785_v51 = vsel %vm5774_vm9, %v777_v28, %v784_v52  ;;  %430 = vst [vmem:[#allocation2 + $0xc8] sm:$0x1] %v429_v61  ;;  %v958_v49 = vsel %vm5718_vm3, %v786_v31, %v957_v22  ;;  %v6524_v52 = vld [vmem:[#allocation2 + $0x90] sm:$0xf]  ;;  %v960_v31 = vld [vmem:[#allocation2 + $0xc0] sm:$0xf] }
  0xb4   : > { %956 = vst.msk [vmem:[#allocation2 + $0xb8] sm:$0xf] %vm312_vm0, %v785_v51  ;;  %959 = vst [vmem:[#allocation2 + $0xbc] sm:$0x1] %v958_v49  ;;  %v1311_v63 = vsel %vm5842_vm14, %v1306_v17, %v1310_v26  ;;  %v790_v51 = vrot.slane %v788_v6, 7 }
  0xb5   : > { %1866 = vrot.lane.b32.xlu0 %v6336_v15, %s5658_s8  ;;  %v1005_v26 = vld [vmem:[#allocation2 + $0x98] sm:$0x1] }
  0xb6   : > { %1868 = vrot.lane.b32.xlu1 %v6409_v58, %s5658_s8  ;;  %v1993_v60 = vpop.permute.xlu1 %1992 }
  0xb7   : > { %v1738_v40 = vpop.permute.xlu0 %1737 }
  0xb8   : > { %v2063_v27 = vsel %vm2057_vm1, %v5832_v47, %v1738_v40  ;;  %v6505_v47 = vcombine.low %v1532_v2, %v1535_v41  ;;  %v1316_v2 = vshll.u32 %v6524_v52, 16 }
  0xb9   : > { %v2110_v3 = vsel %vm2106_vm2, %v2063_v27, %v6405_v50  ;;  %1901 = vrot.lane.b32.xlu0 %v6364_v44, %s5663_s17  ;;  %v311_v50 = vld [vmem:[%s5751_s29 + $0xf8] sm:$0xff]  ;;  %v2141_v44 = vsel %vm2139_vm4, %v2108_v21, %v6341_v5  ;;  %v1326_v21 = vshrl.u32 %v6540_v23, 16  ;;  %v793_v27 = vor.u32 %v791_v11, %v790_v51 }
  0xba   : > { %1903 = vrot.lane.b32.xlu1 %v6476_v20, %s5663_s17  ;;  %v2143_v9 = vsel %vm2139_vm4, %v2110_v3, %v6362_v33  ;;  %v6503_v46 = vpop.permute.xlu1 %1739  ;;  %v5404_v53 = vpack.c.bf16 %v311_v50, %v311_v50  ;;  %v375_v3 = vld [vmem:[#allocation2 + $0xcc] sm:$0x1]  ;;  %v1318_v17 = vrot.slane %v1316_v2, 5 }
  0xbb   : > { %v2176_v28 = vsel %vm2172_vm6, %v2143_v9, %v1888_v48  ;;  %v1886_v29 = vpop.permute.xlu0 %1885  ;;  %v1328_v6 = vrot.slane %v1326_v21, 4 }
  0xbc   : > { %v2174_v42 = vsel %vm2172_vm6, %v2141_v44, %v1886_v29  ;;  %v2209_v33 = vsel %vm2205_vm7, %v2176_v28, %v6430_v7  ;;  %v796_v41 = vshrl.u32 %v5404_v53, 16  ;;  %v431_v44 = vld [vmem:[#allocation2 + $0xd4] sm:$0x1] }
  0xbd   : > { %v2207_v48 = vsel %vm2205_vm7, %v2174_v42, %v6415_v32  ;;  %1936 = vrot.lane.b32.xlu0 %v6393_v10, %s5661_s11  ;;  %v2242_v5 = vsel %vm2238_vm8, %v2209_v33, %v6376_v18  ;;  %v1301_v18 = vsel %vm5842_vm14, %v1296_v13, %v6445_v24  ;;  %v5162_v32 = vrot.slane %v6412_v34, 9 }
  0xbe   : > { %1938 = vrot.lane.b32.xlu1 %v6505_v47, %s5661_s11  ;;  %v6528_v7 = vpop.permute.xlu1 %1741  ;;  %v2240_v10 = vsel %vm2238_vm8, %v2207_v48, %v6368_v54  ;;  %v2275_v55 = vsel %vm2271_vm11, %v2242_v5, %v1993_v60  ;;  %v1540_v54 = vrot.slane %v1538_v36, 4  ;;  %v1313_v24 = vshrl.u32 %v6524_v52, 16  ;;  %v964_v5 = vld [vmem:[#allocation2 + $0xc8] sm:$0x1] }
  0xbf   : > { %v1991_v61 = vpop.permute.xlu0 %1990  ;;  %v1322_v60 = vshll.u32 %v6540_v23, 16  ;;  %v6559_v14 = vcombine.low %v1301_v18, %v1311_v63  ;;  %v2308_v35 = vsel %vm8546_vm12, %v2275_v55, %v6451_v16  ;;  %v1539_v22 = vsel %vm5795_vm13, %v5162_v32, %v1538_v36  ;;  %v6593_v55 = vld [vmem:[#allocation2 + $0x9c] sm:$0xf] }
  0xc0   : > { %v2273_v40 = vsel %vm2271_vm11, %v2240_v10, %v1991_v61  ;;  %v1542_v9 = vsel %vm5795_vm13, %v1540_v54, %v1541_v45  ;;  %v799_v13 = vshll.u32 %v5404_v53, 16  ;;  %v1315_v16 = vrot.slane %v1313_v24, 4 }
  0xc1   : > { %1971 = vrot.lane.b32.xlu0 %v6409_v58, %s5659_s9  ;;  %v2306_v34 = vsel %vm8546_vm12, %v2273_v40, %v6435_v56  ;;  %v6574_v50 = vrot.slane %v1322_v60, 5  ;;  %v798_v28 = vrot.slane %v796_v41, 7  ;;  %v794_v42 = vrot.slane %v790_v51, 4  ;;  %v6597_v40 = vld [vmem:[#allocation2 + $0xa0] sm:$0xf] }
  0xc2   : > { %1973 = vrot.lane.b32.xlu1 %v6532_v37, %s5659_s9  ;;  %v6557_v39 = vpop.permute.xlu1 %1821  ;;  %5481 = vmatprep.mubr.msk.bf16.mxu0 %vm8545_vm15, %v2306_v34  ;;  %v961_v33 = vsel %vm5782_vm10, %v793_v27, %v960_v31  ;;  %v376_v36 = vsel %vm5718_vm3, 0, %v375_v3  ;;  %v6586_v53 = vcombine.low %v1539_v22, %v1542_v9  ;;  %v1332_v10 = vshll.u32 %v1005_v26, 16 }
  0xc3   : > { %5482 = vmatmul.mubr.msk.bf16.vlgmr.msra.gmra.mrb[0].mxu0 %vm8545_vm15, %v2308_v35  ;;  %v6566_v56 = vpop.permute.xlu0 %1819  ;;  %962 = vst [vmem:[#allocation2 + $0xc0] sm:$0xf] %v961_v33  ;;  %377 = vst [vmem:[#allocation2 + $0xcc] sm:$0x1] %v376_v36  ;;  %v801_v48 = vor.u32 %v799_v13, %v798_v28  ;;  %v803_v18 = vrot.slane %v798_v28, 4  ;;  %v432_v32 = vsel %vm5741_vm5, 0, %v431_v44  ;;  %v1319_v61 = vor.u32 %v1318_v17, %v1315_v16 }
  0xc4   : > { %v1329_v63 = vor.u32 %v1328_v6, %v6574_v50  ;;  %433 = vst [vmem:[#allocation2 + $0xd4] sm:$0x1] %v432_v32  ;;  %v1545_v24 = vrot.slane %v6540_v23, 5  ;;  %v1337_v34 = vshrl.u32 %v6593_v55, 16  ;;  %v1340_v2 = vshll.u32 %v6593_v55, 16 }
  0xc5   : > { %2006 = vrot.lane.b32.xlu0 %v6476_v20, %s5664_s18  ;;  %v802_v51 = vsel %vm5774_vm9, %v794_v42, %v801_v48  ;;  %v965_v54 = vsel %vm5718_vm3, %v803_v18, %v964_v5  ;;  %v1320_v60 = vrot.slane %v1319_v61, 4  ;;  %v1350_v35 = vshrl.u32 %v6597_v40, 16  ;;  %v1008_v42 = vld [vmem:[#allocation2 + $0xa4] sm:$0x1] }
  0xc6   : > { %2008 = vrot.lane.b32.xlu1 %v6559_v14, %s5664_s18  ;;  %v6578_v29 = vpop.permute.xlu1 %1856  ;;  %963 = vst.msk [vmem:[#allocation2 + $0xc4] sm:$0xf] %vm312_vm0, %v802_v51  ;;  %966 = vst [vmem:[#allocation2 + $0xc8] sm:$0x1] %v965_v54  ;;  %v1330_v41 = vrot.slane %v1329_v63, 4  ;;  %v1346_v21 = vshll.u32 %v6597_v40, 16  ;;  %v6613_v3 = vcombine.low %v6524_v52, %v6540_v23 }
  0xc7   : > { %v1855_v49 = vpop.permute.xlu0 %1854  ;;  %v5163_v22 = vrot.slane %v6524_v52, 9  ;;  %v1547_v9 = vrot.slane %v1545_v24, 4  ;;  %v1548_v13 = vrot.slane %v1005_v26, 5  ;;  %v1339_v16 = vrot.slane %v1337_v34, 4 }
  0xc8   : > { %v1342_v17 = vrot.slane %v1340_v2, 5  ;;  %v1325_v28 = vsel %vm5842_vm14, %v1320_v60, %v6574_v50  ;;  %v1348_v44 = vrot.slane %v1346_v21, 5  ;;  %v1352_v6 = vrot.slane %v1350_v35, 4 }
  0xc9   : > { %2041 = vrot.lane.b32.xlu0 %v6505_v47, %s5662_s14  ;;  %v2069_v52 = vsel %vm2057_vm1, %v5865_v19, %v6528_v7  ;;  %v1546_v36 = vsel %vm5795_vm13, %v5163_v22, %v1545_v24  ;;  %v1549_v48 = vsel %vm5795_vm13, %v1547_v9, %v1548_v13  ;;  %v1356_v7 = vshll.u32 %v1008_v42, 16  ;;  %v6681_v22 = vld [vmem:[#allocation2 + $0xac] sm:$0xf] }
  0xca   : > { %1755 = vrot.lane.b32.xlu1 %v6476_v20, %s5660_s10  ;;  %v1334_v20 = vrot.slane %v1332_v10, 5  ;;  %v1343_v5 = vor.u32 %v1342_v17, %v1339_v16  ;;  %v1552_v60 = vrot.slane %v6597_v40, 5  ;;  %v5164_v16 = vrot.slane %v6593_v55, 9 }
  0xcb   : > { %v1890_v11 = vpop.permute.xlu0 %1889 }
  0xcc   : > { %v1892_v45 = vpop.permute.xlu1 %1891  ;;  %v1335_v23 = vsel %vm5842_vm14, %v1330_v41, %v1334_v20  ;;  %v1358_v20 = vrot.slane %v1356_v7, 5  ;;  %v1554_v17 = vrot.slane %v1552_v60, 4 }
  0xcd   : > { %2043 = vrot.lane.b32.xlu0 %v6586_v53, %s5662_s14  ;;  %v6633_v50 = vcombine.low %v1325_v28, %v1335_v23  ;;  %v1555_v28 = vrot.slane %v1008_v42, 5 }
  0xce   : > { %1757 = vrot.lane.b32.xlu1 %v6559_v14, %s5660_s10 }
  0xcf   : > { %v1925_v27 = vpop.permute.xlu0 %1924  ;;  %v1556_v42 = vsel %vm5795_vm13, %v1554_v17, %v1555_v28 }
  0xd0   : > { %v1927_v31 = vpop.permute.xlu1 %1926 }
  0xd1   : > { %1835 = vrot.lane.b32.xlu0 %v6505_v47, %s5657_s30  ;;  %v2066_v47 = vsel %vm2057_vm1, %v5848_v62, %v6503_v46  ;;  %v2114_v62 = vsel %vm2106_vm2, %v2069_v52, %v6557_v39  ;;  %v1353_v46 = vor.u32 %v1352_v6, %v1348_v44  ;;  %v6652_v39 = vcombine.low %v1546_v36, %v1549_v48 }
  0xd2   : > { %1837 = vrot.lane.b32.xlu1 %v6586_v53, %s5657_s30  ;;  %v2112_v19 = vsel %vm2106_vm2, %v2066_v47, %v6566_v56  ;;  %v2147_v63 = vsel %vm2139_vm4, %v2114_v62, %v6578_v29  ;;  %v1374_v6 = vshrl.u32 %v6681_v22, 16  ;;  %v1370_v47 = vshll.u32 %v6681_v22, 16 }
  0xd3   : > { %v1960_v26 = vpop.permute.xlu0 %1959  ;;  %v2145_v10 = vsel %vm2139_vm4, %v2112_v19, %v1855_v49  ;;  %v1344_v49 = vrot.slane %v1343_v5, 4  ;;  %v1354_v54 = vrot.slane %v1353_v46, 4  ;;  %v2180_v29 = vsel %vm2172_vm6, %v2147_v63, %v1892_v45  ;;  %v6710_v63 = vld [vmem:[#allocation2 + $0xb4] sm:$0xf] }
  0xd4   : > { %v1962_v33 = vpop.permute.xlu1 %1961  ;;  %v2178_v32 = vsel %vm2172_vm6, %v2145_v10, %v1890_v11  ;;  %v6672_v45 = vcombine.low %v6593_v55, %v6597_v40  ;;  %v1553_v55 = vsel %vm5795_vm13, %v5164_v16, %v1552_v60  ;;  %v1372_v5 = vrot.slane %v1370_v47, 5 }
  0xd5   : > { %1870 = vrot.lane.b32.xlu0 %v6532_v37, %s5658_s8  ;;  %v2211_v51 = vsel %vm2205_vm7, %v2178_v32, %v1925_v27  ;;  %v1349_v35 = vsel %vm5842_vm14, %v1344_v49, %v1348_v44  ;;  %v1359_v21 = vsel %vm5842_vm14, %v1354_v54, %v1358_v20  ;;  %v1376_v62 = vrot.slane %v1374_v6, 4  ;;  %v1014_v6 = vld [vmem:[#allocation2 + $0xbc] sm:$0x1] }
  0xd6   : > { %1872 = vrot.lane.b32.xlu1 %v6613_v3, %s5658_s8  ;;  %v2244_v56 = vsel %vm2238_vm8, %v2211_v51, %v1960_v26  ;;  %v6687_v40 = vcombine.low %v1349_v35, %v1359_v21  ;;  %v6706_v7 = vcombine.low %v1553_v55, %v1556_v42  ;;  %v1559_v54 = vrot.slane %v6681_v22, 5 }
  0xd7   : > { %v1995_v18 = vpop.permute.xlu0 %1994  ;;  %v1377_v32 = vor.u32 %v1376_v62, %v1372_v5 }
  0xd8   : > { %v1997_v61 = vpop.permute.xlu1 %1996  ;;  %v2277_v11 = vsel %vm2271_vm11, %v2244_v56, %v1995_v18  ;;  %v6712_v56 = vld [vmem:[#allocation2 + $0xb8] sm:$0xf]  ;;  %v1561_v21 = vrot.slane %v1559_v54, 4 }
  0xd9   : > { %1905 = vrot.lane.b32.xlu0 %v6559_v14, %s5663_s17  ;;  %v2213_v14 = vsel %vm2205_vm7, %v2180_v29, %v1927_v31  ;;  %v6679_v31 = vld [vmem:[#allocation2 + $0xa8] sm:$0xf] }
  0xda   : > { %1907 = vrot.lane.b32.xlu1 %v6633_v50, %s5663_s17  ;;  %v2246_v41 = vsel %vm2238_vm8, %v2213_v14, %v1962_v33  ;;  %v1361_v23 = vshrl.u32 %v6679_v31, 16  ;;  %v1364_v44 = vshll.u32 %v6679_v31, 16  ;;  %v1011_v33 = vld [vmem:[#allocation2 + $0xb0] sm:$0x1]  ;;  %v1394_v14 = vshll.u32 %v6712_v56, 16 }
  0xdb   : > { %v2030_v24 = vpop.permute.xlu0 %2029  ;;  %v1380_v10 = vshll.u32 %v1011_v33, 16  ;;  %v5165_v35 = vrot.slane %v6679_v31, 9 }
  0xdc   : > { %v6659_v34 = vpop.permute.xlu1 %1743  ;;  %v2310_v2 = vsel %vm8546_vm12, %v2277_v11, %v2030_v24  ;;  %v1363_v36 = vrot.slane %v1361_v23, 4  ;;  %v1366_v48 = vrot.slane %v1364_v44, 5  ;;  %v1378_v11 = vrot.slane %v1377_v32, 4 }
  0xdd   : > { %1940 = vrot.lane.b32.xlu0 %v6586_v53, %s5661_s11  ;;  %5485 = vmatprep.mubr.msk.bf16.mxu0 %vm8545_vm15, %v2310_v2  ;;  %v2279_v53 = vsel %vm2271_vm11, %v2246_v41, %v1997_v61  ;;  %v1382_v49 = vrot.slane %v1380_v10, 5  ;;  %v1388_v24 = vshll.u32 %v6710_v63, 16  ;;  %v1398_v2 = vshrl.u32 %v6712_v56, 16 }
  0xde   : > { %1942 = vrot.lane.b32.xlu1 %v6652_v39, %s5661_s11  ;;  %v1367_v18 = vor.u32 %v1366_v48, %v1363_v36  ;;  %v6727_v41 = vcombine.low %v6679_v31, %v6681_v22  ;;  %v1396_v28 = vrot.slane %v1394_v14, 5  ;;  %v1560_v47 = vsel %vm5795_vm13, %v5165_v35, %v1559_v54 }
  0xdf   : > { %v2032_v27 = vpop.permute.xlu0 %2031  ;;  %v1390_v17 = vrot.slane %v1388_v24, 5  ;;  %v1400_v23 = vrot.slane %v1398_v2, 4  ;;  %v1404_v48 = vshll.u32 %v1014_v6, 16  ;;  %v6778_v24 = vcombine.low %v6710_v63, %v6712_v56 }
  0xe0   : > { %v1746_v9 = vpop.permute.xlu1 %1745  ;;  %v2312_v13 = vsel %vm8546_vm12, %v2279_v53, %v2032_v27  ;;  %v1368_v20 = vrot.slane %v1367_v18, 4  ;;  %v1562_v53 = vrot.slane %v1011_v33, 5 }
  0xe1   : > { %1975 = vrot.lane.b32.xlu0 %v6613_v3, %s5659_s9  ;;  %5486 = vmatmul.mubr.msk.bf16.gmra.mrb[4].mxu0 %vm8545_vm15, %v2312_v13  ;;  %v1383_v13 = vsel %vm5842_vm14, %v1378_v11, %v1382_v49  ;;  %v2075_v31 = vsel %vm2057_vm1, %v6036_v12, %v1746_v9  ;;  %v1401_v36 = vor.u32 %v1400_v23, %v1396_v28  ;;  %v1406_v54 = vrot.slane %v1404_v48, 5  ;;  %v6819_v48 = vld [vmem:[#allocation2 + $0xd0] sm:$0xf] }
  0xe2   : > { %1977 = vrot.lane.b32.xlu1 %v6672_v45, %s5659_s9  ;;  %v1373_v27 = vsel %vm5842_vm14, %v1368_v20, %v1372_v5  ;;  %v1563_v12 = vsel %vm5795_vm13, %v1561_v21, %v1562_v53  ;;  %v6787_v21 = vld [vmem:[#allocation2 + $0xc0] sm:$0xf]  ;;  %v6789_v53 = vld [vmem:[#allocation2 + $0xc4] sm:$0xf] }
  0xe3   : > { %v1824_v52 = vpop.permute.xlu0 %1823 }
  0xe4   : > { %v1826_v26 = vpop.permute.xlu1 %1825 }
  0xe5   : > { %2010 = vrot.lane.b32.xlu0 %v6633_v50, %s5664_s18  ;;  %v2118_v55 = vsel %vm2106_vm2, %v2075_v31, %v1826_v26  ;;  %v1575_v31 = vshll.u32 %v6787_v21, 16 }
  0xe6   : > { %2012 = vrot.lane.b32.xlu1 %v6687_v40, %s5664_s18 }
  0xe7   : > { %v1859_v19 = vpop.permute.xlu0 %1858 }
  0xe8   : > { %v1861_v46 = vpop.permute.xlu1 %1860 }
  0xe9   : > { %2045 = vrot.lane.b32.xlu0 %v6652_v39, %s5662_s14  ;;  %v2151_v26 = vsel %vm2139_vm4, %v2118_v55, %v1861_v46  ;;  %v1577_v55 = vrot.slane %v1575_v31, 5 }
  0xea   : > { %1759 = vrot.lane.b32.xlu1 %v6633_v50, %s5660_s10  ;;  %v1385_v50 = vshrl.u32 %v6710_v63, 16 }
  0xeb   : > { %v1894_v61 = vpop.permute.xlu0 %1893 }
  0xec   : > { %v1896_v51 = vpop.permute.xlu1 %1895  ;;  %v1387_v16 = vrot.slane %v1385_v50, 4 }
  0xed   : > { %2047 = vrot.lane.b32.xlu0 %v6706_v7, %s5662_s14  ;;  %v2184_v46 = vsel %vm2172_vm6, %v2151_v26, %v1896_v51  ;;  %v1566_v51 = vrot.slane %v6712_v56, 5 }
  0xee   : > { %1761 = vrot.lane.b32.xlu1 %v6687_v40, %s5660_s10  ;;  %v1391_v33 = vor.u32 %v1390_v17, %v1387_v16  ;;  %v1569_v16 = vrot.slane %v1014_v6, 5 }
  0xef   : > { %v1929_v29 = vpop.permute.xlu0 %1928 }
  0xf0   : > { %v1931_v60 = vpop.permute.xlu1 %1930  ;;  %v1392_v49 = vrot.slane %v1391_v33, 4 }
  0xf1   : > { %1839 = vrot.lane.b32.xlu0 %v6652_v39, %s5657_s30  ;;  %v2072_v39 = vsel %vm2057_vm1, %v5982_v59, %v6659_v34  ;;  %v6749_v59 = vcombine.low %v1373_v27, %v1383_v13  ;;  %v5166_v27 = vrot.slane %v6710_v63, 9  ;;  %v1568_v13 = vrot.slane %v1566_v51, 4 }
  0xf2   : > { %1841 = vrot.lane.b32.xlu1 %v6706_v7, %s5657_s30  ;;  %v2116_v42 = vsel %vm2106_vm2, %v2072_v39, %v1824_v52  ;;  %v1397_v14 = vsel %vm5842_vm14, %v1392_v49, %v1396_v28  ;;  %v1572_v39 = vshrl.u32 %v6787_v21, 16  ;;  %v1581_v28 = vshll.u32 %v6789_v53, 16 }
  0xf3   : > { %v1964_v22 = vpop.permute.xlu0 %1963  ;;  %v2149_v34 = vsel %vm2139_vm4, %v2116_v42, %v1859_v19  ;;  %v6762_v19 = vcombine.low %v1560_v47, %v1563_v12  ;;  %v1567_v63 = vsel %vm5795_vm13, %v5166_v27, %v1566_v51  ;;  %v1615_v49 = vshll.u32 %v6819_v48, 16 }
  0xf4   : > { %v1966_v44 = vpop.permute.xlu1 %1965  ;;  %v2182_v5 = vsel %vm2172_vm6, %v2149_v34, %v1894_v61  ;;  %v1402_v61 = vrot.slane %v1401_v36, 4  ;;  %v1574_v47 = vrot.slane %v1572_v39, 4  ;;  %v1583_v42 = vrot.slane %v1581_v28, 5  ;;  %v6817_v36 = vld [vmem:[#allocation2 + $0xcc] sm:$0xf] }
  0xf5   : > { %1874 = vrot.lane.b32.xlu0 %v6672_v45, %s5658_s8  ;;  %v2215_v52 = vsel %vm2205_vm7, %v2182_v5, %v1929_v29  ;;  %v5167_v51 = vrot.slane %v6787_v21, 9  ;;  %v6850_v28 = vld [vmem:[#allocation2 + $0xd4] sm:$0x1] }
  0xf6   : > { %1876 = vrot.lane.b32.xlu1 %v6727_v41, %s5658_s8  ;;  %v2248_v10 = vsel %vm2238_vm8, %v2215_v52, %v1964_v22  ;;  %v1585_v22 = vshrl.u32 %v6789_v53, 16 }
  0xf7   : > { %v1999_v9 = vpop.permute.xlu0 %1998 }
  0xf8   : > { %v2001_v62 = vpop.permute.xlu1 %2000  ;;  %v2281_v18 = vsel %vm2271_vm11, %v2248_v10, %v1999_v9  ;;  %v1587_v12 = vrot.slane %v1585_v22, 4  ;;  %v1017_v9 = vld [vmem:[#allocation2 + $0xc8] sm:$0x1] }
  0xf9   : > { %1909 = vrot.lane.b32.xlu0 %v6687_v40, %s5663_s17  ;;  %v2217_v40 = vsel %vm2205_vm7, %v2184_v46, %v1931_v60  ;;  %v1591_v52 = vshll.u32 %v1017_v9, 16  ;;  %v1603_v27 = vrot.slane %v1017_v9, 5 }
  0xfa   : > { %1911 = vrot.lane.b32.xlu1 %v6749_v59, %s5663_s17  ;;  %v2250_v50 = vsel %vm2238_vm8, %v2217_v40, %v1966_v44  ;;  %v1570_v44 = vsel %vm5795_vm13, %v1568_v13, %v1569_v16  ;;  %v1588_v26 = vor.u32 %v1587_v12, %v1583_v42 }
  0xfb   : > { %v2034_v32 = vpop.permute.xlu0 %2033  ;;  %v2283_v29 = vsel %vm2271_vm11, %v2250_v50, %v2001_v62  ;;  %v6813_v33 = vcombine.low %v1567_v63, %v1570_v44  ;;  %v1578_v62 = vor.u32 %v1577_v55, %v1574_v47  ;;  %v1593_v40 = vrot.slane %v1591_v52, 5 }
  0xfc   : > { %v6766_v20 = vpop.permute.xlu1 %1747  ;;  %v2314_v11 = vsel %vm8546_vm12, %v2281_v18, %v2034_v32  ;;  %v1606_v18 = vshrl.u32 %v6817_v36, 16  ;;  %v1619_v32 = vshrl.u32 %v6819_v48, 16 }
  0xfd   : > { %1944 = vrot.lane.b32.xlu0 %v6706_v7, %s5661_s11  ;;  %5489 = vmatprep.mubr.msk.bf16.mxu0 %vm8545_vm15, %v2314_v11  ;;  %v1407_v7 = vsel %vm5842_vm14, %v1402_v61, %v1406_v54  ;;  %v1609_v61 = vshll.u32 %v6817_v36, 16  ;;  %v1579_v46 = vrot.slane %v1578_v62, 4  ;;  %v1589_v11 = vrot.slane %v1588_v26, 4  ;;  %v2672_v62 = vld [vmem:[#allocation3] sm:$0x1] }
  0xfe   : > { %1946 = vrot.lane.b32.xlu1 %v6762_v19, %s5661_s11  ;;  %v6796_v56 = vcombine.low %v1397_v14, %v1407_v7  ;;  %v1621_v14 = vrot.slane %v1619_v32, 4  ;;  %v6839_v7 = vcombine.low %v6787_v21, %v6789_v53 }
  0xff   : > { %v2036_v2 = vpop.permute.xlu0 %2035  ;;  %v1611_v13 = vrot.slane %v1609_v61, 5  ;;  %v1584_v31 = vsel %vm5842_vm14, %v1579_v46, %v1583_v42  ;;  %v1594_v22 = vsel %vm5842_vm14, %v1589_v11, %v1593_v40 }
 0x100   : > { %v1750_v60 = vpop.permute.xlu1 %1749  ;;  %v2316_v35 = vsel %vm8546_vm12, %v2283_v29, %v2036_v2  ;;  %v1608_v29 = vrot.slane %v1606_v18, 4  ;;  %v6833_v2 = vrot.slane %v1615_v49, 5 }
 0x101   : > { %1979 = vrot.lane.b32.xlu0 %v6727_v41, %s5659_s9  ;;  %5490 = vmatmul.mubr.msk.bf16.gmra.mrb[8].mxu0 %vm8545_vm15, %v2316_v35  ;;  %v2081_v16 = vsel %vm2057_vm1, %v6184_v25, %v1750_v60  ;;  %v6859_v25 = vcombine.low %v1584_v31, %v1594_v22  ;;  %v1625_v60 = vshll.u32 %v6850_v28, 16  ;;  %v2732_v22 = vld [vmem:[#allocation3 + $0x20] sm:$0x1] }
 0x102   : > { %1981 = vrot.lane.b32.xlu1 %v6778_v24, %s5659_s9  ;;  %v1612_v42 = vor.u32 %v1611_v13, %v1608_v29  ;;  %v2726_v29 = vld [vmem:[#allocation3 + $0x8] sm:$0x1] }
 0x103   : > { %v1828_v17 = vpop.permute.xlu0 %1827 }
 0x104   : > { %v1830_v23 = vpop.permute.xlu1 %1829  ;;  %v1613_v32 = vrot.slane %v1612_v42, 4 }
 0x105   : > { %2014 = vrot.lane.b32.xlu0 %v6749_v59, %s5664_s18 }
 0x106   : > { %2016 = vrot.lane.b32.xlu1 %v6796_v56, %s5664_s18  ;;  %v1618_v13 = vsel %vm5842_vm14, %v1613_v32, %v6833_v2 }
 0x107   : > { %v1863_v6 = vpop.permute.xlu0 %1862 }
 0x108   : > { %v1865_v34 = vpop.permute.xlu1 %1864 }
 0x109   : > { %2049 = vrot.lane.b32.xlu0 %v6762_v19, %s5662_s14 }
 0x10a   : > { %1763 = vrot.lane.b32.xlu1 %v6749_v59, %s5660_s10  ;;  %v1600_v59 = vrot.slane %v6789_v53, 5  ;;  %v1622_v53 = vor.u32 %v1621_v14, %v6833_v2 }
 0x10b   : > { %v1898_v5 = vpop.permute.xlu0 %1897 }
 0x10c   : > { %v1900_v10 = vpop.permute.xlu1 %1899  ;;  %v1602_v35 = vrot.slane %v1600_v59, 4  ;;  %v1601_v47 = vsel %vm5795_vm13, %v5167_v51, %v1600_v59  ;;  %v1623_v49 = vrot.slane %v1622_v53, 4  ;;  %v1627_v59 = vrot.slane %v1625_v60, 5  ;;  %v2729_v53 = vld [vmem:[#allocation3 + $0x14] sm:$0x1] }
 0x10d   : > { %2051 = vrot.lane.b32.xlu0 %v6813_v33, %s5662_s14  ;;  %v2730_v60 = vsel %vm5741_vm5, 0, %v2729_v53 }
 0x10e   : > { %1765 = vrot.lane.b32.xlu1 %v6796_v56, %s5660_s10  ;;  %v1604_v55 = vsel %vm5795_vm13, %v1602_v35, %v1603_v27  ;;  %v5168_v35 = vrot.slane %v6817_v36, 9  ;;  %2731 = vst [vmem:[#allocation3 + $0x14] sm:$0x1] %v2730_v60 }
 0x10f   : > { %v1933_v54 = vpop.permute.xlu0 %1932  ;;  %v6876_v52 = vcombine.low %v1601_v47, %v1604_v55 }
 0x110   : > { %v1935_v50 = vpop.permute.xlu1 %1934 }
 0x111   : > { %1843 = vrot.lane.b32.xlu0 %v6762_v19, %s5657_s30  ;;  %v2078_v19 = vsel %vm2057_vm1, %v6101_v4, %v6766_v20  ;;  %v2122_v4 = vsel %vm2106_vm2, %v2081_v16, %v1830_v23  ;;  %v1637_v16 = vrot.slane %v6850_v28, 5 }
 0x112   : > { %1845 = vrot.lane.b32.xlu1 %v6813_v33, %s5657_s30  ;;  %v2120_v20 = vsel %vm2106_vm2, %v2078_v19, %v1828_v17  ;;  %v2155_v12 = vsel %vm2139_vm4, %v2122_v4, %v1865_v34  ;;  %v1628_v19 = vsel %vm5842_vm14, %v1623_v49, %v1627_v59 }
 0x113   : > { %v1968_v39 = vpop.permute.xlu0 %1967  ;;  %v2153_v63 = vsel %vm2139_vm4, %v2120_v20, %v1863_v6  ;;  %v1634_v6 = vrot.slane %v6819_v48, 5  ;;  %v2188_v61 = vsel %vm2172_vm6, %v2155_v12, %v1900_v10  ;;  %v5220_v10 = vcombine.low %v6817_v36, %v6819_v48  ;;  %v2675_v36 = vld [vmem:[#allocation3 + $0xc] sm:$0x1] }
 0x114   : > { %v1970_v21 = vpop.permute.xlu1 %1969  ;;  %v2186_v23 = vsel %vm2172_vm6, %v2153_v63, %v1898_v5  ;;  %v2673_v5 = vsel %vm5718_vm3, 0, %v2672_v62  ;;  %v2221_v40 = vsel %vm2205_vm7, %v2188_v61, %v1935_v50  ;;  %v2727_v50 = vsel %vm5741_vm5, 0, %v2726_v29  ;;  %v3310_v63 = vld [vmem:[#allocation3 + $0x4] sm:$0xf] }
 0x115   : > { %1878 = vrot.lane.b32.xlu0 %v6778_v24, %s5658_s8  ;;  %v2219_v9 = vsel %vm2205_vm7, %v2186_v23, %v1933_v54  ;;  %2674 = vst [vmem:[#allocation3] sm:$0x1] %v2673_v5  ;;  %v1636_v51 = vrot.slane %v1634_v6, 4  ;;  %v2254_v14 = vsel %vm2238_vm8, %v2221_v40, %v1970_v21  ;;  %2728 = vst [vmem:[#allocation3 + $0x8] sm:$0x1] %v2727_v50  ;;  %v2676_v31 = vsel %vm5718_vm3, 0, %v2675_v36 }
 0x116   : > { %1880 = vrot.lane.b32.xlu1 %v6839_v7, %s5658_s8  ;;  %v2252_v26 = vsel %vm2238_vm8, %v2219_v9, %v1968_v39  ;;  %v5221_v2 = vcombine.low %v1618_v13, %v1628_v19  ;;  %v1635_v28 = vsel %vm5795_vm13, %v5168_v35, %v1634_v6  ;;  %2677 = vst [vmem:[#allocation3 + $0xc] sm:$0x1] %v2676_v31  ;;  %v2733_v21 = vsel %vm5741_vm5, 0, %v2732_v22 }
 0x117   : > { %v2003_v44 = vpop.permute.xlu0 %2002  ;;  %2734 = vst [vmem:[#allocation3 + $0x20] sm:$0x1] %v2733_v21  ;;  %v3373_v42 = vshll.u32 %v3310_v63, 16  ;;  %v3377_v23 = vshrl.u32 %v3310_v63, 16 }
 0x118   : > { %v2005_v17 = vpop.permute.xlu1 %2004  ;;  %v2285_v34 = vsel %vm2271_vm11, %v2252_v26, %v2003_v44 }
 0x119   : > { %1913 = vrot.lane.b32.xlu0 %v6796_v56, %s5663_s17  ;;  %v2678_v56 = vld [vmem:[#allocation3 + $0x18] sm:$0x1]  ;;  %v3375_v62 = vrot.slane %v3373_v42, 5  ;;  %v3379_v26 = vrot.slane %v3377_v23, 4  ;;  %v2681_v42 = vld [vmem:[#allocation3 + $0x24] sm:$0x1] }
 0x11a   : > { %1915 = vrot.lane.b32.xlu1 %v6859_v25, %s5663_s17  ;;  %v2679_v11 = vsel %vm5718_vm3, 0, %v2678_v56 }
 0x11b   : > { %v2038_v18 = vpop.permute.xlu0 %2037  ;;  %2680 = vst [vmem:[#allocation3 + $0x18] sm:$0x1] %v2679_v11  ;;  %v3380_v49 = vor.u32 %v3379_v26, %v3375_v62 }
 0x11c   : > { %v6882_v54 = vpop.permute.xlu1 %1751  ;;  %v2318_v46 = vsel %vm8546_vm12, %v2285_v34, %v2038_v18  ;;  %v3309_v4 = vld [vmem:[#allocation3] sm:$0xf]  ;;  %v3311_v6 = vld [vmem:[#allocation3 + $0x8] sm:$0x1] }
 0x11d   : > { %1948 = vrot.lane.b32.xlu0 %v6813_v33, %s5661_s11  ;;  %5493 = vmatprep.mubr.msk.bf16.mxu0 %vm8545_vm15, %v2318_v46  ;;  %v2287_v33 = vsel %vm2271_vm11, %v2254_v14, %v2005_v17  ;;  %v3364_v44 = vshrl.u32 %v3309_v4, 16  ;;  %v3367_v47 = vshll.u32 %v3309_v4, 16  ;;  %v3383_v18 = vshll.u32 %v3311_v6, 16 }
 0x11e   : > { %1950 = vrot.lane.b32.xlu1 %v6876_v52, %s5661_s11  ;;  %v5276_v61 = vrot.slane %v3309_v4, 9  ;;  %v3797_v46 = vrot.slane %v3310_v63, 5  ;;  %v3800_v11 = vrot.slane %v3311_v6, 5  ;;  %v2084_v19 = vsel %vm2057_vm1, %v6246_v30, %v6882_v54  ;;  %v2684_v54 = vld [vmem:[#allocation3 + $0x30] sm:$0x1] }
 0x11f   : > { %v2040_v27 = vpop.permute.xlu0 %2039  ;;  %v3366_v17 = vrot.slane %v3364_v44, 4  ;;  %v3369_v12 = vrot.slane %v3367_v47, 5  ;;  %v3385_v56 = vrot.slane %v3383_v18, 5 }
 0x120   : > { %v1754_v39 = vpop.permute.xlu1 %1753  ;;  %v2320_v48 = vsel %vm8546_vm12, %v2287_v33, %v2040_v27 }
 0x121   : > { %1983 = vrot.lane.b32.xlu0 %v6839_v7, %s5659_s9  ;;  %5494 = vmatmul.mubr.msk.bf16.gmra.mrb[12].mxu0 %vm8545_vm15, %v2320_v48  ;;  %v1638_v7 = vsel %vm5795_vm13, %v1636_v51, %v1637_v16  ;;  %v3370_v34 = vor.u32 %v3369_v12, %v3366_v17  ;;  %v2087_v16 = vsel %vm2057_vm1, %v6336_v15, %v1754_v39  ;;  %v2685_v39 = vsel %vm5718_vm3, 0, %v2684_v54  ;;  %v2744_v54 = vld [vmem:[#allocation3 + $0x50] sm:$0x1] }
 0x122   : > { %1985 = vrot.lane.b32.xlu1 %v5220_v10, %s5659_s9  ;;  %v5222_v9 = vcombine.low %v1635_v28, %v1638_v7  ;;  %v3798_v10 = vsel %vm5795_vm13, %v5276_v61, %v3797_v46  ;;  %2686 = vst [vmem:[#allocation3 + $0x30] sm:$0x1] %v2685_v39  ;;  %v2682_v12 = vsel %vm5718_vm3, 0, %v2681_v42 }
 0x123   : > { %v1832_v20 = vpop.permute.xlu0 %1831  ;;  %v3371_v59 = vrot.slane %v3370_v34, 4  ;;  %2683 = vst [vmem:[#allocation3 + $0x24] sm:$0x1] %v2682_v12 }
 0x124   : > { %v1834_v55 = vpop.permute.xlu1 %1833  ;;  %v2124_v22 = vsel %vm2106_vm2, %v2084_v19, %v1832_v20 }
 0x125   : > { %2018 = vrot.lane.b32.xlu0 %v6859_v25, %s5664_s18  ;;  %v3381_v25 = vrot.slane %v3380_v49, 4  ;;  %v3376_v51 = vsel %vm5842_vm14, %v3371_v59, %v3375_v62  ;;  %v2126_v31 = vsel %vm2106_vm2, %v2087_v16, %v1834_v55 }
 0x126   : > { %2020 = vrot.lane.b32.xlu1 %v5221_v2, %s5664_s18 }
 0x127   : > { %v1867_v5 = vpop.permute.xlu0 %1866  ;;  %v3386_v14 = vsel %vm5842_vm14, %v3381_v25, %v3385_v56 }
 0x128   : > { %v1869_v32 = vpop.permute.xlu1 %1868  ;;  %v5310_v35 = vcombine.low %v3376_v51, %v3386_v14  ;;  %v2157_v2 = vsel %vm2139_vm4, %v2124_v22, %v1867_v5  ;;  %v2735_v5 = vld [vmem:[#allocation3 + $0x2c] sm:$0x1] }
 0x129   : > { %2053 = vrot.lane.b32.xlu0 %v6876_v52, %s5662_s14  ;;  %v3799_v52 = vrot.slane %v3797_v46, 4  ;;  %v2159_v4 = vsel %vm2139_vm4, %v2126_v31, %v1869_v32  ;;  %v2736_v34 = vsel %vm5741_vm5, 0, %v2735_v5 }
 0x12a   : > { %2055 = vrot.lane.b32.xlu1 %v5222_v9, %s5662_s14  ;;  %v2738_v9 = vld [vmem:[#allocation3 + $0x38] sm:$0x1]  ;;  %2737 = vst [vmem:[#allocation3 + $0x2c] sm:$0x1] %v2736_v34 }
 0x12b   : > { %v1902_v40 = vpop.permute.xlu0 %1901  ;;  %v3801_v50 = vsel %vm5795_vm13, %v3799_v52, %v3800_v11  ;;  %v2739_v26 = vsel %vm5741_vm5, 0, %v2738_v9 }
 0x12c   : > { %v1904_v29 = vpop.permute.xlu1 %1903  ;;  %v5326_v27 = vcombine.low %v3798_v10, %v3801_v50  ;;  %v2190_v21 = vsel %vm2172_vm6, %v2157_v2, %v1902_v40  ;;  %2740 = vst [vmem:[#allocation3 + $0x38] sm:$0x1] %v2739_v26 }
 0x12d   : > { %4071 = vrot.lane.b32.xlu0 %v5310_v35, %s5660_s10  ;;  %v2192_v20 = vsel %vm2172_vm6, %v2159_v4, %v1904_v29 }
 0x12f   : > { %v1937_v33 = vpop.permute.xlu0 %1936 }
 0x130   : > { %v1939_v13 = vpop.permute.xlu1 %1938  ;;  %v2223_v30 = vsel %vm2205_vm7, %v2190_v21, %v1937_v33  ;;  %v2687_v21 = vld [vmem:[#allocation3 + $0x3c] sm:$0x1] }
 0x131   : > { %4151 = vrot.lane.b32.xlu0 %v5326_v27, %s5657_s30  ;;  %v2225_v47 = vsel %vm2205_vm7, %v2192_v20, %v1939_v13 }
 0x133   : > { %v1972_v48 = vpop.permute.xlu0 %1971 }
 0x134   : > { %v1974_v36 = vpop.permute.xlu1 %1973  ;;  %v2256_v15 = vsel %vm2238_vm8, %v2223_v30, %v1972_v48  ;;  %v2688_v30 = vsel %vm5718_vm3, 0, %v2687_v21 }
 0x135   : > { %v2258_v55 = vsel %vm2238_vm8, %v2225_v47, %v1974_v36  ;;  %2689 = vst [vmem:[#allocation3 + $0x3c] sm:$0x1] %v2688_v30 }
 0x137   : > { %v2007_v28 = vpop.permute.xlu0 %2006 }
 0x138   : > { %v2009_v53 = vpop.permute.xlu1 %2008  ;;  %v2289_v7 = vsel %vm2271_vm11, %v2256_v15, %v2007_v28 }
 0x139   : > { %v2291_v23 = vsel %vm2271_vm11, %v2258_v55, %v2009_v53 }
 0x13b   : > { %v2042_v60 = vpop.permute.xlu0 %2041 }
 0x13c   : > { %v1756_v63 = vpop.permute.xlu1 %1755  ;;  %v2322_v44 = vsel %vm8546_vm12, %v2289_v7, %v2042_v60  ;;  %v2745_v7 = vsel %vm5741_vm5, 0, %v2744_v54  ;;  %v2741_v60 = vld [vmem:[#allocation3 + $0x44] sm:$0x1] }
 0x13d   : > { %5497 = vmatprep.mubr.msk.bf16.mxu0 %vm8545_vm15, %v2322_v44  ;;  %v2090_v11 = vsel %vm2057_vm1, %v6409_v58, %v1756_v63  ;;  %v2690_v58 = vld [vmem:[#allocation3 + $0x48] sm:$0x1]  ;;  %2746 = vst [vmem:[#allocation3 + $0x50] sm:$0x1] %v2745_v7  ;;  %v2742_v20 = vsel %vm5741_vm5, 0, %v2741_v60 }
 0x13e   : > { %2743 = vst [vmem:[#allocation3 + $0x44] sm:$0x1] %v2742_v20  ;;  %v7032_v20 = vld [vmem:[%s8538_s2] ss:$0 sm:$0xff] }
 0x13f   : > { %v2044_v17 = vpop.permute.xlu0 %2043 }
 0x140   : > { %v1758_v6 = vpop.permute.xlu1 %1757  ;;  %v2324_v62 = vsel %vm8546_vm12, %v2291_v23, %v2044_v17 }
 0x141   : > { %5498 = vmatmul.mubr.msk.bf16.gmra.mrb[16].mxu0 %vm8545_vm15, %v2324_v62  ;;  %v2093_v40 = vsel %vm2057_vm1, %v6532_v37, %v1758_v6  ;;  %v2691_v37 = vsel %vm5718_vm3, 0, %v2690_v58  ;;  %v2693_v58 = vld [vmem:[#allocation3 + $0x54] sm:$0x1] }
 0x142   : > { %2692 = vst [vmem:[#allocation3 + $0x48] sm:$0x1] %v2691_v37  ;;  %v2750_v37 = vld [vmem:[#allocation3 + $0x68] sm:$0x1] }
 0x143   : > { %v1836_v18 = vpop.permute.xlu0 %1835 }
 0x144   : > { %v1838_v32 = vpop.permute.xlu1 %1837  ;;  %v2128_v10 = vsel %vm2106_vm2, %v2090_v11, %v1836_v18 }
 0x145   : > { %v2130_v14 = vsel %vm2106_vm2, %v2093_v40, %v1838_v32 }
 0x147   : > { %v1871_v49 = vpop.permute.xlu0 %1870 }
 0x148   : > { %v1873_v59 = vpop.permute.xlu1 %1872  ;;  %v2161_v52 = vsel %vm2139_vm4, %v2128_v10, %v1871_v49 }
 0x149   : > { %v2163_v27 = vsel %vm2139_vm4, %v2130_v14, %v1873_v59 }
 0x14b   : > { %v1906_v56 = vpop.permute.xlu0 %1905 }
 0x14c   : > { %v1908_v61 = vpop.permute.xlu1 %1907  ;;  %v2194_v50 = vsel %vm2172_vm6, %v2161_v52, %v1906_v56 }
 0x14d   : > { %v2196_v36 = vsel %vm2172_vm6, %v2163_v27, %v1908_v61 }
 0x14f   : > { %v1941_v25 = vpop.permute.xlu0 %1940 }
 0x150   : > { %v1943_v46 = vpop.permute.xlu1 %1942  ;;  %v2227_v13 = vsel %vm2205_vm7, %v2194_v50, %v1941_v25 }
 0x151   : > { %v2229_v2 = vsel %vm2205_vm7, %v2196_v36, %v1943_v46 }
 0x153   : > { %v1976_v51 = vpop.permute.xlu0 %1975 }
 0x154   : > { %v1978_v29 = vpop.permute.xlu1 %1977  ;;  %v2260_v19 = vsel %vm2238_vm8, %v2227_v13, %v1976_v51 }
 0x155   : > { %v2262_v28 = vsel %vm2238_vm8, %v2229_v2, %v1978_v29 }
 0x157   : > { %v2011_v35 = vpop.permute.xlu0 %2010 }
 0x158   : > { %v2013_v33 = vpop.permute.xlu1 %2012  ;;  %v2293_v16 = vsel %vm2271_vm11, %v2260_v19, %v2011_v35  ;;  %v2694_v19 = vsel %vm5718_vm3, 0, %v2693_v58 }
 0x159   : > { %v2295_v53 = vsel %vm2271_vm11, %v2262_v28, %v2013_v33  ;;  %2695 = vst [vmem:[#allocation3 + $0x54] sm:$0x1] %v2694_v19 }
 0x15b   : > { %v2046_v48 = vpop.permute.xlu0 %2045 }
 0x15c   : > { %v1760_v31 = vpop.permute.xlu1 %1759  ;;  %v2326_v22 = vsel %vm8546_vm12, %v2293_v16, %v2046_v48  ;;  %v2751_v16 = vsel %vm5741_vm5, 0, %v2750_v37  ;;  %v2747_v48 = vld [vmem:[#allocation3 + $0x5c] sm:$0x1] }
 0x15d   : > { %5501 = vmatprep.mubr.msk.bf16.mxu0 %vm8545_vm15, %v2326_v22  ;;  %v2096_v9 = vsel %vm2057_vm1, %v6613_v3, %v1760_v31  ;;  %v2696_v3 = vld [vmem:[#allocation3 + $0x60] sm:$0x1]  ;;  %2752 = vst [vmem:[#allocation3 + $0x68] sm:$0x1] %v2751_v16  ;;  %v2748_v31 = vsel %vm5741_vm5, 0, %v2747_v48 }
 0x15e   : > { %v2697_v46 = vsel %vm5718_vm3, 0, %v2696_v3  ;;  %2749 = vst [vmem:[#allocation3 + $0x5c] sm:$0x1] %v2748_v31  ;;  %v3204_v48 = vld [vmem:[#allocation3 + $0x18] sm:$0xf] }
 0x15f   : > { %v2048_v4 = vpop.permute.xlu0 %2047  ;;  %2698 = vst [vmem:[#allocation3 + $0x60] sm:$0x1] %v2697_v46 }
 0x160   : > { %v1762_v15 = vpop.permute.xlu1 %1761  ;;  %v2328_v39 = vsel %vm8546_vm12, %v2295_v53, %v2048_v4 }
 0x161   : > { %5502 = vmatmul.mubr.msk.bf16.gmra.mrb[20].mxu0 %vm8545_vm15, %v2328_v39  ;;  %v2099_v6 = vsel %vm2057_vm1, %v6672_v45, %v1762_v15 }
 0x163   : > { %v1840_v63 = vpop.permute.xlu0 %1839 }
 0x164   : > { %v1842_v44 = vpop.permute.xlu1 %1841  ;;  %v2132_v5 = vsel %vm2106_vm2, %v2096_v9, %v1840_v63 }
 0x165   : > { %v2134_v26 = vsel %vm2106_vm2, %v2099_v6, %v1842_v44  ;;  %v7038_v44 = vld [vmem:[%s8539_s3] ss:$0 sm:$0xff] }
 0x167   : > { %v1875_v47 = vpop.permute.xlu0 %1874 }
 0x168   : > { %v1877_v55 = vpop.permute.xlu1 %1876  ;;  %v2165_v32 = vsel %vm2139_vm4, %v2132_v5, %v1875_v47 }
 0x169   : > { %v2167_v18 = vsel %vm2139_vm4, %v2134_v26, %v1877_v55 }
 0x16b   : > { %v1910_v42 = vpop.permute.xlu0 %1909 }
 0x16c   : > { %v1912_v23 = vpop.permute.xlu1 %1911  ;;  %v2198_v59 = vsel %vm2172_vm6, %v2165_v32, %v1910_v42 }
 0x16d   : > { %v2200_v25 = vsel %vm2172_vm6, %v2167_v18, %v1912_v23  ;;  %v2702_v18 = vld [vmem:[#allocation3 + $0x78] sm:$0x1] }
 0x16f   : > { %v1945_v17 = vpop.permute.xlu0 %1944 }
 0x170   : > { %v1947_v12 = vpop.permute.xlu1 %1946  ;;  %v2231_v61 = vsel %vm2205_vm7, %v2198_v59, %v1945_v17 }
 0x171   : > { %v2233_v14 = vsel %vm2205_vm7, %v2200_v25, %v1947_v12 }
 0x173   : > { %v1980_v62 = vpop.permute.xlu0 %1979 }
 0x174   : > { %v1982_v34 = vpop.permute.xlu1 %1981  ;;  %v2264_v45 = vsel %vm2238_vm8, %v2231_v61, %v1980_v62 }
 0x175   : > { %v2266_v10 = vsel %vm2238_vm8, %v2233_v14, %v1982_v34 }
 0x177   : > { %v2015_v49 = vpop.permute.xlu0 %2014 }
 0x178   : > { %v2017_v56 = vpop.permute.xlu1 %2016  ;;  %v2297_v11 = vsel %vm2271_vm11, %v2264_v45, %v2015_v49 }
 0x179   : > { %v2299_v52 = vsel %vm2271_vm11, %v2266_v10, %v2017_v56  ;;  %v2703_v56 = vsel %vm5718_vm3, 0, %v2702_v18 }
 0x17a   : > { %2704 = vst [vmem:[#allocation3 + $0x78] sm:$0x1] %v2703_v56 }
 0x17b   : > { %v2050_v40 = vpop.permute.xlu0 %2049 }
 0x17c   : > { %v1764_v51 = vpop.permute.xlu1 %1763  ;;  %v2330_v29 = vsel %vm8546_vm12, %v2297_v11, %v2050_v40 }
 0x17d   : > { %5505 = vmatprep.mubr.msk.bf16.mxu0 %vm8545_vm15, %v2330_v29  ;;  %v2102_v54 = vsel %vm2057_vm1, %v6727_v41, %v1764_v51 }
 0x17f   : > { %v2052_v35 = vpop.permute.xlu0 %2051 }
 0x180   : > { %v1766_v50 = vpop.permute.xlu1 %1765  ;;  %v2332_v33 = vsel %vm8546_vm12, %v2299_v52, %v2052_v35 }
 0x181   : > { %5506 = vmatmul.mubr.msk.bf16.gmra.mrb[24].mxu0 %vm8545_vm15, %v2332_v33  ;;  %v2105_v21 = vsel %vm2057_vm1, %v6778_v24, %v1766_v50 }
 0x183   : > { %v1844_v27 = vpop.permute.xlu0 %1843 }
 0x184   : > { %v1846_v13 = vpop.permute.xlu1 %1845  ;;  %v2136_v7 = vsel %vm2106_vm2, %v2102_v54, %v1844_v27 }
 0x185   : > { %v2138_v4 = vsel %vm2106_vm2, %v2105_v21, %v1846_v13 }
 0x187   : > { %v1879_v36 = vpop.permute.xlu0 %1878 }
 0x188   : > { %v1881_v22 = vpop.permute.xlu1 %1880  ;;  %v2169_v41 = vsel %vm2139_vm4, %v2136_v7, %v1879_v36 }
 0x189   : > { %v2171_v15 = vsel %vm2139_vm4, %v2138_v4, %v1881_v22 }
 0x18b   : > { %v1914_v2 = vpop.permute.xlu0 %1913 }
 0x18c   : > { %v1916_v28 = vpop.permute.xlu1 %1915  ;;  %v2202_v23 = vsel %vm2172_vm6, %v2169_v41, %v1914_v2  ;;  %v3197_v2 = vld [vmem:[#allocation3 + $0xc] sm:$0xf] }
 0x18d   : > { %v2204_v24 = vsel %vm2172_vm6, %v2171_v15, %v1916_v28 }
 0x18f   : > { %v1949_v53 = vpop.permute.xlu0 %1948 }
 0x190   : > { %v1951_v30 = vpop.permute.xlu1 %1950  ;;  %v2235_v62 = vsel %vm2205_vm7, %v2202_v23, %v1949_v53  ;;  %v2756_v23 = vld [vmem:[#allocation3 + $0x80] sm:$0x1] }
 0x191   : > { %v2237_v6 = vsel %vm2205_vm7, %v2204_v24, %v1951_v30  ;;  %v3208_v30 = vld [vmem:[#allocation3 + $0x20] sm:$0x1]  ;;  %v2699_v24 = vld [vmem:[#allocation3 + $0x6c] sm:$0x1] }
 0x193   : > { %v1984_v39 = vpop.permute.xlu0 %1983 }
 0x194   : > { %v1986_v60 = vpop.permute.xlu1 %1985  ;;  %v2268_v32 = vsel %vm2238_vm8, %v2235_v62, %v1984_v39  ;;  %v2753_v62 = vld [vmem:[#allocation3 + $0x74] sm:$0x1] }
 0x195   : > { %v2270_v61 = vsel %vm2238_vm8, %v2237_v6, %v1986_v60  ;;  %v2757_v6 = vsel %vm5741_vm5, 0, %v2756_v23 }
 0x196   : > { %v5483_v63 = vpop.f32.mrb[0].mxu0  ;;  %2758 = vst [vmem:[#allocation3 + $0x80] sm:$0x1] %v2757_v6 }
 0x197   : > { %v2564_v47 = vmul.f32 %v5483_v63, %v7032_v20  ;;  %v2428_v55 = vpop.f32.mrb[1].mxu0  ;;  %v2019_v42 = vpop.permute.xlu0 %2018 }
 0x198   : > { %v2021_v17 = vpop.permute.xlu1 %2020  ;;  %v2562_v12 = vmul.f32 %v7032_v20, %v2428_v55  ;;  %v5484_v9 = vpop.f32.mrb[2].mxu0  ;;  %v2301_v25 = vsel %vm2271_vm11, %v2268_v32, %v2019_v42  ;;  %v3201_v55 = vld [vmem:[#allocation3 + $0x14] sm:$0x1]  ;;  %v2700_v42 = vsel %vm5718_vm3, 0, %v2699_v24 }
 0x199   : > { %v2603_v26 = vadd.f32 %v7038_v44, %v2564_v47  ;;  %v2565_v5 = vmul.f32 %v5484_v9, %v7032_v20  ;;  %v2431_v34 = vpop.f32.mrb[3].mxu0  ;;  %v2303_v11 = vsel %vm2271_vm11, %v2270_v61, %v2021_v17  ;;  %2701 = vst [vmem:[#allocation3 + $0x6c] sm:$0x1] %v2700_v42 }
 0x19a   : > { %v2601_v49 = vadd.f32 %v7038_v44, %v2562_v12  ;;  %v2563_v59 = vmul.f32 %v7032_v20, %v2431_v34  ;;  %v2754_v34 = vsel %vm5741_vm5, 0, %v2753_v62 }
 0x19b   : > { %v2635_v3 = vmax.f32 %v2603_v26, 0.0  ;;  %v2604_v45 = vadd.f32 %v7038_v44, %v2565_v5  ;;  %v2054_v46 = vpop.permute.xlu0 %2053  ;;  %2755 = vst [vmem:[#allocation3 + $0x74] sm:$0x1] %v2754_v34 }
 0x19c   : > { %v2633_v40 = vmax.f32 %v2601_v49, 0.0  ;;  %v2056_v51 = vpop.permute.xlu1 %2055  ;;  %v2602_v29 = vadd.f32 %v7038_v44, %v2563_v59  ;;  %v2334_v14 = vsel %vm8546_vm12, %v2301_v25, %v2054_v46 }
 0x19d   : > { %v5407_v10 = vpack.c.bf16 %v2635_v3, %v2635_v3  ;;  %v2336_v52 = vsel %vm8546_vm12, %v2303_v11, %v2056_v51  ;;  %v2636_v35 = vmax.f32 %v2604_v45, 0.0  ;;  %5509 = vmatprep.mubr.msk.bf16.mxu0 %vm8545_vm15, %v2334_v14 }
 0x19e   : > { %v5405_v50 = vpack.c.bf16 %v2633_v40, %v2633_v40  ;;  %v2634_v33 = vmax.f32 %v2602_v29, 0.0  ;;  %5510 = vmatmul.mubr.msk.bf16.gmra.mrb[28].mxu0 %vm8545_vm15, %v2336_v52  ;;  %vm8568_vm15 = vcmask 1041408  }
 0x19f   : > { %v2894_v27 = vshrl.u32 %v5407_v10, 16  ;;  %v5408_v13 = vpack.c.bf16 %v2636_v35, %v2636_v35  ;;  %v2897_v16 = vshll.u32 %v5407_v10, 16  ;;  %vm8569_vm12 = vmmov %vm8568_vm15 }
 0x1a0   : > { %v2877_v58 = vshrl.u32 %v5405_v50, 16  ;;  %v5406_v19 = vpack.c.bf16 %v2634_v33, %v2634_v33  ;;  %v2880_v22 = vshll.u32 %v5405_v50, 16 }
 0x1a1   : > { %v2896_v37 = vrot.slane %v2894_v27, 7  ;;  %v2902_v36 = vshrl.u32 %v5408_v13, 16  ;;  %v2905_v4 = vshll.u32 %v5408_v13, 16 }
 0x1a2   : > { %v2879_v31 = vrot.slane %v2877_v58, 7  ;;  %v2885_v28 = vshrl.u32 %v5406_v19, 16  ;;  %v2888_v54 = vshll.u32 %v5406_v19, 16 }
 0x1a3   : > { %v2899_v21 = vor.u32 %v2897_v16, %v2896_v37  ;;  %v2904_v53 = vrot.slane %v2902_v36, 7  ;;  %v2900_v15 = vrot.slane %v2896_v37, 4 }
 0x1a4   : > { %v2882_v39 = vor.u32 %v2880_v22, %v2879_v31  ;;  %v2883_v7 = vrot.slane %v2879_v31, 4  ;;  %v2887_v60 = vrot.slane %v2885_v28, 7 }
 0x1a5   : > { %v3205_v63 = vsel %vm5782_vm10, %v2899_v21, %v3204_v48  ;;  %v2907_v41 = vor.u32 %v2905_v4, %v2904_v53  ;;  %v2909_v47 = vrot.slane %v2904_v53, 4 }
 0x1a6   : > { %3206 = vst [vmem:[#allocation3 + $0x18] sm:$0xf] %v3205_v63  ;;  %v3198_v17 = vsel %vm5782_vm10, %v2882_v39, %v3197_v2  ;;  %v2890_v12 = vor.u32 %v2888_v54, %v2887_v60  ;;  %v2892_v9 = vrot.slane %v2887_v60, 4 }
 0x1a7   : > { %3199 = vst [vmem:[#allocation3 + $0xc] sm:$0xf] %v3198_v17  ;;  %v2908_v26 = vsel %vm5774_vm9, %v2900_v15, %v2907_v41  ;;  %v3209_v5 = vsel %vm5718_vm3, %v2909_v47, %v3208_v30 }
 0x1a8   : > { %3207 = vst.msk [vmem:[#allocation3 + $0x1c] sm:$0xf] %vm312_vm0, %v2908_v26  ;;  %3210 = vst [vmem:[#allocation3 + $0x20] sm:$0x1] %v3209_v5  ;;  %v2891_v18 = vsel %vm5774_vm9, %v2883_v7, %v2890_v12  ;;  %v3202_v32 = vsel %vm5718_vm3, %v2892_v9, %v3201_v55 }
 0x1a9   : > { %3200 = vst.msk [vmem:[#allocation3 + $0x10] sm:$0xf] %vm312_vm0, %v2891_v18  ;;  %3203 = vst [vmem:[#allocation3 + $0x14] sm:$0x1] %v3202_v32 }
 0x1ad   : > { %v3315_v49 = vld [vmem:[#allocation3 + $0x18] sm:$0xf] }
 0x1ae   : > { %v5278_v11 = vrot.slane %v3315_v49, 9  ;;  %v7100_v29 = vld [vmem:[#allocation3 + $0xc] sm:$0xf]  ;;  %v3412_v54 = vshrl.u32 %v3315_v49, 16  ;;  %v3415_v15 = vshll.u32 %v3315_v49, 16 }
 0x1af   : > { %v7082_v59 = vld [vmem:[#allocation3 + $0x1c] sm:$0xf]  ;;  %v7084_v56 = vld [vmem:[#allocation3 + $0x20] sm:$0x1]  ;;  %v5277_v16 = vrot.slane %v7100_v29, 9  ;;  %v3388_v41 = vshrl.u32 %v7100_v29, 16 }
 0x1b0   : > { %v7087_v61 = vcombine.low %v3315_v49, %v7082_v59  ;;  %v7089_v3 = vld [vmem:[#allocation3 + $0x10] sm:$0xf]  ;;  %v3811_v25 = vrot.slane %v7082_v59, 5  ;;  %v7092_v45 = vld [vmem:[#allocation3 + $0x14] sm:$0x1]  ;;  %v3814_v51 = vrot.slane %v7084_v56, 5 }
 0x1b1   : > { %v3804_v46 = vrot.slane %v7089_v3, 5  ;;  %v7104_v52 = vcombine.low %v7100_v29, %v7089_v3  ;;  %v3807_v33 = vrot.slane %v7092_v45, 5  ;;  %v3425_v60 = vshrl.u32 %v7082_v59, 16 }
 0x1b2   : > { %4188 = vrot.lane.b32.xlu1 %v7087_v61, %s5658_s8  ;;  %4291 = vrot.lane.b32.xlu0 %v7087_v61, %s5659_s9  ;;  %v3813_v40 = vrot.slane %v3811_v25, 4  ;;  %v3812_v35 = vsel %vm5795_vm13, %v5278_v11, %v3811_v25  ;;  %v3391_v55 = vshll.u32 %v7100_v29, 16  ;;  %v3421_v23 = vshll.u32 %v7082_v59, 16  ;;  %v3218_v59 = vld [vmem:[#allocation3 + $0x30] sm:$0xf] }
 0x1b3   : > { %v3806_v14 = vrot.slane %v3804_v46, 4  ;;  %v3805_v21 = vsel %vm5795_vm13, %v5277_v16, %v3804_v46  ;;  %v3401_v9 = vshrl.u32 %v7089_v3, 16  ;;  %v3397_v6 = vshll.u32 %v7089_v3, 16  ;;  %v2708_v46 = vld [vmem:[#allocation3 + $0x90] sm:$0x1] }
 0x1b4   : > { %v5487_v10 = vpop.f32.mrb[4].mxu0  ;;  %v3815_v50 = vsel %vm5795_vm13, %v3813_v40, %v3814_v51  ;;  %v7136_v5 = vrot.slane %v3412_v54, 4  ;;  %v7138_v34 = vrot.slane %v3415_v15, 5  ;;  %v3427_v25 = vrot.slane %v3425_v60, 4 }
 0x1b5   : > { %v2568_v27 = vmul.f32 %v5487_v10, %v7032_v20  ;;  %v2444_v13 = vpop.f32.mrb[5].mxu0  ;;  %v5328_v58 = vcombine.low %v3812_v35, %v3815_v50  ;;  %v3808_v48 = vsel %vm5795_vm13, %v3806_v14, %v3807_v33  ;;  %v7140_v14 = vrot.slane %v3421_v23, 5  ;;  %v3211_v10 = vld [vmem:[#allocation3 + $0x24] sm:$0xf] }
 0x1b6   : > { %v2566_v19 = vmul.f32 %v7032_v20, %v2444_v13  ;;  %v5488_v37 = vpop.f32.mrb[6].mxu0  ;;  %4186 = vrot.lane.b32.xlu0 %v7104_v52, %s5658_s8  ;;  %v5327_v30 = vcombine.low %v3805_v21, %v3808_v48  ;;  %v7142_v33 = vrot.slane %v3397_v6, 5  ;;  %v3222_v13 = vld [vmem:[#allocation3 + $0x38] sm:$0x1]  ;;  %v3403_v15 = vrot.slane %v3401_v9, 4 }
 0x1b7   : > { %v2607_v36 = vadd.f32 %v7038_v44, %v2568_v27  ;;  %v2569_v31 = vmul.f32 %v5488_v37, %v7032_v20  ;;  %4258 = vrot.lane.b32.xlu1 %v5328_v58, %s5661_s11  ;;  %v2447_v22 = vpop.f32.mrb[7].mxu0  ;;  %v2709_v37 = vsel %vm5718_vm3, 0, %v2708_v46  ;;  %v3390_v23 = vrot.slane %v3388_v41, 4 }
 0x1b8   : > { %v2605_v2 = vadd.f32 %v7038_v44, %v2566_v19  ;;  %v2567_v28 = vmul.f32 %v7032_v20, %v2447_v22  ;;  %v3215_v22 = vld [vmem:[#allocation3 + $0x2c] sm:$0x1]  ;;  %2710 = vst [vmem:[#allocation3 + $0x90] sm:$0x1] %v2709_v37  ;;  %v3431_v9 = vshll.u32 %v7084_v56, 16  ;;  %v3418_v6 = vor.u32 %v7138_v34, %v7136_v5 }
 0x1b9   : > { %v2639_v53 = vmax.f32 %v2607_v36, 0.0  ;;  %v2608_v4 = vadd.f32 %v7038_v44, %v2569_v31 }
 0x1ba   : > { %v2637_v39 = vmax.f32 %v2605_v2, 0.0  ;;  %v2606_v7 = vadd.f32 %v7038_v44, %v2567_v28  ;;  %4361 = vrot.lane.b32.xlu0 %v5328_v58, %s5662_s14 }
 0x1bb   : > { %v5411_v24 = vpack.c.bf16 %v2639_v53, %v2639_v53  ;;  %v2640_v63 = vmax.f32 %v2608_v4, 0.0  ;;  %4153 = vrot.lane.b32.xlu1 %v5327_v30, %s5657_s30  ;;  %v2705_v4 = vld [vmem:[#allocation3 + $0x84] sm:$0x1] }
 0x1bc   : > { %v5409_v47 = vpack.c.bf16 %v2637_v39, %v2637_v39  ;;  %v2638_v42 = vmax.f32 %v2606_v7, 0.0  ;;  %v2706_v39 = vsel %vm5718_vm3, 0, %v2705_v4  ;;  %v2762_v7 = vld [vmem:[#allocation3 + $0x98] sm:$0x1] }
 0x1bd   : > { %v2928_v17 = vshrl.u32 %v5411_v24, 16  ;;  %v5412_v12 = vpack.c.bf16 %v2640_v63, %v2640_v63  ;;  %v2931_v32 = vshll.u32 %v5411_v24, 16  ;;  %2707 = vst [vmem:[#allocation3 + $0x84] sm:$0x1] %v2706_v39  ;;  %v2763_v63 = vsel %vm5741_vm5, 0, %v2762_v7 }
 0x1be   : > { %v2911_v62 = vshrl.u32 %v5409_v47, 16  ;;  %v5410_v26 = vpack.c.bf16 %v2638_v42, %v2638_v42  ;;  %4155 = vrot.lane.b32.xlu0 %v5328_v58, %s5657_s30  ;;  %v2914_v40 = vshll.u32 %v5409_v47, 16  ;;  %v2759_v47 = vld [vmem:[#allocation3 + $0x8c] sm:$0x1]  ;;  %v3428_v42 = vor.u32 %v3427_v25, %v7140_v14  ;;  %2764 = vst [vmem:[#allocation3 + $0x98] sm:$0x1] %v2763_v63 }
 0x1bf   : > { %v2930_v18 = vrot.slane %v2928_v17, 7  ;;  %v2936_v49 = vshrl.u32 %v5412_v12, 16  ;;  %v2939_v50 = vshll.u32 %v5412_v12, 16  ;;  %v3393_v17 = vrot.slane %v3391_v55, 5 }
 0x1c0   : > { %v2913_v11 = vrot.slane %v2911_v62, 7  ;;  %v2919_v51 = vshrl.u32 %v5410_v26, 16  ;;  %v2922_v19 = vshll.u32 %v5410_v26, 16  ;;  %v2760_v12 = vsel %vm5741_vm5, 0, %v2759_v47 }
 0x1c1   : > { %v2933_v3 = vor.u32 %v2931_v32, %v2930_v18  ;;  %v2938_v35 = vrot.slane %v2936_v49, 7  ;;  %v2934_v16 = vrot.slane %v2930_v18, 4  ;;  %2761 = vst [vmem:[#allocation3 + $0x8c] sm:$0x1] %v2760_v12  ;;  %v3404_v62 = vor.u32 %v3403_v15, %v7142_v33 }
 0x1c2   : > { %v2916_v27 = vor.u32 %v2914_v40, %v2913_v11  ;;  %v2921_v58 = vrot.slane %v2919_v51, 7  ;;  %4256 = vrot.lane.b32.xlu0 %v5327_v30, %s5661_s11  ;;  %v2917_v2 = vrot.slane %v2913_v11, 4  ;;  %v3429_v26 = vrot.slane %v3428_v42, 4 }
 0x1c3   : > { %v3219_v48 = vsel %vm5782_vm10, %v2933_v3, %v3218_v59  ;;  %v2941_v36 = vor.u32 %v2939_v50, %v2938_v35  ;;  %v2943_v31 = vrot.slane %v2938_v35, 4  ;;  %v3394_v18 = vor.u32 %v3393_v17, %v3390_v23  ;;  %v2714_v17 = vld [vmem:[#allocation3 + $0xa8] sm:$0x1] }
 0x1c4   : > { %3220 = vst [vmem:[#allocation3 + $0x30] sm:$0xf] %v3219_v48  ;;  %v3212_v28 = vsel %vm5782_vm10, %v2916_v27, %v3211_v10  ;;  %v2924_v21 = vor.u32 %v2922_v19, %v2921_v58  ;;  %v2926_v53 = vrot.slane %v2921_v58, 4  ;;  %v3407_v32 = vshll.u32 %v7092_v45, 16 }
 0x1c5   : > { %3213 = vst [vmem:[#allocation3 + $0x24] sm:$0xf] %v3212_v28  ;;  %v2942_v30 = vsel %vm5774_vm9, %v2934_v16, %v2941_v36  ;;  %v3223_v54 = vsel %vm5718_vm3, %v2943_v31, %v3222_v13  ;;  %v3433_v49 = vrot.slane %v3431_v9, 5  ;;  %v3419_v55 = vrot.slane %v3418_v6, 4 }
 0x1c6   : > { %3221 = vst.msk [vmem:[#allocation3 + $0x34] sm:$0xf] %vm312_vm0, %v2942_v30  ;;  %3224 = vst [vmem:[#allocation3 + $0x38] sm:$0x1] %v3223_v54  ;;  %v2925_v60 = vsel %vm5774_vm9, %v2917_v2, %v2924_v21  ;;  %v3216_v24 = vsel %vm5718_vm3, %v2926_v53, %v3215_v22  ;;  %v3405_v25 = vrot.slane %v3404_v62, 4  ;;  %v3395_v34 = vrot.slane %v3394_v18, 4 }
 0x1c7   : > { %3214 = vst.msk [vmem:[#allocation3 + $0x28] sm:$0xf] %vm312_vm0, %v2925_v60  ;;  %3217 = vst [vmem:[#allocation3 + $0x2c] sm:$0x1] %v3216_v24  ;;  %v3434_v5 = vsel %vm5842_vm14, %v3429_v26, %v3433_v49  ;;  %v3409_v46 = vrot.slane %v3407_v32, 5  ;;  %v3424_v45 = vsel %vm5842_vm14, %v3419_v55, %v7140_v14  ;;  %v2715_v49 = vsel %vm5718_vm3, 0, %v2714_v17 }
 0x1c8   : > { %v5312_v11 = vcombine.low %v3424_v45, %v3434_v5  ;;  %v3400_v3 = vsel %vm5842_vm14, %v3395_v34, %v7142_v33  ;;  %2716 = vst [vmem:[#allocation3 + $0xa8] sm:$0x1] %v2715_v49  ;;  %v2768_v49 = vld [vmem:[#allocation3 + $0xb0] sm:$0x1] }
 0x1c9   : > { %v3410_v59 = vsel %vm5842_vm14, %v3405_v25, %v3409_v46 }
 0x1ca   : > { %v5311_v13 = vcombine.low %v3400_v3, %v3410_v59 }
 0x1cb   : > { %v7175_v29 = vld [vmem:[#allocation3 + $0x30] sm:$0xf] }
 0x1cc   : > { %v7194_v40 = vld [vmem:[#allocation3 + $0x24] sm:$0xf]  ;;  %v3460_v50 = vshrl.u32 %v7175_v29, 16  ;;  %v3463_v14 = vshll.u32 %v7175_v29, 16  ;;  %v5280_v58 = vrot.slane %v7175_v29, 9 }
 0x1cd   : > { %v7177_v41 = vld [vmem:[#allocation3 + $0x34] sm:$0xf]  ;;  %v7201_v10 = vld [vmem:[#allocation3 + $0x38] sm:$0x1]  ;;  %v3436_v16 = vshrl.u32 %v7194_v40, 16  ;;  %v3439_v48 = vshll.u32 %v7194_v40, 16 }
 0x1ce   : > { %v7181_v56 = vcombine.low %v7175_v29, %v7177_v41  ;;  %v7196_v51 = vld [vmem:[#allocation3 + $0x28] sm:$0xf]  ;;  %v3825_v35 = vrot.slane %v7177_v41, 5  ;;  %v3473_v19 = vshrl.u32 %v7177_v41, 16  ;;  %v3828_v2 = vrot.slane %v7201_v10, 5 }
 0x1cf   : > { %v7216_v22 = vcombine.low %v7194_v40, %v7196_v51  ;;  %v7219_v28 = vld [vmem:[#allocation3 + $0x2c] sm:$0x1]  ;;  %v3818_v21 = vrot.slane %v7196_v51, 5  ;;  %v3449_v54 = vshrl.u32 %v7196_v51, 16  ;;  %v5279_v24 = vrot.slane %v7194_v40, 9 }
 0x1d0   : > { %4192 = vrot.lane.b32.xlu1 %v7181_v56, %s5658_s8  ;;  %4295 = vrot.lane.b32.xlu0 %v7181_v56, %s5659_s9  ;;  %v3827_v15 = vrot.slane %v3825_v35, 4  ;;  %v3826_v60 = vsel %vm5795_vm13, %v5280_v58, %v3825_v35  ;;  %v3821_v42 = vrot.slane %v7219_v28, 5  ;;  %v7236_v23 = vrot.slane %v3460_v50, 4 }
 0x1d1   : > { %v3819_v6 = vsel %vm5795_vm13, %v5279_v24, %v3818_v21  ;;  %v3820_v62 = vrot.slane %v3818_v21, 4  ;;  %v7247_v25 = vrot.slane %v3463_v14, 5  ;;  %v3469_v5 = vshll.u32 %v7177_v41, 16 }
 0x1d2   : > { %v3829_v32 = vsel %vm5795_vm13, %v3827_v15, %v3828_v2  ;;  %v7250_v45 = vrot.slane %v3473_v19, 4  ;;  %v7252_v59 = vrot.slane %v3436_v16, 4  ;;  %v3225_v2 = vld [vmem:[#allocation3 + $0x3c] sm:$0xf] }
 0x1d3   : > { %v5330_v50 = vcombine.low %v3826_v60, %v3829_v32  ;;  %v3822_v14 = vsel %vm5795_vm13, %v3820_v62, %v3821_v42  ;;  %v7259_v19 = vrot.slane %v3469_v5, 5  ;;  %v3441_v5 = vrot.slane %v3439_v48, 5  ;;  %v5602_v48 = vld [vmem:[%s8540_s4] sm:$0xff]  }
 0x1d4   : > { %4223 = vrot.lane.b32.xlu1 %v5312_v11, %s5663_s17  ;;  %4326 = vrot.lane.b32.xlu0 %v5312_v11, %s5664_s18  ;;  %v5491_v27 = vpop.f32.mrb[8].mxu0 }
 0x1d5   : > { %v2572_v33 = vmul.f32 %v5491_v27, %v7032_v20  ;;  %v2460_v37 = vpop.f32.mrb[9].mxu0  ;;  %v3445_v27 = vshll.u32 %v7196_v51, 16  ;;  %5513 = vmatprep.subr.bf16.mxu1 %v5602_v48 }
 0x1d6   : > { %v2570_v36 = vmul.f32 %v7032_v20, %v2460_v37  ;;  %v5492_v31 = vpop.f32.mrb[10].mxu0  ;;  %v3232_v37 = vld [vmem:[#allocation3 + $0x48] sm:$0xf]  ;;  %5514 = vmatpush3.bf16.msra.mxu1 %v5602_v48 }
 0x1d7   : > { %v2611_v53 = vadd.f32 %v7038_v44, %v2572_v33  ;;  %v2573_v4 = vmul.f32 %v5492_v31, %v7032_v20  ;;  %v2463_v30 = vpop.f32.mrb[11].mxu0 }
 0x1d8   : > { %v2609_v39 = vadd.f32 %v7038_v44, %v2570_v36  ;;  %v2571_v7 = vmul.f32 %v7032_v20, %v2463_v30  ;;  %4293 = vrot.lane.b32.xlu1 %v7216_v22, %s5659_s9  ;;  %4190 = vrot.lane.b32.xlu0 %v7216_v22, %s5658_s8  ;;  %v3236_v30 = vld [vmem:[#allocation3 + $0x50] sm:$0x1] }
 0x1d9   : > { %v2643_v63 = vmax.f32 %v2611_v53, 0.0  ;;  %v2612_v47 = vadd.f32 %v7038_v44, %v2573_v4  ;;  %v3451_v53 = vrot.slane %v3449_v54, 4 }
 0x1da   : > { %v2641_v12 = vmax.f32 %v2609_v39, 0.0  ;;  %v2610_v9 = vadd.f32 %v7038_v44, %v2571_v7  ;;  %v7261_v7 = vrot.slane %v3445_v27, 5  ;;  %v3455_v27 = vshll.u32 %v7219_v28, 16 }
 0x1db   : > { %v5415_v26 = vpack.c.bf16 %v2643_v63, %v2643_v63  ;;  %v2644_v18 = vmax.f32 %v2612_v47, 0.0  ;;  %v3229_v47 = vld [vmem:[#allocation3 + $0x44] sm:$0x1] }
 0x1dc   : > { %v5413_v29 = vpack.c.bf16 %v2641_v12, %v2641_v12  ;;  %v2642_v55 = vmax.f32 %v2610_v9, 0.0  ;;  %4075 = vrot.lane.b32.xlu1 %v5312_v11, %s5660_s10  ;;  %4221 = vrot.lane.b32.xlu0 %v5311_v13, %s5663_s17  ;;  %v2711_v9 = vld [vmem:[#allocation3 + $0x9c] sm:$0x1]  ;;  %v3452_v40 = vor.u32 %v3451_v53, %v7261_v7 }
 0x1dd   : > { %v2962_v34 = vshrl.u32 %v5415_v26, 16  ;;  %v5416_v46 = vpack.c.bf16 %v2644_v18, %v2644_v18  ;;  %v2965_v11 = vshll.u32 %v5415_v26, 16  ;;  %v5329_v18 = vcombine.low %v3819_v6, %v3822_v14 }
 0x1de   : > { %v2945_v3 = vshrl.u32 %v5413_v29, 16  ;;  %v5414_v35 = vpack.c.bf16 %v2642_v55, %v2642_v55  ;;  %v2948_v36 = vshll.u32 %v5413_v29, 16  ;;  %v2712_v32 = vsel %vm5718_vm3, 0, %v2711_v9 }
 0x1df   : > { %v2964_v58 = vrot.slane %v2962_v34, 7  ;;  %v2970_v33 = vshrl.u32 %v5416_v46, 16  ;;  %v2973_v51 = vshll.u32 %v5416_v46, 16  ;;  %2713 = vst [vmem:[#allocation3 + $0x9c] sm:$0x1] %v2712_v32  ;;  %v2769_v6 = vsel %vm5741_vm5, 0, %v2768_v49 }
 0x1e0   : > { %v2947_v41 = vrot.slane %v2945_v3, 7  ;;  %v2953_v31 = vshrl.u32 %v5414_v35, 16  ;;  %4073 = vrot.lane.b32.xlu1 %v5311_v13, %s5660_s10  ;;  %4365 = vrot.lane.b32.xlu0 %v5330_v50, %s5662_s14  ;;  %v2956_v39 = vshll.u32 %v5414_v35, 16  ;;  %v2765_v34 = vld [vmem:[#allocation3 + $0xa4] sm:$0x1]  ;;  %v3476_v46 = vor.u32 %v7250_v45, %v7259_v19 }
 0x1e1   : > { %v2967_v16 = vor.u32 %v2965_v11, %v2964_v58  ;;  %v2972_v21 = vrot.slane %v2970_v33, 7  ;;  %v2968_v60 = vrot.slane %v2964_v58, 4  ;;  %2770 = vst [vmem:[#allocation3 + $0xb0] sm:$0x1] %v2769_v6  ;;  %v2766_v3 = vsel %vm5741_vm5, 0, %v2765_v34  ;;  %v5603_v33 = vld [vmem:[%s8540_s4 + $0x8] sm:$0xff]  }
 0x1e2   : > { %v2950_v4 = vor.u32 %v2948_v36, %v2947_v41  ;;  %v2955_v15 = vrot.slane %v2953_v31, 7  ;;  %v2951_v42 = vrot.slane %v2947_v41, 4  ;;  %2767 = vst [vmem:[#allocation3 + $0xa4] sm:$0x1] %v2766_v3  ;;  %v3466_v35 = vor.u32 %v7247_v25, %v7236_v23  ;;  %5515 = vmatprep.subr.bf16.mxu1 %v5603_v33  ;;  %v2720_v3 = vld [vmem:[#allocation3 + $0xc0] sm:$0x1] }
 0x1e3   : > { %v3233_v24 = vsel %vm5782_vm10, %v2967_v16, %v3232_v37  ;;  %v2975_v13 = vor.u32 %v2973_v51, %v2972_v21  ;;  %v2977_v63 = vrot.slane %v2972_v21, 4  ;;  %v3479_v45 = vshll.u32 %v7201_v10, 16  ;;  %5516 = vmatpush3.bf16.msra.mxu1 %v5603_v33 }
 0x1e4   : > { %3234 = vst [vmem:[#allocation3 + $0x48] sm:$0xf] %v3233_v24  ;;  %v3226_v17 = vsel %vm5782_vm10, %v2950_v4, %v3225_v2  ;;  %v2958_v12 = vor.u32 %v2956_v39, %v2955_v15  ;;  %v2960_v54 = vrot.slane %v2955_v15, 4  ;;  %4262 = vrot.lane.b32.xlu1 %v5330_v50, %s5661_s11  ;;  %4159 = vrot.lane.b32.xlu0 %v5330_v50, %s5657_s30  ;;  %v3477_v58 = vrot.slane %v3476_v46, 4 }
 0x1e5   : > { %3227 = vst [vmem:[#allocation3 + $0x3c] sm:$0xf] %v3226_v17  ;;  %v2976_v62 = vsel %vm5774_vm9, %v2968_v60, %v2975_v13  ;;  %v3237_v26 = vsel %vm5718_vm3, %v2977_v63, %v3236_v30  ;;  %v3442_v50 = vor.u32 %v3441_v5, %v7252_v59  ;;  %v3453_v11 = vrot.slane %v3452_v40, 4 }
 0x1e6   : > { %3235 = vst.msk [vmem:[#allocation3 + $0x4c] sm:$0xf] %vm312_vm0, %v2976_v62  ;;  %3238 = vst [vmem:[#allocation3 + $0x50] sm:$0x1] %v3237_v26  ;;  %v2959_v29 = vsel %vm5774_vm9, %v2951_v42, %v2958_v12  ;;  %v3230_v55 = vsel %vm5718_vm3, %v2960_v54, %v3229_v47  ;;  %v3467_v23 = vrot.slane %v3466_v35, 4  ;;  %v3481_v10 = vrot.slane %v3479_v45, 5 }
 0x1e7   : > { %3228 = vst.msk [vmem:[#allocation3 + $0x40] sm:$0xf] %vm312_vm0, %v2959_v29  ;;  %3231 = vst [vmem:[#allocation3 + $0x44] sm:$0x1] %v3230_v55  ;;  %v3443_v28 = vrot.slane %v3442_v50, 4  ;;  %v3457_v59 = vrot.slane %v3455_v27, 5 }
 0x1e8   : > { %4157 = vrot.lane.b32.xlu1 %v5329_v18, %s5657_s30  ;;  %4363 = vrot.lane.b32.xlu0 %v5329_v18, %s5662_s14  ;;  %v3482_v41 = vsel %vm5842_vm14, %v3477_v58, %v3481_v10  ;;  %v3472_v31 = vsel %vm5842_vm14, %v3467_v23, %v7259_v19  ;;  %v2721_v23 = vsel %vm5718_vm3, 0, %v2720_v3  ;;  %v2717_v3 = vld [vmem:[#allocation3 + $0xb4] sm:$0x1] }
 0x1e9   : > { %v3458_v36 = vsel %vm5842_vm14, %v3453_v11, %v3457_v59  ;;  %v5314_v2 = vcombine.low %v3472_v31, %v3482_v41  ;;  %v3448_v51 = vsel %vm5842_vm14, %v3443_v28, %v7261_v7  ;;  %2722 = vst [vmem:[#allocation3 + $0xc0] sm:$0x1] %v2721_v23 }
 0x1ea   : > { %v7331_v4 = vcombine.low %v3448_v51, %v3458_v36 }
 0x1eb   : > { %v7304_v14 = vld [vmem:[#allocation3 + $0x48] sm:$0xf] }
 0x1ec   : > { %4260 = vrot.lane.b32.xlu0 %v5329_v18, %s5661_s11  ;;  %v7323_v16 = vld [vmem:[#allocation3 + $0x3c] sm:$0xf]  ;;  %v3508_v15 = vshrl.u32 %v7304_v14, 16  ;;  %v3511_v39 = vshll.u32 %v7304_v14, 16  ;;  %v5282_v24 = vrot.slane %v7304_v14, 9 }
 0x1ed   : > { %v7306_v37 = vld [vmem:[#allocation3 + $0x4c] sm:$0xf]  ;;  %v7333_v30 = vld [vmem:[#allocation3 + $0x50] sm:$0x1]  ;;  %v3484_v60 = vshrl.u32 %v7323_v16, 16  ;;  %v3487_v47 = vshll.u32 %v7323_v16, 16 }
 0x1ee   : > { %v7310_v25 = vcombine.low %v7304_v14, %v7306_v37  ;;  %v7325_v21 = vld [vmem:[#allocation3 + $0x40] sm:$0xf]  ;;  %v3839_v53 = vrot.slane %v7306_v37, 5  ;;  %v3521_v7 = vshrl.u32 %v7306_v37, 16  ;;  %v7344_v42 = vld [vmem:[#allocation3 + $0x44] sm:$0x1] }
 0x1ef   : > { %v3832_v17 = vrot.slane %v7325_v21, 5  ;;  %v7350_v9 = vcombine.low %v7323_v16, %v7325_v21  ;;  %v3842_v26 = vrot.slane %v7333_v30, 5  ;;  %v3497_v29 = vshrl.u32 %v7325_v21, 16 }
 0x1f0   : > { %8567 = vst [vmem:[#allocation4_spill] sm:$0xff] %v7310_v25  ;;  %4196 = vrot.lane.b32.xlu1 %v7310_v25, %s5658_s8  ;;  %4299 = vrot.lane.b32.xlu0 %v7310_v25, %s5659_s9  ;;  %v3841_v62 = vrot.slane %v3839_v53, 4  ;;  %v5281_v55 = vrot.slane %v7323_v16, 9  ;;  %v3840_v34 = vsel %vm5795_vm13, %v5282_v24, %v3839_v53  ;;  %v3835_v46 = vrot.slane %v7344_v42, 5 }
 0x1f1   : > { %v3517_v58 = vshll.u32 %v7306_v37, 16  ;;  %v3493_v14 = vshll.u32 %v7325_v21, 16  ;;  %v7383_v59 = vrot.slane %v3511_v39, 5  ;;  %v7385_v31 = vrot.slane %v3521_v7, 4  ;;  %v3246_v21 = vld [vmem:[#allocation3 + $0x60] sm:$0xf] }
 0x1f2   : > { %v7369_v35 = vsel %vm5795_vm13, %v5281_v55, %v3832_v17  ;;  %v3843_v27 = vsel %vm5795_vm13, %v3841_v62, %v3842_v26  ;;  %v3250_v62 = vld [vmem:[#allocation3 + $0x68] sm:$0x1] }
 0x1f3   : > { %v5332_v36 = vcombine.low %v3840_v34, %v3843_v27  ;;  %v3243_v27 = vld [vmem:[#allocation3 + $0x5c] sm:$0x1] }
 0x1f4   : > { %4227 = vrot.lane.b32.xlu1 %v5314_v2, %s5663_s17  ;;  %4330 = vrot.lane.b32.xlu0 %v5314_v2, %s5664_s18  ;;  %v5495_v19 = vpop.f32.mrb[12].mxu0 }
 0x1f5   : > { %v2576_v13 = vmul.f32 %v5495_v19, %v7032_v20  ;;  %v2476_v63 = vpop.f32.mrb[13].mxu0  ;;  %v7389_v19 = vrot.slane %v3497_v29, 4  ;;  %v5604_v29 = vld [vmem:[%s8540_s4 + $0x10] ss:$0 sps:$4 sm:$0x33]  }
 0x1f6   : > { %v2574_v12 = vmul.f32 %v7032_v20, %v2476_v63  ;;  %v5496_v54 = vpop.f32.mrb[14].mxu0  ;;  %5552 = vmatprep.subr.msk.bf16.mxu1 %vm8568_vm15, %v5604_v29  ;;  %vm8579_vm15 = vcmask 293888  }
 0x1f7   : > { %v2615_v18 = vadd.f32 %v7038_v44, %v2576_v13  ;;  %v2577_v32 = vmul.f32 %v5496_v54, %v7032_v20  ;;  %v2479_v49 = vpop.f32.mrb[15].mxu0  ;;  %v3239_v13 = vld [vmem:[#allocation3 + $0x54] sm:$0xf] }
 0x1f8   : > { %v2613_v5 = vadd.f32 %v7038_v44, %v2574_v12  ;;  %v2575_v6 = vmul.f32 %v7032_v20, %v2479_v49  ;;  %4297 = vrot.lane.b32.xlu1 %v7350_v9, %s5659_s9  ;;  %4194 = vrot.lane.b32.xlu0 %v7350_v9, %s5658_s8  ;;  %v7371_v20 = vrot.slane %v3508_v15, 4  ;;  %v7387_v15 = vrot.slane %v3517_v58, 5 }
 0x1f9   : > { %v2647_v40 = vmax.f32 %v2615_v18, 0.0  ;;  %v2616_v48 = vadd.f32 %v7038_v44, %v2577_v32  ;;  %v4718_v58 = vsel %vm8569_vm12, %v5604_v29, 0 }
 0x1fa   : > { %v2645_v45 = vmax.f32 %v2613_v5, 0.0  ;;  %v2614_v50 = vadd.f32 %v7038_v44, %v2575_v6  ;;  %v3834_v44 = vrot.slane %v3832_v17, 4  ;;  %v7391_v17 = vrot.slane %v3493_v14, 5  ;;  %5518 = vmatpush3.bf16.msra.mxu1 %v4718_v58  ;;  %v7495_v58 = vld [vmem:[%s8539_s3] ss:$0 sm:$0xff] }
 0x1fb   : > { %v5419_v11 = vpack.c.bf16 %v2647_v40, %v2647_v40  ;;  %v2648_v33 = vmax.f32 %v2616_v48, 0.0  ;;  %v2774_v40 = vld [vmem:[#allocation3 + $0xc8] sm:$0x1] }
 0x1fc   : > { %v5417_v10 = vpack.c.bf16 %v2645_v45, %v2645_v45  ;;  %v2646_v28 = vmax.f32 %v2614_v50, 0.0  ;;  %4079 = vrot.lane.b32.xlu1 %v5314_v2, %s5660_s10  ;;  %4225 = vrot.lane.b32.xlu0 %v7331_v4, %s5663_s17  ;;  %v3836_v34 = vsel %vm5795_vm13, %v3834_v44, %v3835_v46  ;;  %v2718_v46 = vsel %vm5718_vm3, 0, %v2717_v3 }
 0x1fd   : > { %v2996_v41 = vshrl.u32 %v5419_v11, 16  ;;  %v5420_v37 = vpack.c.bf16 %v2648_v33, %v2648_v33  ;;  %v2999_v24 = vshll.u32 %v5419_v11, 16  ;;  %v2771_v11 = vld [vmem:[#allocation3 + $0xbc] sm:$0x1]  ;;  %2719 = vst [vmem:[#allocation3 + $0xb4] sm:$0x1] %v2718_v46 }
 0x1fe   : > { %v2979_v51 = vshrl.u32 %v5417_v10, 16  ;;  %v5418_v53 = vpack.c.bf16 %v2646_v28, %v2646_v28  ;;  %v2982_v12 = vshll.u32 %v5417_v10, 16  ;;  %v2775_v44 = vsel %vm5741_vm5, 0, %v2774_v40 }
 0x1ff   : > { %v2998_v2 = vrot.slane %v2996_v41, 7  ;;  %v3004_v63 = vshrl.u32 %v5420_v37, 16  ;;  %v3007_v54 = vshll.u32 %v5420_v37, 16  ;;  %2776 = vst [vmem:[#allocation3 + $0xc8] sm:$0x1] %v2775_v44 }
 0x200   : > { %v2981_v39 = vrot.slane %v2979_v51, 7  ;;  %v2987_v26 = vshrl.u32 %v5418_v53, 16  ;;  %4328 = vrot.lane.b32.xlu1 %v7331_v4, %s5664_s18  ;;  %4369 = vrot.lane.b32.xlu0 %v5332_v36, %s5662_s14  ;;  %v2990_v49 = vshll.u32 %v5418_v53, 16  ;;  %v3524_v51 = vor.u32 %v7385_v31, %v7387_v15 }
 0x201   : > { %v3001_v7 = vor.u32 %v2999_v24, %v2998_v2  ;;  %v3002_v18 = vrot.slane %v2998_v2, 4  ;;  %v3006_v32 = vrot.slane %v3004_v63, 7  ;;  %v3486_v53 = vrot.slane %v3484_v60, 4 }
 0x202   : > { %v2984_v55 = vor.u32 %v2982_v12, %v2981_v39  ;;  %v2985_v5 = vrot.slane %v2981_v39, 4  ;;  %v2989_v6 = vrot.slane %v2987_v26, 7  ;;  %v3489_v2 = vrot.slane %v3487_v47, 5 }
 0x203   : > { %v3247_v48 = vsel %vm5782_vm10, %v3001_v7, %v3246_v21  ;;  %v3009_v45 = vor.u32 %v3007_v54, %v3006_v32  ;;  %v3011_v50 = vrot.slane %v3006_v32, 4  ;;  %v5331_v21 = vcombine.low %v7369_v35, %v3836_v34 }
 0x204   : > { %3248 = vst [vmem:[#allocation3 + $0x60] sm:$0xf] %v3247_v48  ;;  %v3240_v33 = vsel %vm5782_vm10, %v2984_v55, %v3239_v13  ;;  %v2992_v14 = vor.u32 %v2990_v49, %v2989_v6  ;;  %v2994_v23 = vrot.slane %v2989_v6, 4  ;;  %4077 = vrot.lane.b32.xlu1 %v7331_v4, %s5660_s10  ;;  %4163 = vrot.lane.b32.xlu0 %v5332_v36, %s5657_s30  ;;  %v2772_v4 = vsel %vm5741_vm5, 0, %v2771_v11 }
 0x205   : > { %3241 = vst [vmem:[#allocation3 + $0x54] sm:$0xf] %v3240_v33  ;;  %v3010_v10 = vsel %vm5774_vm9, %v3002_v18, %v3009_v45  ;;  %v3251_v28 = vsel %vm5718_vm3, %v3011_v50, %v3250_v62  ;;  %2773 = vst [vmem:[#allocation3 + $0xbc] sm:$0x1] %v2772_v4  ;;  %v3527_v35 = vshll.u32 %v7333_v30, 16  ;;  %v3514_v24 = vor.u32 %v7383_v59, %v7371_v20 }
 0x206   : > { %3249 = vst.msk [vmem:[#allocation3 + $0x64] sm:$0xf] %vm312_vm0, %v3010_v10  ;;  %3252 = vst [vmem:[#allocation3 + $0x68] sm:$0x1] %v3251_v28  ;;  %v2993_v41 = vsel %vm5774_vm9, %v2985_v5, %v2992_v14  ;;  %v3244_v37 = vsel %vm5718_vm3, %v2994_v23, %v3243_v27  ;;  %v3500_v13 = vor.u32 %v7389_v19, %v7391_v17  ;;  %v3525_v63 = vrot.slane %v3524_v51, 4 }
 0x207   : > { %3242 = vst.msk [vmem:[#allocation3 + $0x58] sm:$0xf] %vm312_vm0, %v2993_v41  ;;  %3245 = vst [vmem:[#allocation3 + $0x5c] sm:$0x1] %v3244_v37  ;;  %v3490_v31 = vor.u32 %v3489_v2, %v3486_v53  ;;  %v3503_v39 = vshll.u32 %v7344_v42, 16  ;;  %v3529_v16 = vrot.slane %v3527_v35, 5 }
 0x208   : > { %4266 = vrot.lane.b32.xlu1 %v5332_v36, %s5661_s11  ;;  %4367 = vrot.lane.b32.xlu0 %v5331_v21, %s5662_s14  ;;  %v3515_v30 = vrot.slane %v3514_v24, 4  ;;  %v3501_v36 = vrot.slane %v3500_v13, 4  ;;  %v7479_v5 = vld [vmem:[%s8538_s2] ss:$0 sm:$0xff]  ;;  %v7514_v24 = vpop.permute.xlu0 %4071 }
 0x209   : > { %v3530_v59 = vsel %vm5842_vm14, %v3525_v63, %v3529_v16  ;;  %v3491_v19 = vrot.slane %v3490_v31, 4  ;;  %v3505_v42 = vrot.slane %v3503_v39, 5 }
 0x20a   : > { %v3520_v12 = vsel %vm5842_vm14, %v3515_v30, %v7387_v15 }
 0x20b   : > { %v7443_v60 = vld [vmem:[#allocation3 + $0x60] sm:$0xf]  ;;  %v3506_v54 = vsel %vm5842_vm14, %v3501_v36, %v3505_v42  ;;  %v5316_v62 = vcombine.low %v3520_v12, %v3530_v59  ;;  %v3496_v18 = vsel %vm5842_vm14, %v3491_v19, %v7391_v17 }
 0x20c   : > { %4161 = vrot.lane.b32.xlu1 %v5331_v21, %s5657_s30  ;;  %4264 = vrot.lane.b32.xlu0 %v5331_v21, %s5661_s11  ;;  %v7462_v26 = vld [vmem:[#allocation3 + $0x54] sm:$0xf]  ;;  %v7472_v15 = vcombine.low %v3496_v18, %v3506_v54  ;;  %v3556_v29 = vshrl.u32 %v7443_v60, 16  ;;  %v3559_v55 = vshll.u32 %v7443_v60, 16  ;;  %v5284_v3 = vrot.slane %v7443_v60, 9 }
 0x20d   : > { %v7445_v47 = vld [vmem:[#allocation3 + $0x64] sm:$0xf]  ;;  %v7482_v34 = vld [vmem:[#allocation3 + $0x68] sm:$0x1]  ;;  %v3532_v45 = vshrl.u32 %v7462_v26, 16  ;;  %v3535_v50 = vshll.u32 %v7462_v26, 16 }
 0x20e   : > { %v7449_v20 = vcombine.low %v7443_v60, %v7445_v47  ;;  %v7464_v7 = vld [vmem:[#allocation3 + $0x58] sm:$0xf]  ;;  %v3853_v32 = vrot.slane %v7445_v47, 5  ;;  %v7499_v46 = vld [vmem:[#allocation3 + $0x5c] sm:$0x1]  ;;  %v3569_v28 = vshrl.u32 %v7445_v47, 16 }
 0x20f   : > { %v7490_v27 = vcombine.low %v7462_v26, %v7464_v7  ;;  %v3846_v10 = vrot.slane %v7464_v7, 5  ;;  %v3856_v41 = vrot.slane %v7482_v34, 5  ;;  %v3545_v51 = vshrl.u32 %v7464_v7, 16 }
 0x210   : > { %8570 = vst [vmem:[#allocation5_spill] sm:$0xff] %v7449_v20  ;;  %4200 = vrot.lane.b32.xlu1 %v7449_v20, %s5658_s8  ;;  %4303 = vrot.lane.b32.xlu0 %v7449_v20, %s5659_s9  ;;  %v3855_v23 = vrot.slane %v3853_v32, 4  ;;  %v5283_v53 = vrot.slane %v7462_v26, 9  ;;  %v3854_v13 = vsel %vm5795_vm13, %v5284_v3, %v3853_v32  ;;  %v3849_v63 = vrot.slane %v7499_v46, 5 }
 0x211   : > { %8571 = vst [vmem:[#allocation6_spill] sm:$0xff] %v7490_v27  ;;  %v3848_v30 = vrot.slane %v3846_v10, 4  ;;  %v7524_v19 = vrot.slane %v3556_v29, 4  ;;  %v3565_v42 = vshll.u32 %v7445_v47, 16  ;;  %v3571_v32 = vrot.slane %v3569_v28, 4 }
 0x212   : > { %v3857_v16 = vsel %vm5795_vm13, %v3855_v23, %v3856_v41  ;;  %v3847_v18 = vsel %vm5795_vm13, %v5283_v53, %v3846_v10  ;;  %v3541_v3 = vshll.u32 %v7464_v7, 16  ;;  %v7535_v23 = vpop.permute.xlu0 %4151  ;;  %v3253_v28 = vld [vmem:[#allocation3 + $0x6c] sm:$0xf]  ;;  %v3547_v41 = vrot.slane %v3545_v51, 4 }
 0x213   : > { %v3850_v29 = vsel %vm5795_vm13, %v3848_v30, %v3849_v63  ;;  %v7537_v10 = vrot.slane %v3565_v42, 5 }
 0x214   : > { %4231 = vrot.lane.b32.xlu1 %v5316_v62, %s5663_s17  ;;  %4334 = vrot.lane.b32.xlu0 %v5316_v62, %s5664_s18  ;;  %v5499_v49 = vpop.f32.mrb[16].mxu0 }
 0x215   : > { %v2580_v17 = vmul.f32 %v7479_v5, %v5499_v49  ;;  %v2492_v6 = vpop.f32.mrb[17].mxu0  ;;  %v3572_v60 = vor.u32 %v3571_v32, %v7537_v10 }
 0x216   : > { %v2578_v40 = vmul.f32 %v7479_v5, %v2492_v6  ;;  %v5500_v48 = vpop.f32.mrb[18].mxu0  ;;  %v5334_v6 = vcombine.low %v3854_v13, %v3857_v16  ;;  %v3257_v16 = vld [vmem:[#allocation3 + $0x74] sm:$0x1] }
 0x217   : > { %v2619_v11 = vadd.f32 %v7495_v58, %v2580_v17  ;;  %v2581_v33 = vmul.f32 %v7479_v5, %v5500_v48  ;;  %v2495_v14 = vpop.f32.mrb[19].mxu0  ;;  %v3573_v26 = vrot.slane %v3572_v60, 4  ;;  %v8594_v0 = vld [vmem:[#allocation5_spill] sm:$0xff] }
 0x218   : > { %v2617_v44 = vadd.f32 %v7495_v58, %v2578_v40  ;;  %v2579_v4 = vmul.f32 %v7479_v5, %v2495_v14  ;;  %4301 = vrot.lane.b32.xlu1 %v7490_v27, %s5659_s9  ;;  %4198 = vrot.lane.b32.xlu0 %v7490_v27, %s5658_s8 }
 0x219   : > { %v2651_v37 = vmax.f32 %v2619_v11, 0.0  ;;  %v2620_v21 = vadd.f32 %v7495_v58, %v2581_v33  ;;  %v3260_v11 = vld [vmem:[#allocation3 + $0x78] sm:$0xf] }
 0x21a   : > { %v2649_v2 = vmax.f32 %v2617_v44, 0.0  ;;  %v2618_v35 = vadd.f32 %v7495_v58, %v2579_v4 }
 0x21b   : > { %v5423_v31 = vpack.c.bf16 %v2651_v37, %v2651_v37  ;;  %v2652_v39 = vmax.f32 %v2620_v21, 0.0  ;;  %v3264_v21 = vld [vmem:[#allocation3 + $0x80] sm:$0x1] }
 0x21c   : > { %v5421_v36 = vpack.c.bf16 %v2649_v2, %v2649_v2  ;;  %v2650_v59 = vmax.f32 %v2618_v35, 0.0  ;;  %4083 = vrot.lane.b32.xlu1 %v5316_v62, %s5660_s10  ;;  %4229 = vrot.lane.b32.xlu0 %v7472_v15, %s5663_s17  ;;  %v7539_v35 = vrot.slane %v3541_v3, 5 }
 0x21d   : > { %v3030_v12 = vshrl.u32 %v5423_v31, 16  ;;  %v5424_v54 = vpack.c.bf16 %v2652_v39, %v2652_v39  ;;  %v3033_v62 = vshll.u32 %v5423_v31, 16 }
 0x21e   : > { %v3013_v49 = vshrl.u32 %v5421_v36, 16  ;;  %v5422_v17 = vpack.c.bf16 %v2650_v59, %v2650_v59  ;;  %v3016_v47 = vshll.u32 %v5421_v36, 16 }
 0x21f   : > { %v3032_v40 = vrot.slane %v3030_v12, 7  ;;  %v3038_v48 = vshrl.u32 %v5424_v54, 16  ;;  %v3041_v4 = vshll.u32 %v5424_v54, 16  ;;  %v3561_v54 = vrot.slane %v3559_v55, 5 }
 0x220   : > { %v3015_v33 = vrot.slane %v3013_v49, 7  ;;  %v3021_v14 = vshrl.u32 %v5422_v17, 16  ;;  %4332 = vrot.lane.b32.xlu1 %v7472_v15, %s5664_s18  ;;  %4373 = vrot.lane.b32.xlu0 %v5334_v6, %s5662_s14  ;;  %v3024_v2 = vshll.u32 %v5422_v17, 16  ;;  %v3534_v49 = vrot.slane %v3532_v45, 4 }
 0x221   : > { %v3035_v7 = vor.u32 %v3033_v62, %v3032_v40  ;;  %v3040_v44 = vrot.slane %v3038_v48, 7  ;;  %v3036_v13 = vrot.slane %v3032_v40, 4  ;;  %v5333_v40 = vcombine.low %v3847_v18, %v3850_v29 }
 0x222   : > { %v3018_v37 = vor.u32 %v3016_v47, %v3015_v33  ;;  %v3023_v53 = vrot.slane %v3021_v14, 7  ;;  %v3019_v30 = vrot.slane %v3015_v33, 4  ;;  %v3537_v62 = vrot.slane %v3535_v50, 5 }
 0x223   : > { %v3261_v63 = vsel %vm5782_vm10, %v3035_v7, %v3260_v11  ;;  %v3043_v31 = vor.u32 %v3041_v4, %v3040_v44  ;;  %v3045_v39 = vrot.slane %v3040_v44, 4  ;;  %v3548_v55 = vor.u32 %v3547_v41, %v7539_v35 }
 0x224   : > { %3262 = vst [vmem:[#allocation3 + $0x78] sm:$0xf] %v3261_v63  ;;  %v3254_v36 = vsel %vm5782_vm10, %v3018_v37, %v3253_v28  ;;  %v3026_v59 = vor.u32 %v3024_v2, %v3023_v53  ;;  %v3028_v51 = vrot.slane %v3023_v53, 4  ;;  %4081 = vrot.lane.b32.xlu1 %v7472_v15, %s5660_s10  ;;  %4167 = vrot.lane.b32.xlu0 %v5334_v6, %s5657_s30  ;;  %v7561_v3 = vpop.permute.xlu0 %4291  ;;  %v3575_v48 = vshll.u32 %v7482_v34, 16  ;;  %v7598_v4 = vpop.permute.xlu1 %4188  ;;  %v7610_v63 = vld [vmem:[#allocation3 + $0x4] sm:$0xf] }
 0x225   : > { %3255 = vst [vmem:[#allocation3 + $0x6c] sm:$0xf] %v3254_v36  ;;  %v3044_v42 = vsel %vm5774_vm9, %v3036_v13, %v3043_v31  ;;  %v3265_v12 = vsel %vm5718_vm3, %v3045_v39, %v3264_v21  ;;  %v3562_v45 = vor.u32 %v3561_v54, %v7524_v19  ;;  %v3538_v11 = vor.u32 %v3537_v62, %v3534_v49  ;;  %v7608_v13 = vld [vmem:[#allocation3] sm:$0xf] }
 0x226   : > { %3263 = vst.msk [vmem:[#allocation3 + $0x7c] sm:$0xf] %vm312_vm0, %v3044_v42  ;;  %3266 = vst [vmem:[#allocation3 + $0x80] sm:$0x1] %v3265_v12  ;;  %v3027_v15 = vsel %vm5774_vm9, %v3019_v30, %v3026_v59  ;;  %v3258_v17 = vsel %vm5718_vm3, %v3028_v51, %v3257_v16  ;;  %v3551_v18 = vshll.u32 %v7499_v46, 16  ;;  %v3549_v32 = vrot.slane %v3548_v55, 4 }
 0x227   : > { %3256 = vst.msk [vmem:[#allocation3 + $0x70] sm:$0xf] %vm312_vm0, %v3027_v15  ;;  %3259 = vst [vmem:[#allocation3 + $0x74] sm:$0x1] %v3258_v17  ;;  %v3563_v33 = vrot.slane %v3562_v45, 4  ;;  %v3577_v47 = vrot.slane %v3575_v48, 5 }
 0x228   : > { %4270 = vrot.lane.b32.xlu1 %v5334_v6, %s5661_s11  ;;  %4371 = vrot.lane.b32.xlu0 %v5333_v40, %s5662_s14  ;;  %v7573_v50 = vpop.permute.xlu0 %4186  ;;  %v3539_v19 = vrot.slane %v3538_v11, 4  ;;  %v3553_v46 = vrot.slane %v3551_v18, 5 }
 0x229   : > { %v3578_v14 = vsel %vm5842_vm14, %v3573_v26, %v3577_v47  ;;  %v3568_v28 = vsel %vm5842_vm14, %v3563_v33, %v7537_v10 }
 0x22a   : > { %v3554_v7 = vsel %vm5842_vm14, %v3549_v32, %v3553_v46  ;;  %v5318_v37 = vcombine.low %v3568_v28, %v3578_v14  ;;  %v3544_v53 = vsel %vm5842_vm14, %v3539_v19, %v7539_v35  ;;  %v7640_v32 = vpop.permute.xlu1 %4258 }
 0x22b   : > { %v7577_v6 = vld [vmem:[#allocation3 + $0x78] sm:$0xf]  ;;  %v7614_v31 = vcombine.low %v3544_v53, %v3554_v7 }
 0x22c   : > { %4165 = vrot.lane.b32.xlu1 %v5333_v40, %s5657_s30  ;;  %4268 = vrot.lane.b32.xlu0 %v5333_v40, %s5661_s11  ;;  %v7596_v44 = vld [vmem:[#allocation3 + $0x6c] sm:$0xf]  ;;  %v7600_v41 = vpop.permute.xlu0 %4361  ;;  %v3604_v16 = vshrl.u32 %v7577_v6, 16  ;;  %v3607_v30 = vshll.u32 %v7577_v6, 16  ;;  %v5286_v59 = vrot.slane %v7577_v6, 9 }
 0x22d   : > { %v7579_v29 = vld [vmem:[#allocation3 + $0x7c] sm:$0xf]  ;;  %v7616_v39 = vld [vmem:[#allocation3 + $0x80] sm:$0x1]  ;;  %v3580_v36 = vshrl.u32 %v7596_v44, 16  ;;  %v3583_v54 = vshll.u32 %v7596_v44, 16 }
 0x22e   : > { %v7583_v34 = vcombine.low %v7577_v6, %v7579_v29  ;;  %v7602_v21 = vld [vmem:[#allocation3 + $0x70] sm:$0xf]  ;;  %v3867_v2 = vrot.slane %v7579_v29, 5  ;;  %v3617_v51 = vshrl.u32 %v7579_v29, 16  ;;  %v7627_v49 = vld [vmem:[#allocation3 + $0x74] sm:$0x1] }
 0x22f   : > { %v8547_v15 = vrot.slane %v7602_v21, 5  ;;  %v7633_v62 = vcombine.low %v7596_v44, %v7602_v21  ;;  %v3870_v55 = vrot.slane %v7616_v39, 5  ;;  %v3593_v18 = vshrl.u32 %v7602_v21, 16 }
 0x230   : > { %8572 = vst [vmem:[#allocation7_spill] sm:$0xff] %v7583_v34  ;;  %4204 = vrot.lane.b32.xlu1 %v7583_v34, %s5658_s8  ;;  %4307 = vrot.lane.b32.xlu0 %v7583_v34, %s5659_s9  ;;  %v3869_v60 = vrot.slane %v3867_v2, 4  ;;  %v7642_v6 = vpop.permute.xlu0 %4155  ;;  %v3868_v19 = vsel %vm5795_vm13, %v5286_v59, %v3867_v2  ;;  %v3863_v46 = vrot.slane %v7627_v49, 5  ;;  %v7656_v53 = vrot.slane %v3604_v16, 4 }
 0x231   : > { %8573 = vst [vmem:[#allocation8_spill] sm:$0xff] %v7633_v62  ;;  %v3862_v28 = vrot.slane %v8547_v15, 4  ;;  %v7662_v59 = vrot.slane %v3607_v30, 5  ;;  %v7669_v16 = vrot.slane %v3580_v36, 4  ;;  %v3589_v36 = vshll.u32 %v7602_v21, 16 }
 0x233   : > { %v3864_v30 = vsel %vm5795_vm13, %v3862_v28, %v3863_v46  ;;  %v7696_v27 = vrot.slane %v3589_v36, 5 }
 0x234   : > { %4235 = vrot.lane.b32.xlu1 %v5318_v37, %s5663_s17  ;;  %4338 = vrot.lane.b32.xlu0 %v5318_v37, %s5664_s18  ;;  %v5503_v35 = vpop.f32.mrb[20].mxu0 }
 0x235   : > { %v2584_v42 = vmul.f32 %v7479_v5, %v5503_v35  ;;  %v2508_v12 = vpop.f32.mrb[21].mxu0 }
 0x236   : > { %v2582_v17 = vmul.f32 %v7479_v5, %v2508_v12  ;;  %v5504_v40 = vpop.f32.mrb[22].mxu0  ;;  %v3871_v12 = vsel %vm5795_vm13, %v3869_v60, %v3870_v55 }
 0x237   : > { %v2623_v45 = vadd.f32 %v7495_v58, %v2584_v42  ;;  %v2585_v48 = vmul.f32 %v7479_v5, %v5504_v40  ;;  %v2511_v11 = vpop.f32.mrb[23].mxu0 }
 0x238   : > { %v2621_v33 = vadd.f32 %v7495_v58, %v2582_v17  ;;  %v2583_v47 = vmul.f32 %v7479_v5, %v2511_v11  ;;  %4305 = vrot.lane.b32.xlu1 %v7633_v62, %s5659_s9  ;;  %4202 = vrot.lane.b32.xlu0 %v7633_v62, %s5658_s8  ;;  %v3613_v17 = vshll.u32 %v7579_v29, 16  ;;  %v3278_v62 = vld [vmem:[#allocation3 + $0x98] sm:$0x1] }
 0x239   : > { %v2655_v14 = vmax.f32 %v2623_v45, 0.0  ;;  %v2624_v7 = vadd.f32 %v7495_v58, %v2585_v48  ;;  %v7664_v45 = vrot.slane %v3617_v51, 4  ;;  %v2723_v48 = vld [vmem:[#allocation3 + $0xcc] sm:$0x1]  ;;  %v7677_v51 = vpop.permute.xlu1 %4153 }
 0x23a   : > { %v2653_v35 = vmax.f32 %v2621_v33, 0.0  ;;  %v2622_v42 = vadd.f32 %v7495_v58, %v2583_v47  ;;  %v2724_v60 = vsel %vm5718_vm3, 0, %v2723_v48  ;;  %v7673_v33 = vcombine.low %v3868_v19, %v3871_v12  ;;  %v7679_v47 = vpop.permute.xlu0 %4256  ;;  %v2777_v19 = vld [vmem:[#allocation3 + $0xd4] sm:$0x1]  ;;  %v3274_v12 = vld [vmem:[#allocation3 + $0x90] sm:$0xf] }
 0x23b   : > { %v5427_v40 = vpack.c.bf16 %v2655_v14, %v2655_v14  ;;  %v2656_v2 = vmax.f32 %v2624_v7, 0.0  ;;  %2725 = vst [vmem:[#allocation3 + $0xcc] sm:$0x1] %v2724_v60  ;;  %v7681_v7 = vrot.slane %v3613_v17, 5  ;;  %v3267_v60 = vld [vmem:[#allocation3 + $0x84] sm:$0xf] }
 0x23c   : > { %v5425_v11 = vpack.c.bf16 %v2653_v35, %v2653_v35  ;;  %v2654_v10 = vmax.f32 %v2622_v42, 0.0  ;;  %4087 = vrot.lane.b32.xlu1 %v5318_v37, %s5660_s10  ;;  %4233 = vrot.lane.b32.xlu0 %v7614_v31, %s5663_s17 }
 0x23d   : > { %v3064_v29 = vshrl.u32 %v5427_v40, 16  ;;  %v5428_v55 = vpack.c.bf16 %v2656_v2, %v2656_v2  ;;  %v3067_v42 = vshll.u32 %v5427_v40, 16  ;;  %v7684_v2 = vrot.slane %v3583_v54, 5 }
 0x23e   : > { %v3047_v37 = vshrl.u32 %v5425_v11, 16  ;;  %v5426_v14 = vpack.c.bf16 %v2654_v10, %v2654_v10  ;;  %v3050_v46 = vshll.u32 %v5425_v11, 16  ;;  %v2778_v10 = vsel %vm5741_vm5, 0, %v2777_v19 }
 0x23f   : > { %v3066_v35 = vrot.slane %v3064_v29, 7  ;;  %v3072_v48 = vshrl.u32 %v5428_v55, 16  ;;  %v3075_v29 = vshll.u32 %v5428_v55, 16  ;;  %v3595_v54 = vrot.slane %v3593_v18, 4  ;;  %2779 = vst [vmem:[#allocation3 + $0xd4] sm:$0x1] %v2778_v10 }
 0x240   : > { %v3049_v26 = vrot.slane %v3047_v37, 7  ;;  %v3055_v28 = vshrl.u32 %v5426_v14, 16  ;;  %4336 = vrot.lane.b32.xlu1 %v7614_v31, %s5664_s18  ;;  %4377 = vrot.lane.b32.xlu0 %v7673_v33, %s5662_s14  ;;  %v3058_v11 = vshll.u32 %v5426_v14, 16  ;;  %vm8578_vm5 = vcmask 261120  }
 0x241   : > { %v3069_v17 = vor.u32 %v3067_v42, %v3066_v35  ;;  %v3074_v40 = vrot.slane %v3072_v48, 7  ;;  %v3070_v25 = vrot.slane %v3066_v35, 4  ;;  %v3271_v48 = vld [vmem:[#allocation3 + $0x8c] sm:$0x1]  ;;  %vm8580_vm12 = vmmov %vm8578_vm5 }
 0x242   : > { %v3052_v15 = vor.u32 %v3050_v46, %v3049_v26  ;;  %v3057_v37 = vrot.slane %v3055_v28, 7  ;;  %v7692_v34 = vpop.permute.xlu1 %4192  ;;  %v7694_v20 = vpop.permute.xlu0 %4295  ;;  %v3053_v18 = vrot.slane %v3049_v26, 4  ;;  %v8574_v26 = vrot.slane %v7602_v21, 5 }
 0x243   : > { %v3275_v8 = vsel %vm5782_vm10, %v3069_v17, %v3274_v12  ;;  %v3077_v42 = vor.u32 %v3075_v29, %v3074_v40  ;;  %v3079_v19 = vrot.slane %v3074_v40, 4  ;;  %v8575_v12 = vrot.slane %v7596_v44, 9 }
 0x244   : > { %3276 = vst [vmem:[#allocation3 + $0x90] sm:$0xf] %v3275_v8  ;;  %v3268_v55 = vsel %vm5782_vm10, %v3052_v15, %v3267_v60  ;;  %v3060_v46 = vor.u32 %v3058_v11, %v3057_v37  ;;  %v3062_v14 = vrot.slane %v3057_v37, 4  ;;  %4085 = vrot.lane.b32.xlu1 %v7614_v31, %s5660_s10  ;;  %4171 = vrot.lane.b32.xlu0 %v7673_v33, %s5657_s30  ;;  %v3623_v17 = vshll.u32 %v7616_v39, 16 }
 0x245   : > { %3269 = vst [vmem:[#allocation3 + $0x84] sm:$0xf] %v3268_v55  ;;  %v3078_v36 = vsel %vm5774_vm9, %v3070_v25, %v3077_v42  ;;  %v3279_v35 = vsel %vm5718_vm3, %v3079_v19, %v3278_v62  ;;  %v3861_v15 = vsel %vm5795_vm13, %v8575_v12, %v8574_v26  ;;  %v3620_v31 = vor.u32 %v7664_v45, %v7681_v7 }
 0x246   : > { %3277 = vst.msk [vmem:[#allocation3 + $0x94] sm:$0xf] %vm312_vm0, %v3078_v36  ;;  %3280 = vst [vmem:[#allocation3 + $0x98] sm:$0x1] %v3279_v35  ;;  %v3061_v28 = vsel %vm5774_vm9, %v3053_v18, %v3060_v46  ;;  %v3272_v25 = vsel %vm5718_vm3, %v3062_v14, %v3271_v48  ;;  %v7723_v62 = vpop.permute.xlu1 %4223  ;;  %v4327_v21 = vpop.permute.xlu0 %4326  ;;  %v5335_v10 = vcombine.low %v3861_v15, %v3864_v30  ;;  %v3599_v29 = vshll.u32 %v7627_v49, 16 }
 0x247   : > { %v3596_v44 = vor.u32 %v3595_v54, %v7696_v27  ;;  %3270 = vst.msk [vmem:[#allocation3 + $0x88] sm:$0xf] %vm312_vm0, %v3061_v28  ;;  %3273 = vst [vmem:[#allocation3 + $0x8c] sm:$0x1] %v3272_v25  ;;  %v3610_v45 = vor.u32 %v7662_v59, %v7656_v53  ;;  %v8576_v60 = vcombine.low %v7608_v13, %v7610_v63  ;;  %v3621_v54 = vrot.slane %v3620_v31, 4 }
 0x248   : > { %4274 = vrot.lane.b32.xlu1 %v7673_v33, %s5661_s11  ;;  %4375 = vrot.lane.b32.xlu0 %v5335_v10, %s5662_s14  ;;  %v3586_v30 = vor.u32 %v7684_v2, %v7669_v16  ;;  %v3625_v63 = vrot.slane %v3623_v17, 5  ;;  %v3601_v16 = vrot.slane %v3599_v29, 5 }
 0x249   : > { %v4395_v40 = vsel %vm2057_vm1, %v8576_v60, %v7514_v24  ;;  %v3597_v59 = vrot.slane %v3596_v44, 4  ;;  %v3611_v24 = vrot.slane %v3610_v45, 4 }
 0x24a   : > { %v7741_v53 = vpop.permute.xlu1 %4293  ;;  %v7743_v39 = vpop.permute.xlu0 %4190  ;;  %v4442_v13 = vsel %vm2106_vm2, %v4395_v40, %v7535_v23  ;;  %v3587_v37 = vrot.slane %v3586_v30, 4  ;;  %v3626_v49 = vsel %vm5842_vm14, %v3621_v54, %v3625_v63 }
 0x24b   : > { %v3345_v33 = vld [vmem:[#allocation3 + $0x90] sm:$0xf]  ;;  %v4474_v11 = vsel %vm2139_vm4, %v4442_v13, %v7573_v50  ;;  %v3602_v48 = vsel %vm5842_vm14, %v3597_v59, %v3601_v16  ;;  %v3616_v50 = vsel %vm5842_vm14, %v3611_v24, %v7681_v7 }
 0x24c   : > { %4169 = vrot.lane.b32.xlu1 %v5335_v10, %s5657_s30  ;;  %4272 = vrot.lane.b32.xlu0 %v5335_v10, %s5661_s11  ;;  %v3652_v46 = vshrl.u32 %v3345_v33, 16  ;;  %v3655_v14 = vshll.u32 %v3345_v33, 16  ;;  %v7769_v36 = vld [vmem:[#allocation3 + $0x84] sm:$0xf]  ;;  %v7777_v26 = vcombine.low %v3616_v50, %v3626_v49  ;;  %v3592_v12 = vsel %vm5842_vm14, %v3587_v37, %v7696_v27 }
 0x24d   : > { %v7749_v2 = vld [vmem:[#allocation3 + $0x94] sm:$0xf]  ;;  %v7784_v15 = vcombine.low %v3592_v12, %v3602_v48  ;;  %v7786_v31 = vld [vmem:[#allocation3 + $0x98] sm:$0x1]  ;;  %v3628_v45 = vshrl.u32 %v7769_v36, 16  ;;  %v3631_v17 = vshll.u32 %v7769_v36, 16 }
 0x24e   : > { %v7755_v8 = vpop.permute.xlu1 %4075  ;;  %v4222_v23 = vpop.permute.xlu0 %4221  ;;  %v7758_v42 = vcombine.low %v3345_v33, %v7749_v2  ;;  %v7760_v19 = vld [vmem:[#allocation3 + $0x88] sm:$0xf]  ;;  %v3881_v18 = vrot.slane %v7749_v2, 5  ;;  %v3665_v60 = vshrl.u32 %v7749_v2, 16  ;;  %v7797_v40 = vld [vmem:[#allocation3 + $0x8c] sm:$0x1] }
 0x24f   : > { %v4506_v55 = vsel %vm2172_vm6, %v4474_v11, %v4222_v23  ;;  %v3874_v28 = vrot.slane %v7760_v19, 5  ;;  %v3654_v30 = vrot.slane %v3652_v46, 4  ;;  %v3657_v29 = vrot.slane %v3655_v14, 5 }
 0x250   : > { %8577 = vst [vmem:[#allocation9_spill] sm:$0xff] %v7758_v42  ;;  %v4538_v35 = vsel %vm2205_vm7, %v4506_v55, %v7679_v47  ;;  %4208 = vrot.lane.b32.xlu1 %v7758_v42, %s5658_s8  ;;  %4311 = vrot.lane.b32.xlu0 %v7758_v42, %s5659_s9  ;;  %v5288_v47 = vrot.slane %v3345_v33, 9  ;;  %v3883_v27 = vrot.slane %v3881_v18, 4  ;;  %v7807_v59 = vcombine.low %v7769_v36, %v7760_v19 }
 0x251   : > { %v4570_v7 = vsel %vm2238_vm8, %v4538_v35, %v7561_v3  ;;  %v3884_v13 = vrot.slane %v7786_v31, 5  ;;  %v3876_v33 = vrot.slane %v3874_v28, 4  ;;  %v3661_v37 = vshll.u32 %v7749_v2, 16 }
 0x252   : > { %v4074_v25 = vpop.permute.xlu1 %4073  ;;  %v7789_v10 = vpop.permute.xlu0 %4365  ;;  %v4602_v44 = vsel %vm2271_vm11, %v4570_v7, %v4327_v21  ;;  %v3882_v63 = vsel %vm5795_vm13, %v5288_v47, %v3881_v18  ;;  %v5287_v23 = vrot.slane %v7769_v36, 9  ;;  %v3877_v48 = vrot.slane %v7797_v40, 5 }
 0x253   : > { %v4634_v3 = vsel %vm8578_vm5, %v4602_v44, %v7600_v41  ;;  %v4398_v54 = vsel %vm2057_vm1, %v7104_v52, %v4074_v25  ;;  %v3641_v41 = vshrl.u32 %v7760_v19, 16  ;;  %v3885_v11 = vsel %vm5795_vm13, %v3883_v27, %v3884_v13  ;;  %vm8581_vm5 = vmmov %vm8579_vm15 }
 0x254   : > { %4239 = vrot.lane.b32.xlu1 %v7777_v26, %s5663_s17  ;;  %4342 = vrot.lane.b32.xlu0 %v7777_v26, %s5664_s18  ;;  %v5507_v21 = vpop.f32.mrb[24].mxu0  ;;  %v4444_v55 = vsel %vm2106_vm2, %v4398_v54, %v7677_v51  ;;  %v3658_v50 = vor.u32 %v3657_v29, %v3654_v30  ;;  %v3667_v51 = vrot.slane %v3665_v60, 4  ;;  %v3671_v47 = vshll.u32 %v7786_v31, 16 }
 0x255   : > { %v2588_v24 = vmul.f32 %v7479_v5, %v5507_v21  ;;  %5519 = vmatprep.mubr.msk.bf16.mxu1 %vm8579_vm15, %v4634_v3  ;;  %v2524_v52 = vpop.f32.mrb[25].mxu0  ;;  %v3878_v27 = vsel %vm5795_vm13, %v3876_v33, %v3877_v48  ;;  %v7839_v3 = vrot.slane %v3661_v37, 5  ;;  %v7842_v54 = vcombine.low %v3882_v63, %v3885_v11  ;;  %vm8582_vm15 = vmmov %vm8580_vm12 }
 0x256   : > { %v2586_v16 = vmul.f32 %v7479_v5, %v2524_v52  ;;  %v5508_v49 = vpop.f32.mrb[26].mxu0  ;;  %v7825_v14 = vpop.permute.xlu0 %4159  ;;  %v3637_v21 = vshll.u32 %v7760_v19, 16  ;;  %v7847_v60 = vsel %vm2139_vm4, %v4444_v55, %v7598_v4  ;;  %v3875_v52 = vsel %vm5795_vm13, %v5287_v23, %v3874_v28 }
 0x257   : > { %v2627_v46 = vadd.f32 %v7495_v58, %v2588_v24  ;;  %v2589_v18 = vmul.f32 %v7479_v5, %v5508_v49  ;;  %v2527_v2 = vpop.f32.mrb[27].mxu0  ;;  %v7828_v12 = vpop.permute.xlu1 %4262  ;;  %v7857_v19 = vcombine.low %v3875_v52, %v3878_v27  ;;  %v7859_v63 = vrot.slane %v3658_v50, 4  ;;  %v3281_v27 = vld [vmem:[#allocation3 + $0x9c] sm:$0xf] }
 0x258   : > { %v2625_v35 = vadd.f32 %v7495_v58, %v2586_v16  ;;  %v2587_v7 = vmul.f32 %v7479_v5, %v2527_v2  ;;  %4309 = vrot.lane.b32.xlu1 %v7807_v59, %s5659_s9  ;;  %4206 = vrot.lane.b32.xlu0 %v7807_v59, %s5658_s8  ;;  %v3668_v49 = vor.u32 %v3667_v51, %v7839_v3  ;;  %v7862_v11 = vrot.slane %v3671_v47, 5 }
 0x259   : > { %v2659_v25 = vmax.f32 %v2627_v46, 0.0  ;;  %v2628_v44 = vadd.f32 %v7495_v58, %v2589_v18  ;;  %v7866_v55 = vrot.slane %v3637_v21, 5  ;;  %v3630_v50 = vrot.slane %v3628_v45, 4  ;;  %v3292_v45 = vld [vmem:[#allocation3 + $0xb0] sm:$0x1] }
 0x25a   : > { %v2657_v30 = vmax.f32 %v2625_v35, 0.0  ;;  %v2626_v29 = vadd.f32 %v7495_v58, %v2587_v7  ;;  %v7849_v24 = vpop.permute.xlu0 %4363  ;;  %v3288_v7 = vld [vmem:[#allocation3 + $0xa8] sm:$0xf]  ;;  %v3669_v21 = vrot.slane %v3668_v49, 4 }
 0x25b   : > { %v5431_v31 = vpack.c.bf16 %v2659_v25, %v2659_v25  ;;  %v2660_v13 = vmax.f32 %v2628_v44, 0.0  ;;  %v7864_v23 = vpop.permute.xlu1 %4157 }
 0x25c   : > { %v5429_v33 = vpack.c.bf16 %v2657_v30, %v2657_v30  ;;  %v2658_v37 = vmax.f32 %v2626_v29, 0.0  ;;  %4091 = vrot.lane.b32.xlu1 %v7777_v26, %s5660_s10  ;;  %4237 = vrot.lane.b32.xlu0 %v7784_v15, %s5663_s17  ;;  %v3643_v26 = vrot.slane %v3641_v41, 4  ;;  %v3633_v41 = vrot.slane %v3631_v17, 5  ;;  %v3285_v17 = vld [vmem:[#allocation3 + $0xa4] sm:$0x1] }
 0x25d   : > { %v3098_v4 = vshrl.u32 %v5431_v31, 16  ;;  %v5432_v16 = vpack.c.bf16 %v2660_v13, %v2660_v13  ;;  %v3101_v18 = vshll.u32 %v5431_v31, 16 }
 0x25e   : > { %v3081_v48 = vshrl.u32 %v5429_v33, 16  ;;  %v5430_v28 = vpack.c.bf16 %v2658_v37, %v2658_v37  ;;  %v7868_v35 = vpop.permute.xlu0 %4260  ;;  %v3084_v51 = vshll.u32 %v5429_v33, 16  ;;  %v3644_v37 = vor.u32 %v3643_v26, %v7866_v55 }
 0x25f   : > { %v3100_v46 = vrot.slane %v3098_v4, 7  ;;  %v3106_v2 = vshrl.u32 %v5432_v16, 16  ;;  %v3109_v29 = vshll.u32 %v5432_v16, 16 }
 0x260   : > { %v3083_v25 = vrot.slane %v3081_v48, 7  ;;  %v3089_v47 = vshrl.u32 %v5430_v28, 16  ;;  %4340 = vrot.lane.b32.xlu1 %v7784_v15, %s5664_s18  ;;  %4381 = vrot.lane.b32.xlu0 %v7842_v54, %s5662_s14  ;;  %v3092_v52 = vshll.u32 %v5430_v28, 16 }
 0x261   : > { %v3103_v44 = vor.u32 %v3101_v18, %v3100_v46  ;;  %v3108_v30 = vrot.slane %v3106_v2, 7  ;;  %v3104_v4 = vrot.slane %v3100_v46, 4 }
 0x262   : > { %v3086_v31 = vor.u32 %v3084_v51, %v3083_v25  ;;  %v3091_v13 = vrot.slane %v3089_v47, 7  ;;  %v7878_v33 = vpop.permute.xlu1 %4196  ;;  %v7883_v18 = vpop.permute.xlu0 %4299  ;;  %v3087_v16 = vrot.slane %v3083_v25, 4  ;;  %v3647_v25 = vshll.u32 %v7797_v40, 16 }
 0x263   : > { %v3289_v48 = vsel %vm5782_vm10, %v3103_v44, %v3288_v7  ;;  %v3111_v42 = vor.u32 %v3109_v29, %v3108_v30  ;;  %v3113_v36 = vrot.slane %v3108_v30, 4  ;;  %v3634_v7 = vor.u32 %v3633_v41, %v3630_v50 }
 0x264   : > { %3290 = vst [vmem:[#allocation3 + $0xa8] sm:$0xf] %v3289_v48  ;;  %v3282_v49 = vsel %vm5782_vm10, %v3086_v31, %v3281_v27  ;;  %v3094_v2 = vor.u32 %v3092_v52, %v3091_v13  ;;  %v3096_v28 = vrot.slane %v3091_v13, 4  ;;  %4089 = vrot.lane.b32.xlu1 %v7784_v15, %s5660_s10  ;;  %4379 = vrot.lane.b32.xlu0 %v7857_v19, %s5662_s14  ;;  %v3645_v40 = vrot.slane %v3644_v37, 4 }
 0x265   : > { %3283 = vst [vmem:[#allocation3 + $0x9c] sm:$0xf] %v3282_v49  ;;  %v3112_v26 = vsel %vm5774_vm9, %v3104_v4, %v3111_v42  ;;  %v3293_v46 = vsel %vm5718_vm3, %v3113_v36, %v3292_v45  ;;  %v3674_v50 = vsel %vm5842_vm14, %v3669_v21, %v7862_v11  ;;  %v4401_v41 = vsel %vm2057_vm1, %v7087_v61, %v7755_v8 }
 0x266   : > { %3291 = vst.msk [vmem:[#allocation3 + $0xac] sm:$0xf] %vm312_vm0, %v3112_v26  ;;  %3294 = vst [vmem:[#allocation3 + $0xb0] sm:$0x1] %v3293_v46  ;;  %v3095_v51 = vsel %vm5774_vm9, %v3087_v16, %v3094_v2  ;;  %v3286_v15 = vsel %vm5718_vm3, %v3096_v28, %v3285_v17  ;;  %v7901_v47 = vpop.permute.xlu1 %4227  ;;  %v4331_v42 = vpop.permute.xlu0 %4330  ;;  %v4508_v44 = vsel %vm2172_vm6, %v7847_v60, %v7723_v62  ;;  %v3635_v27 = vrot.slane %v3634_v7, 4 }
 0x267   : > { %3284 = vst.msk [vmem:[#allocation3 + $0xa0] sm:$0xf] %vm312_vm0, %v3095_v51  ;;  %3287 = vst [vmem:[#allocation3 + $0xa4] sm:$0x1] %v3286_v15  ;;  %v3664_v11 = vsel %vm5842_vm14, %v7859_v63, %v7839_v3  ;;  %v3649_v30 = vrot.slane %v3647_v25, 5  ;;  %v4446_v8 = vsel %vm2106_vm2, %v4401_v41, %v7642_v6  ;;  %v4540_v62 = vsel %vm2205_vm7, %v4508_v44, %v7640_v32 }
 0x268   : > { %4278 = vrot.lane.b32.xlu1 %v7842_v54, %s5661_s11  ;;  %4276 = vrot.lane.b32.xlu0 %v7857_v19, %s5661_s11  ;;  %v7923_v61 = vcombine.low %v3664_v11, %v3674_v50  ;;  %v3640_v6 = vsel %vm5842_vm14, %v3635_v27, %v7866_v55  ;;  %v4478_v32 = vsel %vm2139_vm4, %v4446_v8, %v7743_v39 }
 0x269   : > { %v3650_v31 = vsel %vm5842_vm14, %v3645_v40, %v3649_v30 }
 0x26a   : > { %v7921_v29 = vpop.permute.xlu1 %4297  ;;  %v7927_v21 = vpop.permute.xlu0 %4194  ;;  %v7946_v52 = vcombine.low %v3640_v6, %v3650_v31 }
 0x26b   : > { %v7937_v60 = vld [vmem:[#allocation3 + $0xa8] sm:$0xf] }
 0x26c   : > { %4173 = vrot.lane.b32.xlu1 %v7857_v19, %s5657_s30  ;;  %4346 = vrot.lane.b32.xlu0 %v7923_v61, %s5664_s18  ;;  %v3348_v3 = vld [vmem:[#allocation3 + $0x9c] sm:$0xf]  ;;  %v4572_v19 = vsel %vm2238_vm8, %v4540_v62, %v7741_v53  ;;  %v3700_v55 = vshrl.u32 %v7937_v60, 16 }
 0x26d   : > { %v3676_v63 = vshrl.u32 %v3348_v3, 16  ;;  %v3679_v45 = vshll.u32 %v3348_v3, 16  ;;  %v5289_v17 = vrot.slane %v3348_v3, 9 }
 0x26e   : > { %v7942_v13 = vpop.permute.xlu1 %4079  ;;  %v3349_v37 = vld [vmem:[#allocation3 + $0xa0] sm:$0xf]  ;;  %v7950_v4 = vld [vmem:[#allocation3 + $0xa4] sm:$0x1]  ;;  %v4226_v48 = vpop.permute.xlu0 %4225 }
 0x26f   : > { %v3689_v36 = vshrl.u32 %v3349_v37, 16  ;;  %v3888_v16 = vrot.slane %v3349_v37, 5  ;;  %v4510_v49 = vsel %vm2172_vm6, %v4478_v32, %v4226_v48  ;;  %v7958_v39 = vcombine.low %v3348_v3, %v3349_v37 }
 0x270   : > { %4243 = vrot.lane.b32.xlu1 %v7923_v61, %s5663_s17  ;;  %4241 = vrot.lane.b32.xlu0 %v7946_v52, %s5663_s17  ;;  %v3891_v53 = vrot.slane %v7950_v4, 5  ;;  %v3678_v2 = vrot.slane %v3676_v63, 4  ;;  %v4542_v28 = vsel %vm2205_vm7, %v4510_v49, %v7868_v35  ;;  %v3681_v25 = vrot.slane %v3679_v45, 5 }
 0x271   : > { %v5511_v26 = vpop.f32.mrb[28].mxu0  ;;  %v3889_v46 = vsel %vm5795_vm13, %v5289_v17, %v3888_v16  ;;  %v3890_v7 = vrot.slane %v3888_v16, 4  ;;  %v4574_v51 = vsel %vm2238_vm8, %v4542_v28, %v7694_v20  ;;  %v3685_v41 = vshll.u32 %v3349_v37, 16  ;;  %v7992_v17 = vld [vmem:[#allocation3 + $0xac] sm:$0xf] }
 0x272   : > { %v2592_v15 = vmul.f32 %v7479_v5, %v5511_v26  ;;  %v4329_v50 = vpop.permute.xlu1 %4328  ;;  %v2540_v40 = vpop.f32.mrb[29].mxu0  ;;  %v3691_v44 = vrot.slane %v3689_v36, 4  ;;  %v4606_v31 = vsel %vm2271_vm11, %v4574_v51, %v4331_v42  ;;  %v3713_v51 = vshrl.u32 %v7992_v17, 16 }
 0x273   : > { %v4604_v11 = vsel %vm2271_vm11, %v4572_v19, %v4329_v50  ;;  %v2590_v27 = vmul.f32 %v7479_v5, %v2540_v40  ;;  %v7970_v35 = vpop.permute.xlu0 %4369  ;;  %v5512_v30 = vpop.f32.mrb[30].mxu0  ;;  %v3892_v8 = vsel %vm5795_vm13, %v3890_v7, %v3891_v53  ;;  %v4638_v42 = vsel %vm8582_vm15, %v4606_v31, %v7789_v10 }
 0x274   : > { %v2631_v20 = vadd.f32 %v7495_v58, %v2592_v15  ;;  %v2593_v62 = vmul.f32 %v7479_v5, %v5512_v30  ;;  %4313 = vrot.lane.b32.xlu1 %v7958_v39, %s5659_s9  ;;  %v2543_v3 = vpop.f32.mrb[31].mxu0  ;;  %v4636_v6 = vsel %vm8580_vm12, %v4604_v11, %v7849_v24  ;;  %v7981_v63 = vcombine.low %v3889_v46, %v3892_v8  ;;  %vm8583_vm12 = vmmov %vm8581_vm5 }
 0x275   : > { %v2629_v45 = vadd.f32 %v7495_v58, %v2590_v27  ;;  %v2591_v32 = vmul.f32 %v7479_v5, %v2543_v3  ;;  %5520 = vmatmul.mubr.msk.bf16.vlgmr.msra.gmra.mrb[0].mxu1 %vm8581_vm5, %v4636_v6  ;;  %v3682_v19 = vor.u32 %v3681_v25, %v3678_v2  ;;  %v3687_v24 = vrot.slane %v3685_v41, 5 }
 0x276   : > { %v2663_v37 = vmax.f32 %v2631_v20, 0.0  ;;  %v2632_v48 = vadd.f32 %v7495_v58, %v2593_v62  ;;  %v4078_v36 = vpop.permute.xlu1 %4077  ;;  %4383 = vrot.lane.b32.xlu0 %v7981_v63, %s5662_s14  ;;  %5523 = vmatprep.mubr.msk.bf16.mxu1 %vm8583_vm12, %v4638_v42  ;;  %v3695_v10 = vshll.u32 %v7950_v4, 16  ;;  %v3703_v46 = vshll.u32 %v7937_v60, 16 }
 0x277   : > { %v2661_v16 = vmax.f32 %v2629_v45, 0.0  ;;  %v2630_v5 = vadd.f32 %v7495_v58, %v2591_v32  ;;  %v7995_v49 = vpop.permute.xlu0 %4163  ;;  %v3683_v53 = vrot.slane %v3682_v19, 4  ;;  %v3692_v26 = vor.u32 %v3691_v44, %v3687_v24  ;;  %v3295_v32 = vld [vmem:[#allocation3 + $0xb4] sm:$0xf] }
 0x278   : > { %v5435_v2 = vpack.c.bf16 %v2663_v37, %v2663_v37  ;;  %v2664_v28 = vmax.f32 %v2632_v48, 0.0  ;;  %4095 = vrot.lane.b32.xlu1 %v7923_v61, %s5660_s10  ;;  %v8002_v15 = vrot.slane %v3700_v55, 4  ;;  %v8006_v40 = vsel %vm2057_vm1, %v7216_v22, %v4078_v36  ;;  %v3302_v22 = vld [vmem:[#allocation3 + $0xc0] sm:$0xf] }
 0x279   : > { %v5433_v7 = vpack.c.bf16 %v2661_v16, %v2661_v16  ;;  %v2662_v25 = vmax.f32 %v2630_v5, 0.0  ;;  %v3693_v61 = vrot.slane %v3692_v26, 4  ;;  %v3688_v55 = vsel %vm5842_vm14, %v3683_v53, %v3687_v24  ;;  %v3306_v16 = vld [vmem:[#allocation3 + $0xc8] sm:$0x1] }
 0x27a   : > { %v3132_v58 = vshrl.u32 %v5435_v2, 16  ;;  %v5436_v50 = vpack.c.bf16 %v2664_v28, %v2664_v28  ;;  %v8008_v4 = vpop.permute.xlu1 %4266  ;;  %4175 = vrot.lane.b32.xlu0 %v7842_v54, %s5657_s30  ;;  %v3697_v27 = vrot.slane %v3695_v10, 5  ;;  %v3135_v8 = vshll.u32 %v5435_v2, 16 }
 0x27b   : > { %v3115_v41 = vshrl.u32 %v5433_v7, 16  ;;  %v5434_v44 = vpack.c.bf16 %v2662_v25, %v2662_v25  ;;  %v8012_v11 = vpop.permute.xlu0 %4367  ;;  %v3118_v31 = vshll.u32 %v5433_v7, 16  ;;  %v3705_v48 = vrot.slane %v3703_v46, 5  ;;  %v3299_v7 = vld [vmem:[#allocation3 + $0xbc] sm:$0x1] }
 0x27c   : > { %v3134_v30 = vrot.slane %v3132_v58, 7  ;;  %v3140_v20 = vshrl.u32 %v5436_v50, 16  ;;  %4344 = vrot.lane.b32.xlu1 %v7946_v52, %s5664_s18  ;;  %v3143_v3 = vshll.u32 %v5436_v50, 16  ;;  %v3698_v6 = vsel %vm5842_vm14, %v3693_v61, %v3697_v27  ;;  %v3353_v25 = vld [vmem:[#allocation3 + $0xb0] sm:$0x1] }
 0x27d   : > { %v3117_v62 = vrot.slane %v3115_v41, 7  ;;  %v3123_v54 = vshrl.u32 %v5434_v44, 16  ;;  %v3126_v19 = vshll.u32 %v5434_v44, 16  ;;  %v5323_v10 = vcombine.low %v3688_v55, %v3698_v6 }
 0x27e   : > { %v3137_v45 = vor.u32 %v3135_v8, %v3134_v30  ;;  %v3142_v42 = vrot.slane %v3140_v20, 7  ;;  %v8020_v37 = vpop.permute.xlu1 %4161  ;;  %4210 = vrot.lane.b32.xlu0 %v7958_v39, %s5658_s8  ;;  %v3138_v36 = vrot.slane %v3134_v30, 4  ;;  %v3709_v58 = vshll.u32 %v7992_v17, 16 }
 0x27f   : > { %v3120_v24 = vor.u32 %v3118_v31, %v3117_v62  ;;  %v3125_v5 = vrot.slane %v3123_v54, 7  ;;  %v8024_v53 = vpop.permute.xlu0 %4264  ;;  %v3121_v46 = vrot.slane %v3117_v62, 4  ;;  %v3715_v30 = vrot.slane %v3713_v51, 4 }
 0x280   : > { %v3303_v2 = vsel %vm5782_vm10, %v3137_v45, %v3302_v22  ;;  %v3145_v28 = vor.u32 %v3143_v3, %v3142_v42  ;;  %v3147_v26 = vrot.slane %v3142_v42, 4  ;;  %4093 = vrot.lane.b32.xlu1 %v7946_v52, %s5660_s10  ;;  %v3711_v52 = vrot.slane %v3709_v58, 5 }
 0x281   : > { %3304 = vst [vmem:[#allocation3 + $0xc0] sm:$0xf] %v3303_v2  ;;  %v3296_v50 = vsel %vm5782_vm10, %v3120_v24, %v3295_v32  ;;  %v3128_v61 = vor.u32 %v3126_v19, %v3125_v5  ;;  %v3130_v41 = vrot.slane %v3125_v5, 4  ;;  %v3706_v20 = vor.u32 %v3705_v48, %v8002_v15 }
 0x282   : > { %3297 = vst [vmem:[#allocation3 + $0xb4] sm:$0xf] %v3296_v50  ;;  %v3146_v44 = vsel %vm5774_vm9, %v3138_v36, %v3145_v28  ;;  %v3307_v55 = vsel %vm5718_vm3, %v3147_v26, %v3306_v16  ;;  %v8037_v27 = vpop.permute.xlu1 %4200  ;;  %4245 = vrot.lane.b32.xlu0 %v5323_v10, %s5663_s17  ;;  %v3719_v22 = vshll.u32 %v3353_v25, 16  ;;  %v3716_v51 = vor.u32 %v3715_v30, %v3711_v52 }
 0x283   : > { %3305 = vst.msk [vmem:[#allocation3 + $0xc4] sm:$0xf] %vm312_vm0, %v3146_v44  ;;  %3308 = vst [vmem:[#allocation3 + $0xc8] sm:$0x1] %v3307_v55  ;;  %v3129_v43 = vsel %vm5774_vm9, %v3121_v46, %v3128_v61  ;;  %v3300_v8 = vsel %vm5718_vm3, %v3130_v41, %v3299_v7  ;;  %v8045_v31 = vpop.permute.xlu0 %4303  ;;  %v3895_v62 = vrot.slane %v7992_v17, 5  ;;  %v4448_v38 = vsel %vm2106_vm2, %v8006_v40, %v7864_v23 }
 0x284   : > { %3298 = vst.msk [vmem:[#allocation3 + $0xb8] sm:$0xf] %vm312_vm0, %v3129_v43  ;;  %3301 = vst [vmem:[#allocation3 + $0xbc] sm:$0x1] %v3300_v8  ;;  %4177 = vrot.lane.b32.xlu1 %v7981_v63, %s5657_s30  ;;  %v3717_v15 = vrot.slane %v3716_v51, 4  ;;  %v3707_v54 = vrot.slane %v3706_v20, 4  ;;  %v4407_v45 = vsel %vm2057_vm1, %v7181_v56, %v7942_v13  ;;  %v4480_v32 = vsel %vm2139_vm4, %v4448_v38, %v7692_v34 }
 0x285   : > { %v3721_v6 = vrot.slane %v3719_v22, 5  ;;  %v8067_v23 = vcombine.low %v7937_v60, %v7992_v17  ;;  %v3897_v40 = vrot.slane %v3895_v62, 4  ;;  %v3898_v19 = vrot.slane %v3353_v25, 5  ;;  %vm8584_vm0 = vmmov %vm8582_vm15 }
 0x286   : > { %v8055_v1 = vpop.permute.xlu1 %4231  ;;  %4280 = vrot.lane.b32.xlu0 %v7981_v63, %s5661_s11  ;;  %v4450_v34 = vsel %vm2106_vm2, %v4407_v45, %v7825_v14  ;;  %v3712_v17 = vsel %vm5842_vm14, %v3707_v54, %v3711_v52  ;;  %v4512_v48 = vsel %vm2172_vm6, %v4480_v32, %v7901_v47  ;;  %v5290_v16 = vrot.slane %v7937_v60, 9  ;;  %vm8585_vm3 = vmmov %vm8581_vm5 }
 0x287   : > { %v4335_v3 = vpop.permute.xlu0 %4334  ;;  %v3722_v63 = vsel %vm5842_vm14, %v3717_v15, %v3721_v6  ;;  %v3899_v5 = vsel %vm5795_vm13, %v3897_v40, %v3898_v19  ;;  %v4482_v47 = vsel %vm2139_vm4, %v4450_v34, %v7927_v21  ;;  %v4544_v60 = vsel %vm2205_vm7, %v4512_v48, %v7828_v12  ;;  %vm8586_vm9 = vmmov %vm8584_vm0 }
 0x288   : > { %4348 = vrot.lane.b32.xlu1 %v5323_v10, %s5664_s18  ;;  %v8086_v24 = vcombine.low %v3712_v17, %v3722_v63  ;;  %v3896_v50 = vsel %vm5795_vm13, %v5290_v16, %v3895_v62  ;;  %v4576_v22 = vsel %vm2238_vm8, %v4544_v60, %v7921_v29  ;;  %vm8587_vm10 = vmmov %vm8585_vm3  ;;  %v8139_v19 = vld [vmem:[#allocation3 + $0xc0] sm:$0xf] }
 0x289   : > { %v8075_v56 = vld [vmem:[#allocation3 + $0xb4] sm:$0xf]  ;;  %v5340_v52 = vcombine.low %v3896_v50, %v3899_v5  ;;  %vm8589_vm5 = vmmov %vm8584_vm0 }
 0x28a   : > { %v8071_v42 = vpop.permute.xlu1 %4301  ;;  %4315 = vrot.lane.b32.xlu0 %v8067_v23, %s5659_s9  ;;  %v3724_v28 = vshrl.u32 %v8075_v56, 16  ;;  %v3727_v26 = vshll.u32 %v8075_v56, 16  ;;  %v5291_v30 = vrot.slane %v8075_v56, 9  ;;  %v3359_v50 = vld [vmem:[#allocation3 + $0xc8] sm:$0x1]  ;;  %vm8590_vm15 = vmmov %vm8585_vm3 }
 0x28b   : > { %v8079_v13 = vpop.permute.xlu0 %4198  ;;  %v3355_v36 = vld [vmem:[#allocation3 + $0xb8] sm:$0xf]  ;;  %v3356_v2 = vld [vmem:[#allocation3 + $0xbc] sm:$0x1]  ;;  %vm8591_vm12 = vmmov %vm8584_vm0 }
 0x28c   : > { %4097 = vrot.lane.b32.xlu1 %v5323_v10, %s5660_s10  ;;  %v3902_v14 = vrot.slane %v3355_v36, 5  ;;  %v3733_v7 = vshll.u32 %v3355_v36, 16  ;;  %v3737_v25 = vshrl.u32 %v3355_v36, 16  ;;  %v3905_v61 = vrot.slane %v3356_v2, 5 }
 0x28d   : > { %v3726_v43 = vrot.slane %v3724_v28, 4  ;;  %v3729_v8 = vrot.slane %v3727_v26, 5  ;;  %v3743_v32 = vshll.u32 %v3356_v2, 16  ;;  %v8147_v5 = vcombine.low %v8075_v56, %v3355_v36 }
 0x28e   : > { %v8093_v58 = vpop.permute.xlu1 %4083  ;;  %4350 = vrot.lane.b32.xlu0 %v8086_v24, %s5664_s18  ;;  %v3904_v10 = vrot.slane %v3902_v14, 4  ;;  %v3735_v41 = vrot.slane %v3733_v7, 5  ;;  %v3739_v44 = vrot.slane %v3737_v25, 4  ;;  %v3908_v28 = vshrl.u32 %v8139_v19, 16 }
 0x28f   : > { %v4230_v46 = vpop.permute.xlu0 %4229  ;;  %v3730_v45 = vor.u32 %v3729_v8, %v3726_v43  ;;  %v3745_v17 = vrot.slane %v3743_v32, 5  ;;  %v3911_v26 = vshll.u32 %v8139_v19, 16  ;;  %v8176_v8 = vld [vmem:[#allocation3 + $0xcc] sm:$0xf] }
 0x290   : > { %v4514_v55 = vsel %vm2172_vm6, %v4482_v47, %v4230_v46  ;;  %4212 = vrot.lane.b32.xlu1 %v8067_v23, %s5658_s8  ;;  %v3906_v12 = vsel %vm5795_vm13, %v3904_v10, %v3905_v61  ;;  %v3740_v54 = vor.u32 %v3739_v44, %v3735_v41  ;;  %v3910_v10 = vrot.slane %v3908_v28, 4 }
 0x291   : > { %v4546_v21 = vsel %vm2205_vm7, %v4514_v55, %v8024_v53  ;;  %v3903_v53 = vsel %vm5795_vm13, %v5291_v30, %v3902_v14  ;;  %v3731_v34 = vrot.slane %v3730_v45, 4  ;;  %v3913_v46 = vrot.slane %v3911_v26, 5 }
 0x292   : > { %v4578_v20 = vsel %vm2238_vm8, %v4546_v21, %v7883_v18  ;;  %v4333_v51 = vpop.permute.xlu1 %4332  ;;  %4385 = vrot.lane.b32.xlu0 %v5340_v52, %s5662_s14  ;;  %v8126_v29 = vcombine.low %v3903_v53, %v3906_v12  ;;  %v3927_v30 = vshll.u32 %v3359_v50, 16  ;;  %v8173_v21 = vld [vmem:[#allocation3 + $0xd0] sm:$0xf]  ;;  %v5292_v28 = vrot.slane %v8139_v19, 9 }
 0x293   : > { %v4608_v62 = vsel %vm2271_vm11, %v4576_v22, %v4333_v51  ;;  %v8117_v38 = vpop.permute.xlu0 %4373  ;;  %v4610_v15 = vsel %vm2271_vm11, %v4578_v20, %v4335_v3  ;;  %v8134_v3 = vld [vmem:[#allocation3 + $0xc4] sm:$0xf]  ;;  %v3736_v7 = vsel %vm5842_vm14, %v3731_v34, %v3735_v41 }
 0x294   : > { %4247 = vrot.lane.b32.xlu1 %v8086_v24, %s5663_s17  ;;  %v4640_v18 = vsel %vm8584_vm0, %v4608_v62, %v8012_v11  ;;  %v4642_v6 = vsel %vm8586_vm9, %v4610_v15, %v7970_v35  ;;  %v3741_v11 = vrot.slane %v3740_v54, 4  ;;  %v3921_v35 = vshrl.u32 %v8134_v3, 16  ;;  %vm8592_vm0 = vmmov %vm8585_vm3 }
 0x295   : > { %5524 = vmatmul.mubr.msk.bf16.gmra.mrb[4].mxu1 %vm8585_vm3, %v4640_v18  ;;  %v3917_v48 = vshll.u32 %v8134_v3, 16  ;;  %v3936_v43 = vrot.slane %v8134_v3, 5  ;;  %v3929_v62 = vrot.slane %v3927_v30, 5  ;;  %v5342_v53 = vcombine.low %v8139_v19, %v8134_v3  ;;  %v8588_v18 = vld [vmem:[#allocation4_spill] sm:$0xff]  ;;  %vm8597_vm3 = vmmov %vm8589_vm5 }
 0x296   : > { %v4082_v40 = vpop.permute.xlu1 %4081  ;;  %4387 = vrot.lane.b32.xlu0 %v8126_v29, %s5662_s14  ;;  %5527 = vmatprep.mubr.msk.bf16.mxu1 %vm8587_vm10, %v4642_v6  ;;  %v3746_v14 = vsel %vm5842_vm14, %v3741_v11, %v3745_v17  ;;  %v3923_v47 = vrot.slane %v3921_v35, 4  ;;  %v3942_v15 = vshrl.u32 %v8176_v8, 16  ;;  %v3945_v54 = vshll.u32 %v8176_v8, 16  ;;  %vm8598_vm9 = vmmov %vm8592_vm0 }
 0x297   : > { %v8136_v63 = vpop.permute.xlu0 %4167  ;;  %v3919_v25 = vrot.slane %v3917_v48, 5  ;;  %v5325_v56 = vcombine.low %v3736_v7, %v3746_v14  ;;  %v4410_v41 = vsel %vm2057_vm1, %v7350_v9, %v4082_v40  ;;  %v4413_v6 = vsel %vm2057_vm1, %v8588_v18, %v8093_v58  ;;  %vm8601_vm10 = vmmov %vm8597_vm3 }
 0x298   : > { %4282 = vrot.lane.b32.xlu1 %v5340_v52, %s5661_s11  ;;  %v4452_v20 = vsel %vm2106_vm2, %v4410_v41, %v8020_v37  ;;  %v3955_v37 = vshrl.u32 %v8173_v21, 16  ;;  %v3938_v40 = vrot.slane %v3936_v43, 4  ;;  %v3939_v17 = vrot.slane %v3359_v50, 5 }
 0x299   : > { %v3924_v61 = vor.u32 %v3923_v47, %v3919_v25  ;;  %v4484_v45 = vsel %vm2139_vm4, %v4452_v20, %v7878_v33  ;;  %v4454_v58 = vsel %vm2106_vm2, %v4413_v6, %v7995_v49  ;;  %v3944_v7 = vrot.slane %v3942_v15, 4 }
 0x29a   : > { %v8143_v16 = vpop.permute.xlu1 %4270  ;;  %4179 = vrot.lane.b32.xlu0 %v5340_v52, %s5657_s30  ;;  %v3914_v52 = vor.u32 %v3913_v46, %v3910_v10  ;;  %v4516_v48 = vsel %vm2172_vm6, %v4484_v45, %v8055_v1  ;;  %v3957_v14 = vrot.slane %v3955_v37, 4  ;;  %v3940_v26 = vsel %vm5795_vm13, %v3938_v40, %v3939_v17 }
 0x29b   : > { %v8149_v2 = vpop.permute.xlu0 %4371  ;;  %v3925_v12 = vrot.slane %v3924_v61, 4  ;;  %v4486_v49 = vsel %vm2139_vm4, %v4454_v58, %v8079_v13  ;;  %v4548_v10 = vsel %vm2205_vm7, %v4516_v48, %v8008_v4  ;;  %v3937_v1 = vsel %vm5795_vm13, %v5292_v28, %v3936_v43 }
 0x29c   : > { %4317 = vrot.lane.b32.xlu1 %v8147_v5, %s5659_s9  ;;  %v3915_v51 = vrot.slane %v3914_v52, 4  ;;  %v5344_v46 = vcombine.low %v3937_v1, %v3940_v26  ;;  %v4580_v30 = vsel %vm2238_vm8, %v4548_v10, %v8071_v42 }
 0x29d   : > { %v3930_v32 = vsel %vm5842_vm14, %v3925_v12, %v3929_v62 }
 0x29e   : > { %v8159_v60 = vpop.permute.xlu1 %4165  ;;  %4214 = vrot.lane.b32.xlu0 %v8147_v5, %s5658_s8  ;;  %v3920_v34 = vsel %vm5842_vm14, %v3915_v51, %v3919_v25  ;;  %v3947_v25 = vrot.slane %v3945_v54, 5  ;;  %v3970_v51 = vrot.slane %v8173_v21, 5 }
 0x29f   : > { %v4269_v36 = vpop.permute.xlu0 %4268  ;;  %v5343_v33 = vcombine.low %v3920_v34, %v3930_v32 }
 0x2a0   : > { %4352 = vrot.lane.b32.xlu1 %v5325_v56, %s5664_s18  ;;  %v3948_v61 = vor.u32 %v3947_v25, %v3944_v7  ;;  %v3972_v37 = vrot.slane %v3970_v51, 4 }
 0x2a2   : > { %v8164_v44 = vpop.permute.xlu1 %4204  ;;  %4249 = vrot.lane.b32.xlu0 %v5325_v56, %s5663_s17  ;;  %v3949_v42 = vrot.slane %v3948_v61, 4 }
 0x2a3   : > { %v8169_v55 = vpop.permute.xlu0 %4307 }
 0x2a4   : > { %4099 = vrot.lane.b32.xlu1 %v8086_v24, %s5660_s10  ;;  %v3951_v24 = vshll.u32 %v8173_v21, 16 }
 0x2a6   : > { %v8180_v22 = vpop.permute.xlu1 %4235  ;;  %4284 = vrot.lane.b32.xlu0 %v8126_v29, %s5661_s11  ;;  %v3953_v35 = vrot.slane %v3951_v24, 5 }
 0x2a7   : > { %v4339_v9 = vpop.permute.xlu0 %4338 }
 0x2a8   : > { %4101 = vrot.lane.b32.xlu1 %v5325_v56, %s5660_s10  ;;  %v3362_v56 = vld [vmem:[#allocation3 + $0xd4] sm:$0x1]  ;;  %v3958_v41 = vor.u32 %v3957_v14, %v3953_v35  ;;  %v3954_v54 = vsel %vm5842_vm14, %v3949_v42, %v3953_v35  ;;  %v8593_v35 = vld [vmem:[#allocation6_spill] sm:$0xff] }
 0x2a9   : > { %v3961_v52 = vshll.u32 %v3362_v56, 16  ;;  %v3973_v18 = vrot.slane %v3362_v56, 5 }
 0x2aa   : > { %v8198_v11 = vpop.permute.xlu1 %4305  ;;  %4319 = vrot.lane.b32.xlu0 %v5342_v53, %s5659_s9  ;;  %v3959_v62 = vrot.slane %v3958_v41, 4 }
 0x2ab   : > { %v8201_v3 = vpop.permute.xlu0 %4202  ;;  %v3963_v24 = vrot.slane %v3961_v52, 5 }
 0x2ac   : > { %4181 = vrot.lane.b32.xlu1 %v8126_v29, %s5657_s30 }
 0x2ae   : > { %v4088_v47 = vpop.permute.xlu1 %4087  ;;  %4354 = vrot.lane.b32.xlu0 %v5343_v33, %s5664_s18 }
 0x2af   : > { %v4234_v29 = vpop.permute.xlu0 %4233  ;;  %v4419_v26 = vsel %vm2057_vm1, %v8594_v0, %v4088_v47 }
 0x2b0   : > { %v4518_v19 = vsel %vm2172_vm6, %v4486_v49, %v4234_v29  ;;  %4216 = vrot.lane.b32.xlu1 %v5342_v53, %s5658_s8  ;;  %v4458_v49 = vsel %vm2106_vm2, %v4419_v26, %v8136_v63 }
 0x2b1   : > { %v4550_v50 = vsel %vm2205_vm7, %v4518_v19, %v4269_v36 }
 0x2b2   : > { %v4582_v13 = vsel %vm2238_vm8, %v4550_v50, %v8045_v31  ;;  %v4337_v4 = vpop.permute.xlu1 %4336  ;;  %4389 = vrot.lane.b32.xlu0 %v5344_v46, %s5662_s14 }
 0x2b3   : > { %v4612_v12 = vsel %vm2271_vm11, %v4580_v30, %v4337_v4  ;;  %v4378_v43 = vpop.permute.xlu0 %4377  ;;  %v4614_v20 = vsel %vm2271_vm11, %v4582_v13, %v4339_v9  ;;  %v5345_v9 = vcombine.low %v8176_v8, %v8173_v21  ;;  %v3974_v21 = vsel %vm5795_vm13, %v3972_v37, %v3973_v18  ;;  %v8599_v4 = vld [vmem:[#allocation7_spill] sm:$0xff] }
 0x2b4   : > { %4251 = vrot.lane.b32.xlu1 %v5343_v33, %s5663_s17  ;;  %v4644_v36 = vsel %vm8589_vm5, %v4612_v12, %v8149_v2  ;;  %v4646_v31 = vsel %vm8591_vm12, %v4614_v20, %v8117_v38  ;;  %v5293_v2 = vrot.slane %v8176_v8, 9  ;;  %v3964_v38 = vsel %vm5842_vm14, %v3959_v62, %v3963_v24  ;;  %vm8596_vm14 = vmmov %vm8592_vm0  ;;  %v8600_v20 = vld [vmem:[#allocation8_spill] sm:$0xff]  ;;  %s8379_s17 = scalar_lea.vmem %s8543_s7, %s5371_s26 }
 0x2b5   : > { %5528 = vmatmul.mubr.msk.bf16.gmra.mrb[8].mxu1 %vm8590_vm15, %v4644_v36  ;;  %v5346_v32 = vcombine.low %v3954_v54, %v3964_v38  ;;  %vm8603_vm15 = vmmov %vm8597_vm3 }
 0x2b6   : > { %v4086_v53 = vpop.permute.xlu1 %4085  ;;  %5531 = vmatprep.mubr.msk.bf16.mxu1 %vm8592_vm0, %v4646_v31  ;;  %v3971_v40 = vsel %vm5795_vm13, %v5293_v2, %v3970_v51  ;;  %vm8595_vm13 = vmmov %vm8589_vm5 }
 0x2b7   : > { %v4172_v15 = vpop.permute.xlu0 %4171  ;;  %v5347_v17 = vcombine.low %v3971_v40, %v3974_v21  ;;  %v4416_v58 = vsel %vm2057_vm1, %v8593_v35, %v4086_v53  ;;  %vm8602_vm5 = vmmov %vm8592_vm0 }
 0x2b8   : > { %4286 = vrot.lane.b32.xlu1 %v5344_v46, %s5661_s11  ;;  %v4456_v48 = vsel %vm2106_vm2, %v4416_v58, %v8159_v60  ;;  %v4490_v60 = vsel %vm2139_vm4, %v4458_v49, %v8201_v3  ;;  %vm8604_vm12 = vmmov %vm8592_vm0 }
 0x2b9   : > { %v4488_v7 = vsel %vm2139_vm4, %v4456_v48, %v8037_v27  ;;  %vm8606_vm0 = vmmov %vm8597_vm3 }
 0x2ba   : > { %v4275_v6 = vpop.permute.xlu1 %4274  ;;  %v4520_v29 = vsel %vm2172_vm6, %v4488_v7, %v8180_v22 }
 0x2bb   : > { %v4376_v45 = vpop.permute.xlu0 %4375  ;;  %v4552_v19 = vsel %vm2205_vm7, %v4520_v29, %v8143_v16  ;;  %v8605_v29 = vld [vmem:[#allocation9_spill] sm:$0xff] }
 0x2bc   : > { %4321 = vrot.lane.b32.xlu1 %v5345_v9, %s5659_s9  ;;  %v4584_v63 = vsel %vm2238_vm8, %v4552_v19, %v8198_v11 }
 0x2be   : > { %v4170_v8 = vpop.permute.xlu1 %4169 }
 0x2bf   : > { %v4273_v34 = vpop.permute.xlu0 %4272 }
 0x2c0   : > { %4356 = vrot.lane.b32.xlu1 %v5346_v32, %s5664_s18 }
 0x2c2   : > { %v8253_v57 = vpop.permute.xlu1 %4208 }
 0x2c3   : > { %v4312_v33 = vpop.permute.xlu0 %4311 }
 0x2c4   : > { %4391 = vrot.lane.b32.xlu1 %v5347_v17, %s5662_s14 }
 0x2c6   : > { %v4240_v14 = vpop.permute.xlu1 %4239 }
 0x2c7   : > { %v4343_v28 = vpop.permute.xlu0 %4342 }
 0x2ca   : > { %v4310_v25 = vpop.permute.xlu1 %4309 }
 0x2cb   : > { %v4207_v56 = vpop.permute.xlu0 %4206 }
 0x2ce   : > { %v4092_v10 = vpop.permute.xlu1 %4091 }
 0x2cf   : > { %v4238_v1 = vpop.permute.xlu0 %4237  ;;  %v4425_v11 = vsel %vm2057_vm1, %v8599_v4, %v4092_v10 }
 0x2d0   : > { %v4522_v47 = vsel %vm2172_vm6, %v4490_v60, %v4238_v1  ;;  %v4462_v31 = vsel %vm2106_vm2, %v4425_v11, %v4172_v15 }
 0x2d1   : > { %v4554_v27 = vsel %vm2205_vm7, %v4522_v47, %v4273_v34  ;;  %v4494_v24 = vsel %vm2139_vm4, %v4462_v31, %v4207_v56 }
 0x2d2   : > { %v4586_v46 = vsel %vm2238_vm8, %v4554_v27, %v8169_v55  ;;  %v4341_v50 = vpop.permute.xlu1 %4340 }
 0x2d3   : > { %v4616_v22 = vsel %vm2271_vm11, %v4584_v63, %v4341_v50  ;;  %v4382_v61 = vpop.permute.xlu0 %4381  ;;  %v4618_v3 = vsel %vm2271_vm11, %v4586_v46, %v4343_v28 }
 0x2d4   : > { %v4648_v41 = vsel %vm8595_vm13, %v4616_v22, %v4376_v45  ;;  %v4650_v16 = vsel %vm8597_vm3, %v4618_v3, %v4378_v43  ;;  %vm8607_vm13 = vmmov %vm8602_vm5 }
 0x2d5   : > { %5532 = vmatmul.mubr.msk.bf16.gmra.mrb[12].mxu1 %vm8596_vm14, %v4648_v41  ;;  %vm8608_vm14 = vmmov %vm8606_vm0 }
 0x2d6   : > { %v4090_v52 = vpop.permute.xlu1 %4089  ;;  %5535 = vmatprep.mubr.msk.bf16.mxu1 %vm8598_vm9, %v4650_v16  ;;  %vm8609_vm3 = vmmov %vm8602_vm5 }
 0x2d7   : > { %v4380_v13 = vpop.permute.xlu0 %4379  ;;  %v4422_v36 = vsel %vm2057_vm1, %v8600_v20, %v4090_v52  ;;  %vm8610_vm9 = vmmov %vm8606_vm0 }
 0x2d8   : > { %v4460_v42 = vsel %vm2106_vm2, %v4422_v36, %v4170_v8 }
 0x2d9   : > { %v4492_v53 = vsel %vm2139_vm4, %v4460_v42, %v8164_v44 }
 0x2da   : > { %v4279_v55 = vpop.permute.xlu1 %4278  ;;  %v4524_v37 = vsel %vm2172_vm6, %v4492_v53, %v4240_v14 }
 0x2db   : > { %v4277_v30 = vpop.permute.xlu0 %4276  ;;  %v4556_v45 = vsel %vm2205_vm7, %v4524_v37, %v4275_v6 }
 0x2dc   : > { %v4588_v40 = vsel %vm2238_vm8, %v4556_v45, %v4310_v25 }
 0x2de   : > { %v4174_v12 = vpop.permute.xlu1 %4173 }
 0x2df   : > { %v4347_v51 = vpop.permute.xlu0 %4346 }
 0x2e2   : > { %v4244_v62 = vpop.permute.xlu1 %4243 }
 0x2e3   : > { %v4242_v43 = vpop.permute.xlu0 %4241 }
 0x2e4   : > { %v4526_v9 = vsel %vm2172_vm6, %v4494_v24, %v4242_v43 }
 0x2e5   : > { %v4558_v54 = vsel %vm2205_vm7, %v4526_v9, %v4277_v30 }
 0x2e6   : > { %v4314_v2 = vpop.permute.xlu1 %4313  ;;  %v4590_v15 = vsel %vm2238_vm8, %v4558_v54, %v4312_v33 }
 0x2e7   : > { %v4622_v8 = vsel %vm2271_vm11, %v4590_v15, %v4347_v51 }
 0x2e8   : > { %v4384_v38 = vpop.permute.xlu0 %4383  ;;  %v4654_v35 = vsel %vm8603_vm15, %v4622_v8, %v4382_v61  ;;  %vm8613_vm15 = vmmov %vm8609_vm3 }
 0x2ea   : > { %v4096_v18 = vpop.permute.xlu1 %4095 }
 0x2ec   : > { %v4176_v32 = vpop.permute.xlu0 %4175 }
 0x2ee   : > { %v4345_v21 = vpop.permute.xlu1 %4344 }
 0x2ef   : > { %v4620_v44 = vsel %vm2271_vm11, %v4588_v40, %v4345_v21 }
 0x2f0   : > { %v4211_v34 = vpop.permute.xlu0 %4210  ;;  %v4652_v17 = vsel %vm8601_vm10, %v4620_v44, %v4380_v13  ;;  %vm8611_vm10 = vmmov %vm8609_vm3 }
 0x2f1   : > { %5536 = vmatmul.mubr.msk.bf16.gmra.mrb[16].mxu1 %vm8602_vm5, %v4652_v17  ;;  %vm8612_vm5 = vmmov %vm8606_vm0 }
 0x2f2   : > { %v4094_v58 = vpop.permute.xlu1 %4093  ;;  %5539 = vmatprep.mubr.msk.bf16.mxu1 %vm8604_vm12, %v4654_v35  ;;  %vm8614_vm12 = vmmov %vm8606_vm0 }
 0x2f3   : > { %v4428_v6 = vsel %vm2057_vm1, %v7807_v59, %v4094_v58  ;;  %v4431_v59 = vsel %vm2057_vm1, %v8605_v29, %v4096_v18 }
 0x2f4   : > { %v4464_v33 = vsel %vm2106_vm2, %v4428_v6, %v4174_v12  ;;  %v4246_v48 = vpop.permute.xlu0 %4245  ;;  %v4466_v1 = vsel %vm2106_vm2, %v4431_v59, %v4176_v32 }
 0x2f5   : > { %v4496_v14 = vsel %vm2139_vm4, %v4464_v33, %v8253_v57  ;;  %v4498_v19 = vsel %vm2139_vm4, %v4466_v1, %v4211_v34 }
 0x2f6   : > { %v4178_v28 = vpop.permute.xlu1 %4177  ;;  %v4528_v0 = vsel %vm2172_vm6, %v4496_v14, %v4244_v62  ;;  %v4530_v27 = vsel %vm2172_vm6, %v4498_v19, %v4246_v48 }
 0x2f7   : > { %v4560_v26 = vsel %vm2205_vm7, %v4528_v0, %v4279_v55 }
 0x2f8   : > { %v4281_v7 = vpop.permute.xlu0 %4280  ;;  %v4592_v25 = vsel %vm2238_vm8, %v4560_v26, %v4314_v2 }
 0x2f9   : > { %v4562_v46 = vsel %vm2205_vm7, %v4530_v27, %v4281_v7  ;;  %v5616_v27 = vld [vmem:[%s5751_s29 + $0x10] sm:$0xff] }
 0x2fa   : > { %v4349_v56 = vpop.permute.xlu1 %4348 }
 0x2fb   : > { %v4624_v49 = vsel %vm2271_vm11, %v4592_v25, %v4349_v56  ;;  %v8364_v56 = vld [vmem:[%s8542_s6] ss:$0 sm:$0xff] }
 0x2fc   : > { %v4316_v10 = vpop.permute.xlu0 %4315  ;;  %v4656_v60 = vsel %vm8606_vm0, %v4624_v49, %v4384_v38  ;;  %vm8615_vm0 = vmmov %vm8609_vm3 }
 0x2fd   : > { %5540 = vmatmul.mubr.msk.bf16.gmra.mrb[20].mxu1 %vm8607_vm13, %v4656_v60  ;;  %v4594_v50 = vsel %vm2238_vm8, %v4562_v46, %v4316_v10 }
 0x2fe   : > { %v4098_v57 = vpop.permute.xlu1 %4097 }
 0x2ff   : > { %v4434_v13 = vsel %vm2057_vm1, %v7958_v39, %v4098_v57 }
 0x300   : > { %v4351_v47 = vpop.permute.xlu0 %4350  ;;  %v4468_v30 = vsel %vm2106_vm2, %v4434_v13, %v4178_v28  ;;  %v5619_v13 = vld [vmem:[%s5751_s29 + $0x8] sm:$0xff] }
 0x301   : > { %v4626_v22 = vsel %vm2271_vm11, %v4594_v50, %v4351_v47  ;;  %v5617_v50 = vld [vmem:[%s5751_s29] sm:$0xff] }
 0x302   : > { %v4213_v63 = vpop.permute.xlu1 %4212 }
 0x303   : > { %v4500_v11 = vsel %vm2139_vm4, %v4468_v30, %v4213_v63 }
 0x304   : > { %v4386_v61 = vpop.permute.xlu0 %4385 }
 0x305   : > { %v4658_v3 = vsel %vm8608_vm14, %v4626_v22, %v4386_v61 }
 0x306   : > { %v4248_v41 = vpop.permute.xlu1 %4247  ;;  %5543 = vmatprep.mubr.msk.bf16.mxu1 %vm8609_vm3, %v4658_v3 }
 0x307   : > { %v4532_v12 = vsel %vm2172_vm6, %v4500_v11, %v4248_v41  ;;  %v5618_v41 = vld [vmem:[%s5751_s29 + $0x18] sm:$0xff] }
 0x308   : > { %v4388_v16 = vpop.permute.xlu0 %4387 }
 0x30a   : > { %v4283_v52 = vpop.permute.xlu1 %4282 }
 0x30b   : > { %v4564_v36 = vsel %vm2205_vm7, %v4532_v12, %v4283_v52 }
 0x30c   : > { %v4180_v55 = vpop.permute.xlu0 %4179 }
 0x30e   : > { %v4318_v4 = vpop.permute.xlu1 %4317 }
 0x30f   : > { %v4596_v51 = vsel %vm2238_vm8, %v4564_v36, %v4318_v4 }
 0x310   : > { %v4215_v20 = vpop.permute.xlu0 %4214 }
 0x312   : > { %v4353_v31 = vpop.permute.xlu1 %4352 }
 0x313   : > { %v4628_v42 = vsel %vm2271_vm11, %v4596_v51, %v4353_v31 }
 0x314   : > { %v4250_v62 = vpop.permute.xlu0 %4249  ;;  %v4660_v43 = vsel %vm8610_vm9, %v4628_v42, %v4388_v16 }
 0x315   : > { %5544 = vmatmul.mubr.msk.bf16.gmra.mrb[24].mxu1 %vm8611_vm10, %v4660_v43 }
 0x316   : > { %v4100_v39 = vpop.permute.xlu1 %4099 }
 0x317   : > { %v4437_v24 = vsel %vm2057_vm1, %v8067_v23, %v4100_v39 }
 0x318   : > { %v4470_v53 = vsel %vm2106_vm2, %v4437_v24, %v4180_v55  ;;  %v4285_v9 = vpop.permute.xlu0 %4284  ;;  %v5620_v24 = vld [vmem:[%s5751_s29 + $0x30] sm:$0xff] }
 0x319   : > { %v4502_v2 = vsel %vm2139_vm4, %v4470_v53, %v4215_v20 }
 0x31a   : > { %v4102_v54 = vpop.permute.xlu1 %4101  ;;  %v4534_v37 = vsel %vm2172_vm6, %v4502_v2, %v4250_v62  ;;  %v5621_v2 = vld [vmem:[%s5751_s29 + $0x20] sm:$0xff] }
 0x31b   : > { %v4566_v15 = vsel %vm2205_vm7, %v4534_v37, %v4285_v9  ;;  %v4440_v35 = vsel %vm2057_vm1, %v8147_v5, %v4102_v54  ;;  %v8359_v5 = vld [vmem:[%s8541_s5] ss:$0 sm:$0xff] }
 0x31c   : > { %v4320_v38 = vpop.permute.xlu0 %4319 }
 0x31d   : > { %v4598_v40 = vsel %vm2238_vm8, %v4566_v15, %v4320_v38 }
 0x31e   : > { %v4182_v18 = vpop.permute.xlu1 %4181 }
 0x31f   : > { %v4472_v58 = vsel %vm2106_vm2, %v4440_v35, %v4182_v18  ;;  %v5622_v18 = vld [vmem:[%s5751_s29 + $0x38] sm:$0xff] }
 0x320   : > { %v4355_v45 = vpop.permute.xlu0 %4354 }
 0x321   : > { %v4630_v21 = vsel %vm2271_vm11, %v4598_v40, %v4355_v45 }
 0x322   : > { %v4217_v32 = vpop.permute.xlu1 %4216 }
 0x323   : > { %v4504_v6 = vsel %vm2139_vm4, %v4472_v58, %v4217_v32  ;;  %v5623_v32 = vld [vmem:[%s5751_s29 + $0x28] sm:$0xff] }
 0x324   : > { %v4390_v8 = vpop.permute.xlu0 %4389 }
 0x325   : > { %v4662_v23 = vsel %vm8612_vm5, %v4630_v21, %v4390_v8 }
 0x326   : > { %v4252_v44 = vpop.permute.xlu1 %4251  ;;  %5547 = vmatprep.mubr.msk.bf16.mxu1 %vm8613_vm15, %v4662_v23 }
 0x327   : > { %v4536_v48 = vsel %vm2172_vm6, %v4504_v6, %v4252_v44 }
 0x32a   : > { %v4287_v34 = vpop.permute.xlu1 %4286 }
 0x32b   : > { %v4568_v14 = vsel %vm2205_vm7, %v4536_v48, %v4287_v34 }
 0x32e   : > { %v4322_v17 = vpop.permute.xlu1 %4321 }
 0x32f   : > { %v4600_v28 = vsel %vm2238_vm8, %v4568_v14, %v4322_v17 }
 0x332   : > { %v4357_v33 = vpop.permute.xlu1 %4356 }
 0x333   : > { %v4632_v0 = vsel %vm2271_vm11, %v4600_v28, %v4357_v33  ;;  %v5624_v28 = vld [vmem:[%s5751_s29 + $0x50] sm:$0xff] }
 0x336   : > { %v4392_v26 = vpop.permute.xlu1 %4391 }
 0x337   : > { %v4664_v7 = vsel %vm8614_vm12, %v4632_v0, %v4392_v26 }
 0x338   : > { %5548 = vmatmul.mubr.msk.bf16.gmra.mrb[28].mxu1 %vm8615_vm0, %v4664_v7  ;;  %v5625_v7 = vld [vmem:[%s5751_s29 + $0x40] sm:$0xff] }
 0x348   : > { %v5521_v25 = vpop.f32.mrb[0].mxu1 }
 0x349   : > { %v4890_v49 = vmul.f32 %v5521_v25, %v8359_v5  ;;  %v4754_v29 = vpop.f32.mrb[1].mxu1 }
 0x34a   : > { %v4888_v59 = vmul.f32 %v8359_v5, %v4754_v29  ;;  %v5522_v10 = vpop.f32.mrb[2].mxu1 }
 0x34b   : > { %v4929_v60 = vadd.f32 %v8364_v56, %v4890_v49  ;;  %v4891_v57 = vmul.f32 %v5522_v10, %v8359_v5  ;;  %v4757_v1 = vpop.f32.mrb[3].mxu1 }
 0x34c   : > { %v4927_v19 = vadd.f32 %v8364_v56, %v4888_v59  ;;  %v4889_v47 = vmul.f32 %v8359_v5, %v4757_v1  ;;  %v5626_v59 = vld [vmem:[%s5751_s29 + $0x58] sm:$0xff] }
 0x34d   : > { %v4961_v46 = vadd.f32 %v5616_v27, %v4929_v60  ;;  %v4930_v63 = vadd.f32 %v8364_v56, %v4891_v57  ;;  %v5627_v57 = vld [vmem:[%s5751_s29 + $0x48] sm:$0xff] }
 0x34e   : > { %v4959_v22 = vadd.f32 %v5617_v50, %v4927_v19  ;;  %v4928_v61 = vadd.f32 %v8364_v56, %v4889_v47 }
 0x34f   : > { %v4993_v3 = vmax.f32 %v4961_v46, 0.0  ;;  %v4962_v16 = vadd.f32 %v5618_v41, %v4930_v63 }
 0x350   : > { %v4991_v52 = vmax.f32 %v4959_v22, 0.0  ;;  %v4960_v55 = vadd.f32 %v5619_v13, %v4928_v61  ;;  %v5628_v13 = vld [vmem:[%s5751_s29 + $0x70] sm:$0xff] }
 0x351   : > { %5025 = vst.msk [vmem:[%s8379_s17 + $0x10] sm:$0xff] %vm2057_vm1, %v4993_v3  ;;  %v4994_v30 = vmax.f32 %v4962_v16, 0.0 }
 0x352   : > { %5023 = vst.msk [vmem:[%s8379_s17] sm:$0xff] %vm2057_vm1, %v4991_v52  ;;  %v4992_v4 = vmax.f32 %v4960_v55, 0.0 }
 0x353   : > { %5026 = vst.msk [vmem:[%s8379_s17 + $0x18] sm:$0xff] %vm2057_vm1, %v4994_v30 }
 0x354   : > { %5024 = vst.msk [vmem:[%s8379_s17 + $0x8] sm:$0xff] %vm2057_vm1, %v4992_v4  ;;  %v5629_v4 = vld [vmem:[%s5751_s29 + $0x60] sm:$0xff] }
 0x368   : > { %v5525_v11 = vpop.f32.mrb[4].mxu1 }
 0x369   : > { %v4894_v12 = vmul.f32 %v5525_v11, %v8359_v5  ;;  %v4770_v20 = vpop.f32.mrb[5].mxu1 }
 0x36a   : > { %v4892_v36 = vmul.f32 %v8359_v5, %v4770_v20  ;;  %v5526_v51 = vpop.f32.mrb[6].mxu1 }
 0x36b   : > { %v4933_v31 = vadd.f32 %v8364_v56, %v4894_v12  ;;  %v4895_v42 = vmul.f32 %v5526_v51, %v8359_v5  ;;  %v4773_v62 = vpop.f32.mrb[7].mxu1 }
 0x36c   : > { %v4931_v43 = vadd.f32 %v8364_v56, %v4892_v36  ;;  %v4893_v39 = vmul.f32 %v8359_v5, %v4773_v62  ;;  %v5630_v36 = vld [vmem:[%s5751_s29 + $0x78] sm:$0xff] }
 0x36d   : > { %v4965_v53 = vadd.f32 %v5620_v24, %v4933_v31  ;;  %v4934_v9 = vadd.f32 %v8364_v56, %v4895_v42  ;;  %v5631_v42 = vld [vmem:[%s5751_s29 + $0x68] sm:$0xff] }
 0x36e   : > { %v4963_v54 = vadd.f32 %v5621_v2, %v4931_v43  ;;  %v4932_v38 = vadd.f32 %v8364_v56, %v4893_v39 }
 0x36f   : > { %v4997_v37 = vmax.f32 %v4965_v53, 0.0  ;;  %v4966_v15 = vadd.f32 %v5622_v18, %v4934_v9 }
 0x370   : > { %v4995_v45 = vmax.f32 %v4963_v54, 0.0  ;;  %v4964_v40 = vadd.f32 %v5623_v32, %v4932_v38  ;;  %v5632_v32 = vld [vmem:[%s5751_s29 + $0x90] sm:$0xff] }
 0x371   : > { %5029 = vst.msk [vmem:[%s8379_s17 + $0x30] sm:$0xff] %vm2057_vm1, %v4997_v37  ;;  %v4998_v21 = vmax.f32 %v4966_v15, 0.0 }
 0x372   : > { %5027 = vst.msk [vmem:[%s8379_s17 + $0x20] sm:$0xff] %vm2057_vm1, %v4995_v45  ;;  %v4996_v8 = vmax.f32 %v4964_v40, 0.0 }
 0x373   : > { %5030 = vst.msk [vmem:[%s8379_s17 + $0x38] sm:$0xff] %vm2057_vm1, %v4998_v21 }
 0x374   : > { %5028 = vst.msk [vmem:[%s8379_s17 + $0x28] sm:$0xff] %vm2057_vm1, %v4996_v8  ;;  %v5633_v8 = vld [vmem:[%s5751_s29 + $0x80] sm:$0xff] }
 0x388   : > { %v5529_v23 = vpop.f32.mrb[8].mxu1 }
 0x389   : > { %v4898_v44 = vmul.f32 %v5529_v23, %v8359_v5  ;;  %v4786_v34 = vpop.f32.mrb[9].mxu1 }
 0x38a   : > { %v4896_v17 = vmul.f32 %v8359_v5, %v4786_v34  ;;  %v5530_v35 = vpop.f32.mrb[10].mxu1 }
 0x38b   : > { %v4937_v58 = vadd.f32 %v8364_v56, %v4898_v44  ;;  %v4899_v6 = vmul.f32 %v5530_v35, %v8359_v5  ;;  %v4789_v33 = vpop.f32.mrb[11].mxu1 }
 0x38c   : > { %v4935_v48 = vadd.f32 %v8364_v56, %v4896_v17  ;;  %v4897_v14 = vmul.f32 %v8359_v5, %v4789_v33  ;;  %v5634_v17 = vld [vmem:[%s5751_s29 + $0x98] sm:$0xff] }
 0x38d   : > { %v4969_v0 = vadd.f32 %v5624_v28, %v4937_v58  ;;  %v4938_v26 = vadd.f32 %v8364_v56, %v4899_v6  ;;  %v5635_v6 = vld [vmem:[%s5751_s29 + $0x88] sm:$0xff] }
 0x38e   : > { %v4967_v25 = vadd.f32 %v5625_v7, %v4935_v48  ;;  %v4936_v49 = vadd.f32 %v8364_v56, %v4897_v14 }
 0x38f   : > { %v5001_v29 = vmax.f32 %v4969_v0, 0.0  ;;  %v4970_v10 = vadd.f32 %v5626_v59, %v4938_v26 }
 0x390   : > { %v4999_v60 = vmax.f32 %v4967_v25, 0.0  ;;  %v4968_v1 = vadd.f32 %v5627_v57, %v4936_v49  ;;  %v5636_v57 = vld [vmem:[%s5751_s29 + $0xb0] sm:$0xff] }
 0x391   : > { %5033 = vst.msk [vmem:[%s8379_s17 + $0x50] sm:$0xff] %vm2057_vm1, %v5001_v29  ;;  %v5002_v19 = vmax.f32 %v4970_v10, 0.0 }
 0x392   : > { %5031 = vst.msk [vmem:[%s8379_s17 + $0x40] sm:$0xff] %vm2057_vm1, %v4999_v60  ;;  %v5000_v47 = vmax.f32 %v4968_v1, 0.0 }
 0x393   : > { %5034 = vst.msk [vmem:[%s8379_s17 + $0x58] sm:$0xff] %vm2057_vm1, %v5002_v19 }
 0x394   : > { %5032 = vst.msk [vmem:[%s8379_s17 + $0x48] sm:$0xff] %vm2057_vm1, %v5000_v47  ;;  %v5637_v47 = vld [vmem:[%s5751_s29 + $0xa0] sm:$0xff] }
 0x3a8   : > { %v5533_v27 = vpop.f32.mrb[12].mxu1 }
 0x3a9   : > { %v4902_v46 = vmul.f32 %v5533_v27, %v8359_v5  ;;  %v4802_v63 = vpop.f32.mrb[13].mxu1 }
 0x3aa   : > { %v4900_v50 = vmul.f32 %v8359_v5, %v4802_v63  ;;  %v5534_v22 = vpop.f32.mrb[14].mxu1 }
 0x3ab   : > { %v4941_v61 = vadd.f32 %v8364_v56, %v4902_v46  ;;  %v4903_v3 = vmul.f32 %v5534_v22, %v8359_v5  ;;  %v4805_v41 = vpop.f32.mrb[15].mxu1 }
 0x3ac   : > { %v4939_v16 = vadd.f32 %v8364_v56, %v4900_v50  ;;  %v4901_v52 = vmul.f32 %v8359_v5, %v4805_v41  ;;  %v5638_v50 = vld [vmem:[%s5751_s29 + $0xb8] sm:$0xff] }
 0x3ad   : > { %v4973_v55 = vadd.f32 %v5628_v13, %v4941_v61  ;;  %v4942_v30 = vadd.f32 %v8364_v56, %v4903_v3  ;;  %v5639_v3 = vld [vmem:[%s5751_s29 + $0xa8] sm:$0xff] }
 0x3ae   : > { %v4971_v11 = vadd.f32 %v5629_v4, %v4939_v16  ;;  %v4940_v12 = vadd.f32 %v8364_v56, %v4901_v52 }
 0x3af   : > { %v5005_v20 = vmax.f32 %v4973_v55, 0.0  ;;  %v4974_v51 = vadd.f32 %v5630_v36, %v4942_v30 }
 0x3b0   : > { %v5003_v31 = vmax.f32 %v4971_v11, 0.0  ;;  %v4972_v62 = vadd.f32 %v5631_v42, %v4940_v12  ;;  %v5640_v42 = vld [vmem:[%s5751_s29 + $0xd0] sm:$0xff] }
 0x3b1   : > { %5037 = vst.msk [vmem:[%s8379_s17 + $0x70] sm:$0xff] %vm2057_vm1, %v5005_v20  ;;  %v5006_v43 = vmax.f32 %v4974_v51, 0.0 }
 0x3b2   : > { %5035 = vst.msk [vmem:[%s8379_s17 + $0x60] sm:$0xff] %vm2057_vm1, %v5003_v31  ;;  %v5004_v39 = vmax.f32 %v4972_v62, 0.0 }
 0x3b3   : > { %5038 = vst.msk [vmem:[%s8379_s17 + $0x78] sm:$0xff] %vm2057_vm1, %v5006_v43 }
 0x3b4   : > { %5036 = vst.msk [vmem:[%s8379_s17 + $0x68] sm:$0xff] %vm2057_vm1, %v5004_v39  ;;  %v5641_v39 = vld [vmem:[%s5751_s29 + $0xc0] sm:$0xff] }
 0x3c4   : > { %v5537_v24 = vpop.f32.mrb[16].mxu1 }
 0x3c5   : > { %v4906_v53 = vmul.f32 %v5537_v24, %v8359_v5  ;;  %v4818_v9 = vpop.f32.mrb[17].mxu1 }
 0x3c6   : > { %v4904_v2 = vmul.f32 %v8359_v5, %v4818_v9  ;;  %v5538_v54 = vpop.f32.mrb[18].mxu1 }
 0x3c7   : > { %v4945_v38 = vadd.f32 %v8364_v56, %v4906_v53  ;;  %v4907_v37 = vmul.f32 %v5538_v54, %v8359_v5  ;;  %v4821_v18 = vpop.f32.mrb[19].mxu1 }
 0x3c8   : > { %v4943_v15 = vadd.f32 %v8364_v56, %v4904_v2  ;;  %v4905_v45 = vmul.f32 %v8359_v5, %v4821_v18  ;;  %v5642_v2 = vld [vmem:[%s5751_s29 + $0xd8] sm:$0xff] }
 0x3c9   : > { %v4977_v40 = vadd.f32 %v5632_v32, %v4945_v38  ;;  %v4946_v21 = vadd.f32 %v8364_v56, %v4907_v37  ;;  %v5643_v37 = vld [vmem:[%s5751_s29 + $0xc8] sm:$0xff] }
 0x3ca   : > { %v4975_v23 = vadd.f32 %v5633_v8, %v4943_v15  ;;  %v4944_v44 = vadd.f32 %v8364_v56, %v4905_v45 }
 0x3cb   : > { %v5009_v34 = vmax.f32 %v4977_v40, 0.0  ;;  %v4978_v35 = vadd.f32 %v5634_v17, %v4946_v21 }
 0x3cc   : > { %v5007_v58 = vmax.f32 %v4975_v23, 0.0  ;;  %v4976_v33 = vadd.f32 %v5635_v6, %v4944_v44  ;;  %v5644_v6 = vld [vmem:[%s5751_s29 + $0xf0] sm:$0xff] }
 0x3cd   : > { %5041 = vst.msk [vmem:[%s8379_s17 + $0x90] sm:$0xff] %vm2057_vm1, %v5009_v34  ;;  %v5010_v48 = vmax.f32 %v4978_v35, 0.0 }
 0x3ce   : > { %5039 = vst.msk [vmem:[%s8379_s17 + $0x80] sm:$0xff] %vm2057_vm1, %v5007_v58  ;;  %v5008_v14 = vmax.f32 %v4976_v33, 0.0 }
 0x3cf   : > { %5042 = vst.msk [vmem:[%s8379_s17 + $0x98] sm:$0xff] %vm2057_vm1, %v5010_v48 }
 0x3d0   : > { %5040 = vst.msk [vmem:[%s8379_s17 + $0x88] sm:$0xff] %vm2057_vm1, %v5008_v14  ;;  %v5541_v28 = vpop.f32.mrb[20].mxu1  ;;  %v5645_v14 = vld [vmem:[%s5751_s29 + $0xe0] sm:$0xff] }
 0x3d1   : > { %v4910_v0 = vmul.f32 %v5541_v28, %v8359_v5  ;;  %v4834_v26 = vpop.f32.mrb[21].mxu1 }
 0x3d2   : > { %v4908_v7 = vmul.f32 %v8359_v5, %v4834_v26  ;;  %v5542_v25 = vpop.f32.mrb[22].mxu1 }
 0x3d3   : > { %v4949_v49 = vadd.f32 %v8364_v56, %v4910_v0  ;;  %v4911_v29 = vmul.f32 %v5542_v25, %v8359_v5  ;;  %v4837_v59 = vpop.f32.mrb[23].mxu1 }
 0x3d4   : > { %v4947_v10 = vadd.f32 %v8364_v56, %v4908_v7  ;;  %v4909_v60 = vmul.f32 %v8359_v5, %v4837_v59  ;;  %v5646_v7 = vld [vmem:[%s5751_s29 + $0xf8] sm:$0xff] }
 0x3d5   : > { %v4981_v1 = vadd.f32 %v5636_v57, %v4949_v49  ;;  %v4950_v19 = vadd.f32 %v8364_v56, %v4911_v29  ;;  %v5647_v29 = vld [vmem:[%s5751_s29 + $0xe8] sm:$0xff] }
 0x3d6   : > { %v4979_v27 = vadd.f32 %v5637_v47, %v4947_v10  ;;  %v4948_v46 = vadd.f32 %v8364_v56, %v4909_v60 }
 0x3d7   : > { %v5013_v63 = vmax.f32 %v4981_v1, 0.0  ;;  %v4982_v22 = vadd.f32 %v5638_v50, %v4950_v19 }
 0x3d8   : > { %v5011_v61 = vmax.f32 %v4979_v27, 0.0  ;;  %v4980_v41 = vadd.f32 %v5639_v3, %v4948_v46 }
 0x3d9   : > { %5045 = vst.msk [vmem:[%s8379_s17 + $0xb0] sm:$0xff] %vm2057_vm1, %v5013_v63  ;;  %v5014_v16 = vmax.f32 %v4982_v22, 0.0 }
 0x3da   : > { %5043 = vst.msk [vmem:[%s8379_s17 + $0xa0] sm:$0xff] %vm2057_vm1, %v5011_v61  ;;  %v5012_v52 = vmax.f32 %v4980_v41, 0.0 }
 0x3db   : > { %5046 = vst.msk [vmem:[%s8379_s17 + $0xb8] sm:$0xff] %vm2057_vm1, %v5014_v16 }
 0x3dc   : > { %5044 = vst.msk [vmem:[%s8379_s17 + $0xa8] sm:$0xff] %vm2057_vm1, %v5012_v52 }
 0x3e8   : > { %v5545_v13 = vpop.f32.mrb[24].mxu1 }
 0x3e9   : > { %v4914_v55 = vmul.f32 %v5545_v13, %v8359_v5  ;;  %v4850_v30 = vpop.f32.mrb[25].mxu1 }
 0x3ea   : > { %v4912_v4 = vmul.f32 %v8359_v5, %v4850_v30  ;;  %v5546_v11 = vpop.f32.mrb[26].mxu1 }
 0x3eb   : > { %v4953_v12 = vadd.f32 %v8364_v56, %v4914_v55  ;;  %v4915_v20 = vmul.f32 %v5546_v11, %v8359_v5  ;;  %v4853_v36 = vpop.f32.mrb[27].mxu1 }
 0x3ec   : > { %v4951_v51 = vadd.f32 %v8364_v56, %v4912_v4  ;;  %v4913_v31 = vmul.f32 %v8359_v5, %v4853_v36 }
 0x3ed   : > { %v4985_v62 = vadd.f32 %v5640_v42, %v4953_v12  ;;  %v4954_v43 = vadd.f32 %v8364_v56, %v4915_v20 }
 0x3ee   : > { %v4983_v24 = vadd.f32 %v5641_v39, %v4951_v51  ;;  %v4952_v53 = vadd.f32 %v8364_v56, %v4913_v31 }
 0x3ef   : > { %v5017_v9 = vmax.f32 %v4985_v62, 0.0  ;;  %v4986_v54 = vadd.f32 %v5642_v2, %v4954_v43 }
 0x3f0   : > { %v5015_v38 = vmax.f32 %v4983_v24, 0.0  ;;  %v4984_v18 = vadd.f32 %v5643_v37, %v4952_v53 }
 0x3f1   : > { %5049 = vst.msk [vmem:[%s8379_s17 + $0xd0] sm:$0xff] %vm2057_vm1, %v5017_v9  ;;  %v5018_v15 = vmax.f32 %v4986_v54, 0.0 }
 0x3f2   : > { %5047 = vst.msk [vmem:[%s8379_s17 + $0xc0] sm:$0xff] %vm2057_vm1, %v5015_v38  ;;  %v5016_v45 = vmax.f32 %v4984_v18, 0.0 }
 0x3f3   : > { %5050 = vst.msk [vmem:[%s8379_s17 + $0xd8] sm:$0xff] %vm2057_vm1, %v5018_v15 }
 0x3f4   : > { %5048 = vst.msk [vmem:[%s8379_s17 + $0xc8] sm:$0xff] %vm2057_vm1, %v5016_v45 }
 0x40b   : > { %v5549_v32 = vpop.f32.mrb[28].mxu1 }
 0x40c   : > { %v4918_v40 = vmul.f32 %v5549_v32, %v8359_v5  ;;  %v4866_v21 = vpop.f32.mrb[29].mxu1 }
 0x40d   : > { %v4916_v8 = vmul.f32 %v8359_v5, %v4866_v21  ;;  %v5550_v23 = vpop.f32.mrb[30].mxu1 }
 0x40e   : > { %v4957_v44 = vadd.f32 %v8364_v56, %v4918_v40  ;;  %v4919_v34 = vmul.f32 %v5550_v23, %v8359_v5  ;;  %v4869_v17 = vpop.f32.mrb[31].mxu1 }
 0x40f   : > { %v4955_v35 = vadd.f32 %v8364_v56, %v4916_v8  ;;  %v4917_v58 = vmul.f32 %v8359_v5, %v4869_v17 }
 0x410   : > { %v4989_v33 = vadd.f32 %v5644_v6, %v4957_v44  ;;  %v4958_v48 = vadd.f32 %v8364_v56, %v4919_v34 }
 0x411   : > { %v4987_v28 = vadd.f32 %v5645_v14, %v4955_v35  ;;  %v4956_v0 = vadd.f32 %v8364_v56, %v4917_v58 }
 0x412   : > { %v5021_v26 = vmax.f32 %v4989_v33, 0.0  ;;  %v4990_v25 = vadd.f32 %v5646_v7, %v4958_v48 }
 0x413   : > { %v5019_v49 = vmax.f32 %v4987_v28, 0.0  ;;  %v4988_v59 = vadd.f32 %v5647_v29, %v4956_v0 }
 0x414   : > { %5053 = vst.msk [vmem:[%s8379_s17 + $0xf0] sm:$0xff] %vm2057_vm1, %v5021_v26  ;;  %v5022_v10 = vmax.f32 %v4990_v25, 0.0 }
 0x415   : > { %5051 = vst.msk [vmem:[%s8379_s17 + $0xe0] sm:$0xff] %vm2057_vm1, %v5019_v49  ;;  %v5020_v5 = vmax.f32 %v4988_v59, 0.0 }
 0x416   : > { %5054 = vst.msk [vmem:[%s8379_s17 + $0xf8] sm:$0xff] %vm2057_vm1, %v5022_v10 }
 0x417   : > { %5052 = vst.msk [vmem:[%s8379_s17 + $0xe8] sm:$0xff] %vm2057_vm1, %v5020_v5 }
 0x418 PF: > { %s17_s24 = sadd.s32 1, %s5654_s24  }
 0x419   : > { %p14_p4 = scmp.ge.s32.totalorder %s17_s24, 4  }
 0x41b   :  { %16 = sbr.rel (!%p14_p4) target bundleno = 1 (0x1), region = 82 }

</bundles_post_ra>
